<compile_context>
chip_gen: v5e
topology: v5e:2x2
jax: 0.10.0
libtpu: 0.0.40
codegen_flags: <defaults>
</compile_context>

<pallas_src>
import jax
import jax.numpy as jnp
from jax import lax
from jax.experimental import pallas as pl
from jax.experimental.pallas import tpu as pltpu

NEG_SLOPE = 0.33
C_MID = 8      # hidden edge channels of both E2E layers
C_OUT = 256    # output channels of the E2N layer


def _leaky(x):
    return jnp.where(x >= 0, x, NEG_SLOPE * x)


# ---------------------------------------------------------------------------
# Fused Pallas kernel:  E2E(1,8) -> LReLU -> E2E(8,8) -> LReLU -> E2N -> LReLU
# ---------------------------------------------------------------------------
def _fused_kernel(a_ref, w1a_ref, w1bt_ref, w2a_ref, w2bt_ref, w3_hbm_ref,
                  bias1_ref, bias2_ref, bias3_ref, out_ref,
                  xbuf_ref, w3_vmem_ref, w3_sem):
    """All activations VMEM resident; slabs stored once into a j-stacked buffer.

    a_ref     : (Ni, Nj)          zero-padded input adjacency (rows i, cols j)
    w1a_ref   : (8, Ni)           W1a[o, i]
    w1bt_ref  : (Nj, 8)           W1b transposed -> [j, o]
    w2a_ref   : (8, 8, Ni)        W2a[c, o, i]
    w2bt_ref  : (8*Nj, 8)         W2b flattened  -> [(c, j), o]
    w3_hbm    : (256, 8*Nj) HBM   W3 flattened   -> [o, (c, j)]
    bias1/2   : (8,)   SMEM       combined conv biases of each E2E layer (ba + bb)
    bias3     : (256, 1)          E2N bias
    out_ref   : (256, Ni)         y[o, i]   (valid for i < N)
    xbuf_ref  : (Ni, 8*Nj) VMEM   j-stacked slab buffer (x1, then reused for x2)
    w3_vmem   : (256, 8*Nj) VMEM  landing buffer for the manual w3 DMA
    w3_sem    : DMA semaphore
    """
    f32 = jnp.float32
    ni, nj = a_ref.shape

    # Kick off the (large) w3 fetch first; it overlaps all of the layer-1/2 work.
    w3_copy = pltpu.make_async_copy(w3_hbm_ref, w3_vmem_ref, w3_sem)
    w3_copy.start()

    a = a_ref[...]

    # ---- E2E layer 1 projections --------------------------------------------
    # a1[o, j] = sum_i W1a[o, i] * A[i, j]
    # b1[i, o] = sum_j A[i, j]   * W1b[o, j]
    a1 = jnp.dot(w1a_ref[...], a, preferred_element_type=f32)       # (8, Nj)
    b1 = jnp.dot(a, w1bt_ref[...], preferred_element_type=f32)      # (Ni, 8)

    # ---- build x1 slabs (stored once, j-stacked); accumulate a2 on the fly ---
    a2 = jnp.zeros((C_MID, nj), f32)                                 # a2[o, j]
    for c in range(C_MID):
        # x1[c][i, j] = leaky(a1[c, j] + b1[i, c] + bias1[c])
        x1c = _leaky(b1[:, c:c + 1] + a1[c:c + 1, :] + bias1_ref[c])  # (Ni, Nj)
        xbuf_ref[:, c * nj:(c + 1) * nj] = x1c
        a2 = a2 + jnp.dot(w2a_ref[c], x1c, preferred_element_type=f32)

    # ---- layer-2 "b" projection: ONE long-K matmul over the stacked buffer ---
    # b2[i, o] = sum_{c,j} x1[c, i, j] * W2b[c, o, j]
    b2 = jnp.dot(xbuf_ref[...], w2bt_ref[...], preferred_element_type=f32)  # (Ni, 8)

    # ---- build x2 slabs, overwriting the stacked buffer (x1 no longer needed)
    for c in range(C_MID):
        xbuf_ref[:, c * nj:(c + 1) * nj] = _leaky(
            b2[:, c:c + 1] + a2[c:c + 1, :] + bias2_ref[c])

    # ---- E2N: single long-K (K = 8*Nj) NT matmul + bias/LeakyReLU epilogue ---
    w3_copy.wait()
    nt = (((1,), (1,)), ((), ()))      # contract both operands on their last dim
    acc = lax.dot_general(w3_vmem_ref[...], xbuf_ref[...], nt,
                          preferred_element_type=f32)                # (256, Ni)
    out_ref[...] = _leaky(acc + bias3_ref[...])


# ---------------------------------------------------------------------------
# Wrapper
# ---------------------------------------------------------------------------
def _round_up(x, m):
    return (x + m - 1) // m * m


def node_alignment_choose(A, params, nodes):
    """A: any array with nodes*nodes elements (e.g. (1,1,N,N)). Returns (N, 256)."""
    f32 = jnp.float32
    N = nodes
    Ni = _round_up(max(N, 8), 8)        # node-row (sublane) padding
    Nj = _round_up(max(N, 128), 128)    # node-col (lane) padding
    pi, pj = Ni - N, Nj - N

    # Zero-padded input (valid region [:N, :N]).
    a_pad = jnp.pad(A.reshape(N, N).astype(f32), ((0, pi), (0, pj)))

    # Weight prep: tiny weight-only reshapes / transposes (no activation work).
    # Zero padding along every contraction dim keeps padded activation junk out
    # of all valid output elements.
    w1a = jnp.pad(params["w1a"][:, 0, :, 0].astype(f32),
                  ((0, 0), (0, pi)))                                   # (8, Ni)   [o, i]
    w1bt = jnp.pad(params["w1b"][:, 0, 0, :].astype(f32),
                   ((0, 0), (0, pj))).T                                # (Nj, 8)   [j, o]
    w2a = jnp.pad(jnp.transpose(params["w2a"][:, :, :, 0].astype(f32),
                                (1, 0, 2)),
                  ((0, 0), (0, 0), (0, pi)))                           # (8, 8, Ni) [c, o, i]
    w2bt = jnp.pad(jnp.transpose(params["w2b"][:, :, 0, :].astype(f32),
                                 (1, 2, 0)),
                   ((0, 0), (0, pj), (0, 0))
                   ).reshape(C_MID * Nj, C_MID)                        # (8*Nj, 8)  [(c,j), o]
    w3 = jnp.pad(params["w3"][:, :, 0, :].astype(f32),
                 ((0, 0), (0, 0), (0, pj))
                 ).reshape(C_OUT, C_MID * Nj)                          # (256, 8*Nj) [o, (c,j)]

    bias1 = (params["b1a"] + params["b1b"]).astype(f32)                # (8,)
    bias2 = (params["b2a"] + params["b2b"]).astype(f32)                # (8,)
    bias3 = params["b3"].astype(f32).reshape(C_OUT, 1)                 # (256, 1)

    y = pl.pallas_call(
        _fused_kernel,
        out_shape=jax.ShapeDtypeStruct((C_OUT, Ni), f32),
        grid=(1,),
        in_specs=[
            pl.BlockSpec((Ni, Nj), lambda i: (0, 0)),                  # A
            pl.BlockSpec((C_MID, Ni), lambda i: (0, 0)),               # w1a
            pl.BlockSpec((Nj, C_MID), lambda i: (0, 0)),               # w1b^T
            pl.BlockSpec((C_MID, C_MID, Ni), lambda i: (0, 0, 0)),     # w2a
            pl.BlockSpec((C_MID * Nj, C_MID), lambda i: (0, 0)),       # w2b^T (flattened)
            pl.BlockSpec(memory_space=pl.ANY),                         # w3 (HBM, manual DMA)
            pl.BlockSpec(memory_space=pltpu.MemorySpace.SMEM),         # bias1 (8,)
            pl.BlockSpec(memory_space=pltpu.MemorySpace.SMEM),         # bias2 (8,)
            pl.BlockSpec((C_OUT, 1), lambda i: (0, 0)),                # bias3
        ],
        out_specs=pl.BlockSpec((C_OUT, Ni), lambda i: (0, 0)),
        scratch_shapes=[
            pltpu.VMEM((Ni, C_MID * Nj), f32),        # j-stacked slab buffer
            pltpu.VMEM((C_OUT, C_MID * Nj), f32),     # w3 landing buffer
            pltpu.SemaphoreType.DMA(()),              # w3 DMA completion
        ],
        compiler_params=pltpu.CompilerParams(
            dimension_semantics=("arbitrary",),
            vmem_limit_bytes=32 * 1024 * 1024,
        ),
    )(a_pad, w1a, w1bt, w2a, w2bt, w3, bias1, bias2, bias3)

    # torch: x.reshape(nodes, -1) on the contiguous (1, 256, N, 1) result -- a
    # flat C-order reinterpretation of the (256, N) slab (wrapper glue only).
    return y[:, :N].reshape(N, C_OUT)


# ---------------------------------------------------------------------------
# Parameters + pure-JAX reference (mirrors the PyTorch semantics)
# ---------------------------------------------------------------------------
def init_params(key, nodes):
    N = nodes
    ks = jax.random.split(key, 10)
    scale = 0.1

    def rnd(k, shape):
        return (scale * jax.random.normal(k, shape)).astype(jnp.float32)

    return {
        # E2E(1, 8): conv1xd (8,1,N,1), convdx1 (8,1,1,N)
        "w1a": rnd(ks[0], (8, 1, N, 1)), "b1a": rnd(ks[1], (8,)),
        "w1b": rnd(ks[2], (8, 1, 1, N)), "b1b": rnd(ks[3], (8,)),
        # E2E(8, 8): conv1xd (8,8,N,1), convdx1 (8,8,1,N)
        "w2a": rnd(ks[4], (8, 8, N, 1)), "b2a": rnd(ks[5], (8,)),
        "w2b": rnd(ks[6], (8, 8, 1, N)), "b2b": rnd(ks[7], (8,)),
        # e2n: Conv2d(8, 256, (1, N))
        "w3": rnd(ks[8], (256, 8, 1, N)), "b3": rnd(ks[9], (256,)),
    }


def reference_forward(A, params, nodes):
    N = nodes
    hp = jax.lax.Precision.HIGHEST
    x = A.reshape(1, N, N).astype(jnp.float32)

    def e2e(x, wa, ba, wb, bb):
        a = jnp.einsum("oci,cij->oj", wa[..., 0], x, precision=hp) + ba[:, None]
        b = jnp.einsum("ocj,cij->oi", wb[:, :, 0, :], x, precision=hp) + bb[:, None]
        return _leaky(a[:, None, :] + b[:, :, None])

    x = e2e(x, params["w1a"], params["b1a"], params["w1b"], params["b1b"])
    x = e2e(x, params["w2a"], params["b2a"], params["w2b"], params["b2b"])
    y = jnp.einsum("ocj,cij->oi", params["w3"][:, :, 0, :], x,
                   precision=hp) + params["b3"][:, None]
    y = _leaky(y)
    return y.reshape(N, 256)


if __name__ == "__main__":
    nodes = 20  # small shape consistent with the module (default was 150);
                # exercises both the row (8-) and col (128-) padding paths.
    key = jax.random.PRNGKey(0)
    k_param, k_input = jax.random.split(key)

    params = init_params(k_param, nodes)
    A = jax.random.normal(k_input, (1, 1, nodes, nodes), dtype=jnp.float32)

    fwd = jax.jit(lambda a: node_alignment_choose(a, params, nodes))
    out = jax.block_until_ready(fwd(A))

    ref = reference_forward(A, params, nodes)
    assert out.shape == (nodes, C_OUT), out.shape
    assert jnp.allclose(out, ref, atol=1e-3, rtol=1e-3), (
        "mismatch vs reference, max abs err = %e"
        % float(jnp.max(jnp.abs(out - ref))))

    print("KERNEL_OK")
</pallas_src>

<mosaic_0001>
module attributes {stable_mosaic.version = 11 : i64} {
  func.func @_fused_kernel(%arg0: i32, %arg1: memref<24x128xf32, #tpu.memory_space<vmem>>, %arg2: memref<8x24xf32, #tpu.memory_space<vmem>>, %arg3: memref<128x8xf32, #tpu.memory_space<vmem>>, %arg4: memref<8x8x24xf32, #tpu.memory_space<vmem>>, %arg5: memref<1024x8xf32, #tpu.memory_space<vmem>>, %arg6: memref<256x1024xf32, #tpu.memory_space<any>>, %arg7: memref<8xf32, #tpu.memory_space<smem>>, %arg8: memref<8xf32, #tpu.memory_space<smem>>, %arg9: memref<256x1xf32, #tpu.memory_space<vmem>>, %arg10: memref<256x24xf32, #tpu.memory_space<vmem>>, %arg11: memref<24x1024xf32, #tpu.memory_space<vmem>>, %arg12: memref<256x1024xf32, #tpu.memory_space<vmem>>, %arg13: memref<!tpu.dma_semaphore, #tpu.memory_space<semaphore_mem>>) attributes {dimension_semantics = [#tpu.dimension_semantics<arbitrary>], iteration_bounds = array<i64: 1>, scalar_prefetch = 0 : i64, scratch_operands = 3 : i64, tpu.core_type = #tpu.core_type<tc>, window_params = [{pipeline_mode = #tpu.pipeline_mode<synchronous>, transform_indices = @transform_0, window_bounds = array<i64: 24, 128>}, {pipeline_mode = #tpu.pipeline_mode<synchronous>, transform_indices = @transform_1, window_bounds = array<i64: 8, 24>}, {pipeline_mode = #tpu.pipeline_mode<synchronous>, transform_indices = @transform_2, window_bounds = array<i64: 128, 8>}, {pipeline_mode = #tpu.pipeline_mode<synchronous>, transform_indices = @transform_3, window_bounds = array<i64: 8, 8, 24>}, {pipeline_mode = #tpu.pipeline_mode<synchronous>, transform_indices = @transform_4, window_bounds = array<i64: 1024, 8>}, {}, {transform_indices = @transform_6, window_bounds = array<i64: 8>}, {transform_indices = @transform_7, window_bounds = array<i64: 8>}, {pipeline_mode = #tpu.pipeline_mode<synchronous>, transform_indices = @transform_8, window_bounds = array<i64: 256, 1>}, {pipeline_mode = #tpu.pipeline_mode<synchronous>, transform_indices = @transform_9, window_bounds = array<i64: 256, 24>}]} {
    tpu.enqueue_dma source(%arg6 : memref<256x1024xf32, #tpu.memory_space<any>>) target(%arg12 : memref<256x1024xf32, #tpu.memory_space<vmem>>) target_semaphore(%arg13 : memref<!tpu.dma_semaphore, #tpu.memory_space<semaphore_mem>>)
    %c0 = arith.constant 0 : index
    %c0_0 = arith.constant 0 : index
    %0 = vector.load %arg1[%c0, %c0_0] : memref<24x128xf32, #tpu.memory_space<vmem>>, vector<24x128xf32>
    %c0_1 = arith.constant 0 : index
    %c0_2 = arith.constant 0 : index
    %1 = vector.load %arg2[%c0_1, %c0_2] : memref<8x24xf32, #tpu.memory_space<vmem>>, vector<8x24xf32>
    %cst = arith.constant dense<0.000000e+00> : vector<8x128xf32>
    %2 = tpu.matmul %1, %0, %cst {dimension_numbers = #tpu.dot_dimension_numbers<[1], [0], [0], [1], [0, 0, 1, 1], [], []>} : vector<8x24xf32>, vector<24x128xf32>, vector<8x128xf32> -> vector<8x128xf32>
    %c0_3 = arith.constant 0 : index
    %c0_4 = arith.constant 0 : index
    %3 = vector.load %arg3[%c0_3, %c0_4] : memref<128x8xf32, #tpu.memory_space<vmem>>, vector<128x8xf32>
    %cst_5 = arith.constant dense<0.000000e+00> : vector<24x8xf32>
    %4 = tpu.matmul %0, %3, %cst_5 {dimension_numbers = #tpu.dot_dimension_numbers<[1], [0], [0], [1], [0, 0, 1, 1], [], []>} : vector<24x128xf32>, vector<128x8xf32>, vector<24x8xf32> -> vector<24x8xf32>
    %cst_6 = arith.constant 0.000000e+00 : f32
    %5 = vector.broadcast %cst_6 : f32 to vector<8x128xf32>
    %6 = vector.extract_strided_slice %4 {offsets = [0, 0], sizes = [24, 1], strides = [1, 1]} : vector<24x8xf32> to vector<24x1xf32>
    %7 = vector.extract_strided_slice %2 {offsets = [0, 0], sizes = [1, 128], strides = [1, 1]} : vector<8x128xf32> to vector<1x128xf32>
    %8 = vector.broadcast %6 : vector<24x1xf32> to vector<24x128xf32>
    %9 = vector.broadcast %7 : vector<1x128xf32> to vector<24x128xf32>
    %10 = arith.addf %8, %9 : vector<24x128xf32>
    %c0_7 = arith.constant 0 : index
    %11 = memref.load %arg7[%c0_7] : memref<8xf32, #tpu.memory_space<smem>>
    %12 = vector.broadcast %11 : f32 to vector<24x128xf32>
    %13 = arith.addf %10, %12 : vector<24x128xf32>
    %cst_8 = arith.constant 0.000000e+00 : f32
    %14 = vector.broadcast %cst_8 : f32 to vector<24x128xf32>
    %15 = arith.cmpf oge, %13, %14 : vector<24x128xf32>
    %cst_9 = arith.constant 3.300000e-01 : f32
    %16 = vector.broadcast %cst_9 : f32 to vector<24x128xf32>
    %17 = arith.mulf %16, %13 : vector<24x128xf32>
    %18 = arith.select %15, %13, %17 : vector<24x128xi1>, vector<24x128xf32>
    %c0_10 = arith.constant 0 : index
    %c0_11 = arith.constant 0 : index
    %19 = vector.load %arg11[%c0_10, %c0_11] : memref<24x1024xf32, #tpu.memory_space<vmem>>, vector<24x128xf32>
    tpu.vector_store %arg11[%c0_10, %c0_11], %18 {strides = array<i32>} : memref<24x1024xf32, #tpu.memory_space<vmem>>, vector<24x128xf32>,
    %c0_12 = arith.constant 0 : index
    %c0_13 = arith.constant 0 : index
    %c0_14 = arith.constant 0 : index
    %20 = vector.load %arg4[%c0_12, %c0_13, %c0_14] : memref<8x8x24xf32, #tpu.memory_space<vmem>>, vector<1x8x24xf32>
    %21 = vector.shape_cast %20 : vector<1x8x24xf32> to vector<8x24xf32>
    %cst_15 = arith.constant dense<0.000000e+00> : vector<8x128xf32>
    %22 = tpu.matmul %21, %18, %cst_15 {dimension_numbers = #tpu.dot_dimension_numbers<[1], [0], [0], [1], [0, 0, 1, 1], [], []>} : vector<8x24xf32>, vector<24x128xf32>, vector<8x128xf32> -> vector<8x128xf32>
    %23 = arith.addf %5, %22 : vector<8x128xf32>
    %24 = vector.extract_strided_slice %4 {offsets = [0, 1], sizes = [24, 1], strides = [1, 1]} : vector<24x8xf32> to vector<24x1xf32>
    %25 = vector.extract_strided_slice %2 {offsets = [1, 0], sizes = [1, 128], strides = [1, 1]} : vector<8x128xf32> to vector<1x128xf32>
    %26 = vector.broadcast %24 : vector<24x1xf32> to vector<24x128xf32>
    %27 = vector.broadcast %25 : vector<1x128xf32> to vector<24x128xf32>
    %28 = arith.addf %26, %27 : vector<24x128xf32>
    %c1 = arith.constant 1 : index
    %29 = memref.load %arg7[%c1] : memref<8xf32, #tpu.memory_space<smem>>
    %30 = vector.broadcast %29 : f32 to vector<24x128xf32>
    %31 = arith.addf %28, %30 : vector<24x128xf32>
    %cst_16 = arith.constant 0.000000e+00 : f32
    %32 = vector.broadcast %cst_16 : f32 to vector<24x128xf32>
    %33 = arith.cmpf oge, %31, %32 : vector<24x128xf32>
    %cst_17 = arith.constant 3.300000e-01 : f32
    %34 = vector.broadcast %cst_17 : f32 to vector<24x128xf32>
    %35 = arith.mulf %34, %31 : vector<24x128xf32>
    %36 = arith.select %33, %31, %35 : vector<24x128xi1>, vector<24x128xf32>
    %c0_18 = arith.constant 0 : index
    %c128 = arith.constant 128 : index
    %37 = vector.load %arg11[%c0_18, %c128] : memref<24x1024xf32, #tpu.memory_space<vmem>>, vector<24x128xf32>
    tpu.vector_store %arg11[%c0_18, %c128], %36 {strides = array<i32>} : memref<24x1024xf32, #tpu.memory_space<vmem>>, vector<24x128xf32>,
    %c1_19 = arith.constant 1 : index
    %c0_20 = arith.constant 0 : index
    %c0_21 = arith.constant 0 : index
    %38 = vector.load %arg4[%c1_19, %c0_20, %c0_21] : memref<8x8x24xf32, #tpu.memory_space<vmem>>, vector<1x8x24xf32>
    %39 = vector.shape_cast %38 : vector<1x8x24xf32> to vector<8x24xf32>
    %cst_22 = arith.constant dense<0.000000e+00> : vector<8x128xf32>
    %40 = tpu.matmul %39, %36, %cst_22 {dimension_numbers = #tpu.dot_dimension_numbers<[1], [0], [0], [1], [0, 0, 1, 1], [], []>} : vector<8x24xf32>, vector<24x128xf32>, vector<8x128xf32> -> vector<8x128xf32>
    %41 = arith.addf %23, %40 : vector<8x128xf32>
    %42 = vector.extract_strided_slice %4 {offsets = [0, 2], sizes = [24, 1], strides = [1, 1]} : vector<24x8xf32> to vector<24x1xf32>
    %43 = vector.extract_strided_slice %2 {offsets = [2, 0], sizes = [1, 128], strides = [1, 1]} : vector<8x128xf32> to vector<1x128xf32>
    %44 = vector.broadcast %42 : vector<24x1xf32> to vector<24x128xf32>
    %45 = vector.broadcast %43 : vector<1x128xf32> to vector<24x128xf32>
    %46 = arith.addf %44, %45 : vector<24x128xf32>
    %c2 = arith.constant 2 : index
    %47 = memref.load %arg7[%c2] : memref<8xf32, #tpu.memory_space<smem>>
    %48 = vector.broadcast %47 : f32 to vector<24x128xf32>
    %49 = arith.addf %46, %48 : vector<24x128xf32>
    %cst_23 = arith.constant 0.000000e+00 : f32
    %50 = vector.broadcast %cst_23 : f32 to vector<24x128xf32>
    %51 = arith.cmpf oge, %49, %50 : vector<24x128xf32>
    %cst_24 = arith.constant 3.300000e-01 : f32
    %52 = vector.broadcast %cst_24 : f32 to vector<24x128xf32>
    %53 = arith.mulf %52, %49 : vector<24x128xf32>
    %54 = arith.select %51, %49, %53 : vector<24x128xi1>, vector<24x128xf32>
    %c0_25 = arith.constant 0 : index
    %c256 = arith.constant 256 : index
    %55 = vector.load %arg11[%c0_25, %c256] : memref<24x1024xf32, #tpu.memory_space<vmem>>, vector<24x128xf32>
    tpu.vector_store %arg11[%c0_25, %c256], %54 {strides = array<i32>} : memref<24x1024xf32, #tpu.memory_space<vmem>>, vector<24x128xf32>,
    %c2_26 = arith.constant 2 : index
    %c0_27 = arith.constant 0 : index
    %c0_28 = arith.constant 0 : index
    %56 = vector.load %arg4[%c2_26, %c0_27, %c0_28] : memref<8x8x24xf32, #tpu.memory_space<vmem>>, vector<1x8x24xf32>
    %57 = vector.shape_cast %56 : vector<1x8x24xf32> to vector<8x24xf32>
    %cst_29 = arith.constant dense<0.000000e+00> : vector<8x128xf32>
    %58 = tpu.matmul %57, %54, %cst_29 {dimension_numbers = #tpu.dot_dimension_numbers<[1], [0], [0], [1], [0, 0, 1, 1], [], []>} : vector<8x24xf32>, vector<24x128xf32>, vector<8x128xf32> -> vector<8x128xf32>
    %59 = arith.addf %41, %58 : vector<8x128xf32>
    %60 = vector.extract_strided_slice %4 {offsets = [0, 3], sizes = [24, 1], strides = [1, 1]} : vector<24x8xf32> to vector<24x1xf32>
    %61 = vector.extract_strided_slice %2 {offsets = [3, 0], sizes = [1, 128], strides = [1, 1]} : vector<8x128xf32> to vector<1x128xf32>
    %62 = vector.broadcast %60 : vector<24x1xf32> to vector<24x128xf32>
    %63 = vector.broadcast %61 : vector<1x128xf32> to vector<24x128xf32>
    %64 = arith.addf %62, %63 : vector<24x128xf32>
    %c3 = arith.constant 3 : index
    %65 = memref.load %arg7[%c3] : memref<8xf32, #tpu.memory_space<smem>>
    %66 = vector.broadcast %65 : f32 to vector<24x128xf32>
    %67 = arith.addf %64, %66 : vector<24x128xf32>
    %cst_30 = arith.constant 0.000000e+00 : f32
    %68 = vector.broadcast %cst_30 : f32 to vector<24x128xf32>
    %69 = arith.cmpf oge, %67, %68 : vector<24x128xf32>
    %cst_31 = arith.constant 3.300000e-01 : f32
    %70 = vector.broadcast %cst_31 : f32 to vector<24x128xf32>
    %71 = arith.mulf %70, %67 : vector<24x128xf32>
    %72 = arith.select %69, %67, %71 : vector<24x128xi1>, vector<24x128xf32>
    %c0_32 = arith.constant 0 : index
    %c384 = arith.constant 384 : index
    %73 = vector.load %arg11[%c0_32, %c384] : memref<24x1024xf32, #tpu.memory_space<vmem>>, vector<24x128xf32>
    tpu.vector_store %arg11[%c0_32, %c384], %72 {strides = array<i32>} : memref<24x1024xf32, #tpu.memory_space<vmem>>, vector<24x128xf32>,
    %c3_33 = arith.constant 3 : index
    %c0_34 = arith.constant 0 : index
    %c0_35 = arith.constant 0 : index
    %74 = vector.load %arg4[%c3_33, %c0_34, %c0_35] : memref<8x8x24xf32, #tpu.memory_space<vmem>>, vector<1x8x24xf32>
    %75 = vector.shape_cast %74 : vector<1x8x24xf32> to vector<8x24xf32>
    %cst_36 = arith.constant dense<0.000000e+00> : vector<8x128xf32>
    %76 = tpu.matmul %75, %72, %cst_36 {dimension_numbers = #tpu.dot_dimension_numbers<[1], [0], [0], [1], [0, 0, 1, 1], [], []>} : vector<8x24xf32>, vector<24x128xf32>, vector<8x128xf32> -> vector<8x128xf32>
    %77 = arith.addf %59, %76 : vector<8x128xf32>
    %78 = vector.extract_strided_slice %4 {offsets = [0, 4], sizes = [24, 1], strides = [1, 1]} : vector<24x8xf32> to vector<24x1xf32>
    %79 = vector.extract_strided_slice %2 {offsets = [4, 0], sizes = [1, 128], strides = [1, 1]} : vector<8x128xf32> to vector<1x128xf32>
    %80 = vector.broadcast %78 : vector<24x1xf32> to vector<24x128xf32>
    %81 = vector.broadcast %79 : vector<1x128xf32> to vector<24x128xf32>
    %82 = arith.addf %80, %81 : vector<24x128xf32>
    %c4 = arith.constant 4 : index
    %83 = memref.load %arg7[%c4] : memref<8xf32, #tpu.memory_space<smem>>
    %84 = vector.broadcast %83 : f32 to vector<24x128xf32>
    %85 = arith.addf %82, %84 : vector<24x128xf32>
    %cst_37 = arith.constant 0.000000e+00 : f32
    %86 = vector.broadcast %cst_37 : f32 to vector<24x128xf32>
    %87 = arith.cmpf oge, %85, %86 : vector<24x128xf32>
    %cst_38 = arith.constant 3.300000e-01 : f32
    %88 = vector.broadcast %cst_38 : f32 to vector<24x128xf32>
    %89 = arith.mulf %88, %85 : vector<24x128xf32>
    %90 = arith.select %87, %85, %89 : vector<24x128xi1>, vector<24x128xf32>
    %c0_39 = arith.constant 0 : index
    %c512 = arith.constant 512 : index
    %91 = vector.load %arg11[%c0_39, %c512] : memref<24x1024xf32, #tpu.memory_space<vmem>>, vector<24x128xf32>
    tpu.vector_store %arg11[%c0_39, %c512], %90 {strides = array<i32>} : memref<24x1024xf32, #tpu.memory_space<vmem>>, vector<24x128xf32>,
    %c4_40 = arith.constant 4 : index
    %c0_41 = arith.constant 0 : index
    %c0_42 = arith.constant 0 : index
    %92 = vector.load %arg4[%c4_40, %c0_41, %c0_42] : memref<8x8x24xf32, #tpu.memory_space<vmem>>, vector<1x8x24xf32>
    %93 = vector.shape_cast %92 : vector<1x8x24xf32> to vector<8x24xf32>
    %cst_43 = arith.constant dense<0.000000e+00> : vector<8x128xf32>
    %94 = tpu.matmul %93, %90, %cst_43 {dimension_numbers = #tpu.dot_dimension_numbers<[1], [0], [0], [1], [0, 0, 1, 1], [], []>} : vector<8x24xf32>, vector<24x128xf32>, vector<8x128xf32> -> vector<8x128xf32>
    %95 = arith.addf %77, %94 : vector<8x128xf32>
    %96 = vector.extract_strided_slice %4 {offsets = [0, 5], sizes = [24, 1], strides = [1, 1]} : vector<24x8xf32> to vector<24x1xf32>
    %97 = vector.extract_strided_slice %2 {offsets = [5, 0], sizes = [1, 128], strides = [1, 1]} : vector<8x128xf32> to vector<1x128xf32>
    %98 = vector.broadcast %96 : vector<24x1xf32> to vector<24x128xf32>
    %99 = vector.broadcast %97 : vector<1x128xf32> to vector<24x128xf32>
    %100 = arith.addf %98, %99 : vector<24x128xf32>
    %c5 = arith.constant 5 : index
    %101 = memref.load %arg7[%c5] : memref<8xf32, #tpu.memory_space<smem>>
    %102 = vector.broadcast %101 : f32 to vector<24x128xf32>
    %103 = arith.addf %100, %102 : vector<24x128xf32>
    %cst_44 = arith.constant 0.000000e+00 : f32
    %104 = vector.broadcast %cst_44 : f32 to vector<24x128xf32>
    %105 = arith.cmpf oge, %103, %104 : vector<24x128xf32>
    %cst_45 = arith.constant 3.300000e-01 : f32
    %106 = vector.broadcast %cst_45 : f32 to vector<24x128xf32>
    %107 = arith.mulf %106, %103 : vector<24x128xf32>
    %108 = arith.select %105, %103, %107 : vector<24x128xi1>, vector<24x128xf32>
    %c0_46 = arith.constant 0 : index
    %c640 = arith.constant 640 : index
    %109 = vector.load %arg11[%c0_46, %c640] : memref<24x1024xf32, #tpu.memory_space<vmem>>, vector<24x128xf32>
    tpu.vector_store %arg11[%c0_46, %c640], %108 {strides = array<i32>} : memref<24x1024xf32, #tpu.memory_space<vmem>>, vector<24x128xf32>,
    %c5_47 = arith.constant 5 : index
    %c0_48 = arith.constant 0 : index
    %c0_49 = arith.constant 0 : index
    %110 = vector.load %arg4[%c5_47, %c0_48, %c0_49] : memref<8x8x24xf32, #tpu.memory_space<vmem>>, vector<1x8x24xf32>
    %111 = vector.shape_cast %110 : vector<1x8x24xf32> to vector<8x24xf32>
    %cst_50 = arith.constant dense<0.000000e+00> : vector<8x128xf32>
    %112 = tpu.matmul %111, %108, %cst_50 {dimension_numbers = #tpu.dot_dimension_numbers<[1], [0], [0], [1], [0, 0, 1, 1], [], []>} : vector<8x24xf32>, vector<24x128xf32>, vector<8x128xf32> -> vector<8x128xf32>
    %113 = arith.addf %95, %112 : vector<8x128xf32>
    %114 = vector.extract_strided_slice %4 {offsets = [0, 6], sizes = [24, 1], strides = [1, 1]} : vector<24x8xf32> to vector<24x1xf32>
    %115 = vector.extract_strided_slice %2 {offsets = [6, 0], sizes = [1, 128], strides = [1, 1]} : vector<8x128xf32> to vector<1x128xf32>
    %116 = vector.broadcast %114 : vector<24x1xf32> to vector<24x128xf32>
    %117 = vector.broadcast %115 : vector<1x128xf32> to vector<24x128xf32>
    %118 = arith.addf %116, %117 : vector<24x128xf32>
    %c6 = arith.constant 6 : index
    %119 = memref.load %arg7[%c6] : memref<8xf32, #tpu.memory_space<smem>>
    %120 = vector.broadcast %119 : f32 to vector<24x128xf32>
    %121 = arith.addf %118, %120 : vector<24x128xf32>
    %cst_51 = arith.constant 0.000000e+00 : f32
    %122 = vector.broadcast %cst_51 : f32 to vector<24x128xf32>
    %123 = arith.cmpf oge, %121, %122 : vector<24x128xf32>
    %cst_52 = arith.constant 3.300000e-01 : f32
    %124 = vector.broadcast %cst_52 : f32 to vector<24x128xf32>
    %125 = arith.mulf %124, %121 : vector<24x128xf32>
    %126 = arith.select %123, %121, %125 : vector<24x128xi1>, vector<24x128xf32>
    %c0_53 = arith.constant 0 : index
    %c768 = arith.constant 768 : index
    %127 = vector.load %arg11[%c0_53, %c768] : memref<24x1024xf32, #tpu.memory_space<vmem>>, vector<24x128xf32>
    tpu.vector_store %arg11[%c0_53, %c768], %126 {strides = array<i32>} : memref<24x1024xf32, #tpu.memory_space<vmem>>, vector<24x128xf32>,
    %c6_54 = arith.constant 6 : index
    %c0_55 = arith.constant 0 : index
    %c0_56 = arith.constant 0 : index
    %128 = vector.load %arg4[%c6_54, %c0_55, %c0_56] : memref<8x8x24xf32, #tpu.memory_space<vmem>>, vector<1x8x24xf32>
    %129 = vector.shape_cast %128 : vector<1x8x24xf32> to vector<8x24xf32>
    %cst_57 = arith.constant dense<0.000000e+00> : vector<8x128xf32>
    %130 = tpu.matmul %129, %126, %cst_57 {dimension_numbers = #tpu.dot_dimension_numbers<[1], [0], [0], [1], [0, 0, 1, 1], [], []>} : vector<8x24xf32>, vector<24x128xf32>, vector<8x128xf32> -> vector<8x128xf32>
    %131 = arith.addf %113, %130 : vector<8x128xf32>
    %132 = vector.extract_strided_slice %4 {offsets = [0, 7], sizes = [24, 1], strides = [1, 1]} : vector<24x8xf32> to vector<24x1xf32>
    %133 = vector.extract_strided_slice %2 {offsets = [7, 0], sizes = [1, 128], strides = [1, 1]} : vector<8x128xf32> to vector<1x128xf32>
    %134 = vector.broadcast %132 : vector<24x1xf32> to vector<24x128xf32>
    %135 = vector.broadcast %133 : vector<1x128xf32> to vector<24x128xf32>
    %136 = arith.addf %134, %135 : vector<24x128xf32>
    %c7 = arith.constant 7 : index
    %137 = memref.load %arg7[%c7] : memref<8xf32, #tpu.memory_space<smem>>
    %138 = vector.broadcast %137 : f32 to vector<24x128xf32>
    %139 = arith.addf %136, %138 : vector<24x128xf32>
    %cst_58 = arith.constant 0.000000e+00 : f32
    %140 = vector.broadcast %cst_58 : f32 to vector<24x128xf32>
    %141 = arith.cmpf oge, %139, %140 : vector<24x128xf32>
    %cst_59 = arith.constant 3.300000e-01 : f32
    %142 = vector.broadcast %cst_59 : f32 to vector<24x128xf32>
    %143 = arith.mulf %142, %139 : vector<24x128xf32>
    %144 = arith.select %141, %139, %143 : vector<24x128xi1>, vector<24x128xf32>
    %c0_60 = arith.constant 0 : index
    %c896 = arith.constant 896 : index
    %145 = vector.load %arg11[%c0_60, %c896] : memref<24x1024xf32, #tpu.memory_space<vmem>>, vector<24x128xf32>
    tpu.vector_store %arg11[%c0_60, %c896], %144 {strides = array<i32>} : memref<24x1024xf32, #tpu.memory_space<vmem>>, vector<24x128xf32>,
    %c7_61 = arith.constant 7 : index
    %c0_62 = arith.constant 0 : index
    %c0_63 = arith.constant 0 : index
    %146 = vector.load %arg4[%c7_61, %c0_62, %c0_63] : memref<8x8x24xf32, #tpu.memory_space<vmem>>, vector<1x8x24xf32>
    %147 = vector.shape_cast %146 : vector<1x8x24xf32> to vector<8x24xf32>
    %cst_64 = arith.constant dense<0.000000e+00> : vector<8x128xf32>
    %148 = tpu.matmul %147, %144, %cst_64 {dimension_numbers = #tpu.dot_dimension_numbers<[1], [0], [0], [1], [0, 0, 1, 1], [], []>} : vector<8x24xf32>, vector<24x128xf32>, vector<8x128xf32> -> vector<8x128xf32>
    %149 = arith.addf %131, %148 : vector<8x128xf32>
    %c0_65 = arith.constant 0 : index
    %c0_66 = arith.constant 0 : index
    %150 = vector.load %arg11[%c0_65, %c0_66] : memref<24x1024xf32, #tpu.memory_space<vmem>>, vector<24x1024xf32>
    %c0_67 = arith.constant 0 : index
    %c0_68 = arith.constant 0 : index
    %151 = vector.load %arg5[%c0_67, %c0_68] : memref<1024x8xf32, #tpu.memory_space<vmem>>, vector<1024x8xf32>
    %cst_69 = arith.constant dense<0.000000e+00> : vector<24x8xf32>
    %152 = tpu.matmul %150, %151, %cst_69 {dimension_numbers = #tpu.dot_dimension_numbers<[1], [0], [0], [1], [0, 0, 1, 1], [], []>} : vector<24x1024xf32>, vector<1024x8xf32>, vector<24x8xf32> -> vector<24x8xf32>
    %153 = vector.extract_strided_slice %152 {offsets = [0, 0], sizes = [24, 1], strides = [1, 1]} : vector<24x8xf32> to vector<24x1xf32>
    %154 = vector.extract_strided_slice %149 {offsets = [0, 0], sizes = [1, 128], strides = [1, 1]} : vector<8x128xf32> to vector<1x128xf32>
    %155 = vector.broadcast %153 : vector<24x1xf32> to vector<24x128xf32>
    %156 = vector.broadcast %154 : vector<1x128xf32> to vector<24x128xf32>
    %157 = arith.addf %155, %156 : vector<24x128xf32>
    %c0_70 = arith.constant 0 : index
    %158 = memref.load %arg8[%c0_70] : memref<8xf32, #tpu.memory_space<smem>>
    %159 = vector.broadcast %158 : f32 to vector<24x128xf32>
    %160 = arith.addf %157, %159 : vector<24x128xf32>
    %cst_71 = arith.constant 0.000000e+00 : f32
    %161 = vector.broadcast %cst_71 : f32 to vector<24x128xf32>
    %162 = arith.cmpf oge, %160, %161 : vector<24x128xf32>
    %cst_72 = arith.constant 3.300000e-01 : f32
    %163 = vector.broadcast %cst_72 : f32 to vector<24x128xf32>
    %164 = arith.mulf %163, %160 : vector<24x128xf32>
    %165 = arith.select %162, %160, %164 : vector<24x128xi1>, vector<24x128xf32>
    %c0_73 = arith.constant 0 : index
    %c0_74 = arith.constant 0 : index
    %166 = vector.load %arg11[%c0_73, %c0_74] : memref<24x1024xf32, #tpu.memory_space<vmem>>, vector<24x128xf32>
    tpu.vector_store %arg11[%c0_73, %c0_74], %165 {strides = array<i32>} : memref<24x1024xf32, #tpu.memory_space<vmem>>, vector<24x128xf32>,
    %167 = vector.extract_strided_slice %152 {offsets = [0, 1], sizes = [24, 1], strides = [1, 1]} : vector<24x8xf32> to vector<24x1xf32>
    %168 = vector.extract_strided_slice %149 {offsets = [1, 0], sizes = [1, 128], strides = [1, 1]} : vector<8x128xf32> to vector<1x128xf32>
    %169 = vector.broadcast %167 : vector<24x1xf32> to vector<24x128xf32>
    %170 = vector.broadcast %168 : vector<1x128xf32> to vector<24x128xf32>
    %171 = arith.addf %169, %170 : vector<24x128xf32>
    %c1_75 = arith.constant 1 : index
    %172 = memref.load %arg8[%c1_75] : memref<8xf32, #tpu.memory_space<smem>>
    %173 = vector.broadcast %172 : f32 to vector<24x128xf32>
    %174 = arith.addf %171, %173 : vector<24x128xf32>
    %cst_76 = arith.constant 0.000000e+00 : f32
    %175 = vector.broadcast %cst_76 : f32 to vector<24x128xf32>
    %176 = arith.cmpf oge, %174, %175 : vector<24x128xf32>
    %cst_77 = arith.constant 3.300000e-01 : f32
    %177 = vector.broadcast %cst_77 : f32 to vector<24x128xf32>
    %178 = arith.mulf %177, %174 : vector<24x128xf32>
    %179 = arith.select %176, %174, %178 : vector<24x128xi1>, vector<24x128xf32>
    %c0_78 = arith.constant 0 : index
    %c128_79 = arith.constant 128 : index
    %180 = vector.load %arg11[%c0_78, %c128_79] : memref<24x1024xf32, #tpu.memory_space<vmem>>, vector<24x128xf32>
    tpu.vector_store %arg11[%c0_78, %c128_79], %179 {strides = array<i32>} : memref<24x1024xf32, #tpu.memory_space<vmem>>, vector<24x128xf32>,
    %181 = vector.extract_strided_slice %152 {offsets = [0, 2], sizes = [24, 1], strides = [1, 1]} : vector<24x8xf32> to vector<24x1xf32>
    %182 = vector.extract_strided_slice %149 {offsets = [2, 0], sizes = [1, 128], strides = [1, 1]} : vector<8x128xf32> to vector<1x128xf32>
    %183 = vector.broadcast %181 : vector<24x1xf32> to vector<24x128xf32>
    %184 = vector.broadcast %182 : vector<1x128xf32> to vector<24x128xf32>
    %185 = arith.addf %183, %184 : vector<24x128xf32>
    %c2_80 = arith.constant 2 : index
    %186 = memref.load %arg8[%c2_80] : memref<8xf32, #tpu.memory_space<smem>>
    %187 = vector.broadcast %186 : f32 to vector<24x128xf32>
    %188 = arith.addf %185, %187 : vector<24x128xf32>
    %cst_81 = arith.constant 0.000000e+00 : f32
    %189 = vector.broadcast %cst_81 : f32 to vector<24x128xf32>
    %190 = arith.cmpf oge, %188, %189 : vector<24x128xf32>
    %cst_82 = arith.constant 3.300000e-01 : f32
    %191 = vector.broadcast %cst_82 : f32 to vector<24x128xf32>
    %192 = arith.mulf %191, %188 : vector<24x128xf32>
    %193 = arith.select %190, %188, %192 : vector<24x128xi1>, vector<24x128xf32>
    %c0_83 = arith.constant 0 : index
    %c256_84 = arith.constant 256 : index
    %194 = vector.load %arg11[%c0_83, %c256_84] : memref<24x1024xf32, #tpu.memory_space<vmem>>, vector<24x128xf32>
    tpu.vector_store %arg11[%c0_83, %c256_84], %193 {strides = array<i32>} : memref<24x1024xf32, #tpu.memory_space<vmem>>, vector<24x128xf32>,
    %195 = vector.extract_strided_slice %152 {offsets = [0, 3], sizes = [24, 1], strides = [1, 1]} : vector<24x8xf32> to vector<24x1xf32>
    %196 = vector.extract_strided_slice %149 {offsets = [3, 0], sizes = [1, 128], strides = [1, 1]} : vector<8x128xf32> to vector<1x128xf32>
    %197 = vector.broadcast %195 : vector<24x1xf32> to vector<24x128xf32>
    %198 = vector.broadcast %196 : vector<1x128xf32> to vector<24x128xf32>
    %199 = arith.addf %197, %198 : vector<24x128xf32>
    %c3_85 = arith.constant 3 : index
    %200 = memref.load %arg8[%c3_85] : memref<8xf32, #tpu.memory_space<smem>>
    %201 = vector.broadcast %200 : f32 to vector<24x128xf32>
    %202 = arith.addf %199, %201 : vector<24x128xf32>
    %cst_86 = arith.constant 0.000000e+00 : f32
    %203 = vector.broadcast %cst_86 : f32 to vector<24x128xf32>
    %204 = arith.cmpf oge, %202, %203 : vector<24x128xf32>
    %cst_87 = arith.constant 3.300000e-01 : f32
    %205 = vector.broadcast %cst_87 : f32 to vector<24x128xf32>
    %206 = arith.mulf %205, %202 : vector<24x128xf32>
    %207 = arith.select %204, %202, %206 : vector<24x128xi1>, vector<24x128xf32>
    %c0_88 = arith.constant 0 : index
    %c384_89 = arith.constant 384 : index
    %208 = vector.load %arg11[%c0_88, %c384_89] : memref<24x1024xf32, #tpu.memory_space<vmem>>, vector<24x128xf32>
    tpu.vector_store %arg11[%c0_88, %c384_89], %207 {strides = array<i32>} : memref<24x1024xf32, #tpu.memory_space<vmem>>, vector<24x128xf32>,
    %209 = vector.extract_strided_slice %152 {offsets = [0, 4], sizes = [24, 1], strides = [1, 1]} : vector<24x8xf32> to vector<24x1xf32>
    %210 = vector.extract_strided_slice %149 {offsets = [4, 0], sizes = [1, 128], strides = [1, 1]} : vector<8x128xf32> to vector<1x128xf32>
    %211 = vector.broadcast %209 : vector<24x1xf32> to vector<24x128xf32>
    %212 = vector.broadcast %210 : vector<1x128xf32> to vector<24x128xf32>
    %213 = arith.addf %211, %212 : vector<24x128xf32>
    %c4_90 = arith.constant 4 : index
    %214 = memref.load %arg8[%c4_90] : memref<8xf32, #tpu.memory_space<smem>>
    %215 = vector.broadcast %214 : f32 to vector<24x128xf32>
    %216 = arith.addf %213, %215 : vector<24x128xf32>
    %cst_91 = arith.constant 0.000000e+00 : f32
    %217 = vector.broadcast %cst_91 : f32 to vector<24x128xf32>
    %218 = arith.cmpf oge, %216, %217 : vector<24x128xf32>
    %cst_92 = arith.constant 3.300000e-01 : f32
    %219 = vector.broadcast %cst_92 : f32 to vector<24x128xf32>
    %220 = arith.mulf %219, %216 : vector<24x128xf32>
    %221 = arith.select %218, %216, %220 : vector<24x128xi1>, vector<24x128xf32>
    %c0_93 = arith.constant 0 : index
    %c512_94 = arith.constant 512 : index
    %222 = vector.load %arg11[%c0_93, %c512_94] : memref<24x1024xf32, #tpu.memory_space<vmem>>, vector<24x128xf32>
    tpu.vector_store %arg11[%c0_93, %c512_94], %221 {strides = array<i32>} : memref<24x1024xf32, #tpu.memory_space<vmem>>, vector<24x128xf32>,
    %223 = vector.extract_strided_slice %152 {offsets = [0, 5], sizes = [24, 1], strides = [1, 1]} : vector<24x8xf32> to vector<24x1xf32>
    %224 = vector.extract_strided_slice %149 {offsets = [5, 0], sizes = [1, 128], strides = [1, 1]} : vector<8x128xf32> to vector<1x128xf32>
    %225 = vector.broadcast %223 : vector<24x1xf32> to vector<24x128xf32>
    %226 = vector.broadcast %224 : vector<1x128xf32> to vector<24x128xf32>
    %227 = arith.addf %225, %226 : vector<24x128xf32>
    %c5_95 = arith.constant 5 : index
    %228 = memref.load %arg8[%c5_95] : memref<8xf32, #tpu.memory_space<smem>>
    %229 = vector.broadcast %228 : f32 to vector<24x128xf32>
    %230 = arith.addf %227, %229 : vector<24x128xf32>
    %cst_96 = arith.constant 0.000000e+00 : f32
    %231 = vector.broadcast %cst_96 : f32 to vector<24x128xf32>
    %232 = arith.cmpf oge, %230, %231 : vector<24x128xf32>
    %cst_97 = arith.constant 3.300000e-01 : f32
    %233 = vector.broadcast %cst_97 : f32 to vector<24x128xf32>
    %234 = arith.mulf %233, %230 : vector<24x128xf32>
    %235 = arith.select %232, %230, %234 : vector<24x128xi1>, vector<24x128xf32>
    %c0_98 = arith.constant 0 : index
    %c640_99 = arith.constant 640 : index
    %236 = vector.load %arg11[%c0_98, %c640_99] : memref<24x1024xf32, #tpu.memory_space<vmem>>, vector<24x128xf32>
    tpu.vector_store %arg11[%c0_98, %c640_99], %235 {strides = array<i32>} : memref<24x1024xf32, #tpu.memory_space<vmem>>, vector<24x128xf32>,
    %237 = vector.extract_strided_slice %152 {offsets = [0, 6], sizes = [24, 1], strides = [1, 1]} : vector<24x8xf32> to vector<24x1xf32>
    %238 = vector.extract_strided_slice %149 {offsets = [6, 0], sizes = [1, 128], strides = [1, 1]} : vector<8x128xf32> to vector<1x128xf32>
    %239 = vector.broadcast %237 : vector<24x1xf32> to vector<24x128xf32>
    %240 = vector.broadcast %238 : vector<1x128xf32> to vector<24x128xf32>
    %241 = arith.addf %239, %240 : vector<24x128xf32>
    %c6_100 = arith.constant 6 : index
    %242 = memref.load %arg8[%c6_100] : memref<8xf32, #tpu.memory_space<smem>>
    %243 = vector.broadcast %242 : f32 to vector<24x128xf32>
    %244 = arith.addf %241, %243 : vector<24x128xf32>
    %cst_101 = arith.constant 0.000000e+00 : f32
    %245 = vector.broadcast %cst_101 : f32 to vector<24x128xf32>
    %246 = arith.cmpf oge, %244, %245 : vector<24x128xf32>
    %cst_102 = arith.constant 3.300000e-01 : f32
    %247 = vector.broadcast %cst_102 : f32 to vector<24x128xf32>
    %248 = arith.mulf %247, %244 : vector<24x128xf32>
    %249 = arith.select %246, %244, %248 : vector<24x128xi1>, vector<24x128xf32>
    %c0_103 = arith.constant 0 : index
    %c768_104 = arith.constant 768 : index
    %250 = vector.load %arg11[%c0_103, %c768_104] : memref<24x1024xf32, #tpu.memory_space<vmem>>, vector<24x128xf32>
    tpu.vector_store %arg11[%c0_103, %c768_104], %249 {strides = array<i32>} : memref<24x1024xf32, #tpu.memory_space<vmem>>, vector<24x128xf32>,
    %251 = vector.extract_strided_slice %152 {offsets = [0, 7], sizes = [24, 1], strides = [1, 1]} : vector<24x8xf32> to vector<24x1xf32>
    %252 = vector.extract_strided_slice %149 {offsets = [7, 0], sizes = [1, 128], strides = [1, 1]} : vector<8x128xf32> to vector<1x128xf32>
    %253 = vector.broadcast %251 : vector<24x1xf32> to vector<24x128xf32>
    %254 = vector.broadcast %252 : vector<1x128xf32> to vector<24x128xf32>
    %255 = arith.addf %253, %254 : vector<24x128xf32>
    %c7_105 = arith.constant 7 : index
    %256 = memref.load %arg8[%c7_105] : memref<8xf32, #tpu.memory_space<smem>>
    %257 = vector.broadcast %256 : f32 to vector<24x128xf32>
    %258 = arith.addf %255, %257 : vector<24x128xf32>
    %cst_106 = arith.constant 0.000000e+00 : f32
    %259 = vector.broadcast %cst_106 : f32 to vector<24x128xf32>
    %260 = arith.cmpf oge, %258, %259 : vector<24x128xf32>
    %cst_107 = arith.constant 3.300000e-01 : f32
    %261 = vector.broadcast %cst_107 : f32 to vector<24x128xf32>
    %262 = arith.mulf %261, %258 : vector<24x128xf32>
    %263 = arith.select %260, %258, %262 : vector<24x128xi1>, vector<24x128xf32>
    %c0_108 = arith.constant 0 : index
    %c896_109 = arith.constant 896 : index
    %264 = vector.load %arg11[%c0_108, %c896_109] : memref<24x1024xf32, #tpu.memory_space<vmem>>, vector<24x128xf32>
    tpu.vector_store %arg11[%c0_108, %c896_109], %263 {strides = array<i32>} : memref<24x1024xf32, #tpu.memory_space<vmem>>, vector<24x128xf32>,
    tpu.wait_dma2 semaphore(%arg13 : memref<!tpu.dma_semaphore, #tpu.memory_space<semaphore_mem>>) src(%arg6 : memref<256x1024xf32, #tpu.memory_space<any>>) dst(%arg12 : memref<256x1024xf32, #tpu.memory_space<vmem>>)
    %c0_110 = arith.constant 0 : index
    %c0_111 = arith.constant 0 : index
    %265 = vector.load %arg12[%c0_110, %c0_111] : memref<256x1024xf32, #tpu.memory_space<vmem>>, vector<256x1024xf32>
    %c0_112 = arith.constant 0 : index
    %c0_113 = arith.constant 0 : index
    %266 = vector.load %arg11[%c0_112, %c0_113] : memref<24x1024xf32, #tpu.memory_space<vmem>>, vector<24x1024xf32>
    %cst_114 = arith.constant dense<0.000000e+00> : vector<256x24xf32>
    %267 = tpu.matmul %265, %266, %cst_114 {dimension_numbers = #tpu.dot_dimension_numbers<[1], [1], [0], [0], [0, 0, 1, 0], [], []>} : vector<256x1024xf32>, vector<24x1024xf32>, vector<256x24xf32> -> vector<256x24xf32>
    %c0_115 = arith.constant 0 : index
    %c0_116 = arith.constant 0 : index
    %268 = vector.load %arg9[%c0_115, %c0_116] : memref<256x1xf32, #tpu.memory_space<vmem>>, vector<256x1xf32>
    %269 = vector.broadcast %268 : vector<256x1xf32> to vector<256x24xf32>
    %270 = arith.addf %267, %269 : vector<256x24xf32>
    %cst_117 = arith.constant 0.000000e+00 : f32
    %271 = vector.broadcast %cst_117 : f32 to vector<256x24xf32>
    %272 = arith.cmpf oge, %270, %271 : vector<256x24xf32>
    %cst_118 = arith.constant 3.300000e-01 : f32
    %273 = vector.broadcast %cst_118 : f32 to vector<256x24xf32>
    %274 = arith.mulf %273, %270 : vector<256x24xf32>
    %275 = arith.select %272, %270, %274 : vector<256x24xi1>, vector<256x24xf32>
    %c0_119 = arith.constant 0 : index
    %c0_120 = arith.constant 0 : index
    %276 = vector.load %arg10[%c0_119, %c0_120] : memref<256x24xf32, #tpu.memory_space<vmem>>, vector<256x24xf32>
    tpu.vector_store %arg10[%c0_119, %c0_120], %275 {strides = array<i32>} : memref<256x24xf32, #tpu.memory_space<vmem>>, vector<256x24xf32>,
    return
  }
  func.func @transform_0(%arg0: i32) -> (i32, i32) {
    %c0_i32 = arith.constant 0 : i32
    %c0_i32_0 = arith.constant 0 : i32
    %c0_i32_1 = arith.constant 0 : i32
    return %c0_i32, %c0_i32_0 : i32, i32
  }
  func.func @transform_1(%arg0: i32) -> (i32, i32) {
    %c0_i32 = arith.constant 0 : i32
    %c0_i32_0 = arith.constant 0 : i32
    %c0_i32_1 = arith.constant 0 : i32
    return %c0_i32, %c0_i32_0 : i32, i32
  }
  func.func @transform_2(%arg0: i32) -> (i32, i32) {
    %c0_i32 = arith.constant 0 : i32
    %c0_i32_0 = arith.constant 0 : i32
    %c0_i32_1 = arith.constant 0 : i32
    return %c0_i32, %c0_i32_0 : i32, i32
  }
  func.func @transform_3(%arg0: i32) -> (i32, i32, i32) {
    %c0_i32 = arith.constant 0 : i32
    %c0_i32_0 = arith.constant 0 : i32
    %c0_i32_1 = arith.constant 0 : i32
    %c0_i32_2 = arith.constant 0 : i32
    return %c0_i32, %c0_i32_0, %c0_i32_1 : i32, i32, i32
  }
  func.func @transform_4(%arg0: i32) -> (i32, i32) {
    %c0_i32 = arith.constant 0 : i32
    %c0_i32_0 = arith.constant 0 : i32
    %c0_i32_1 = arith.constant 0 : i32
    return %c0_i32, %c0_i32_0 : i32, i32
  }
  func.func @transform_6(%arg0: i32) -> i32 {
    %c0_i32 = arith.constant 0 : i32
    %c0_i32_0 = arith.constant 0 : i32
    return %c0_i32 : i32
  }
  func.func @transform_7(%arg0: i32) -> i32 {
    %c0_i32 = arith.constant 0 : i32
    %c0_i32_0 = arith.constant 0 : i32
    return %c0_i32 : i32
  }
  func.func @transform_8(%arg0: i32) -> (i32, i32) {
    %c0_i32 = arith.constant 0 : i32
    %c0_i32_0 = arith.constant 0 : i32
    %c0_i32_1 = arith.constant 0 : i32
    return %c0_i32, %c0_i32_0 : i32, i32
  }
  func.func @transform_9(%arg0: i32) -> (i32, i32) {
    %c0_i32 = arith.constant 0 : i32
    %c0_i32_0 = arith.constant 0 : i32
    %c0_i32_1 = arith.constant 0 : i32
    return %c0_i32, %c0_i32_0 : i32, i32
  }
}

</mosaic_0001>

<bundles_post_ra>
// kernel: _lambda_.1
= control target key start
LH: loop header
LB: loop body
LE: loop exit
PB: predicated region body
PF: predicated region fallthrough
CT: control target
= control target key end

     0   :  { %14 = vsyncpa [#allocation6], 0  ;;  %s3702_s0 = inlined_call_operand.vmem [shape: f32[24,128], index: 0, kind: input, shape index: {}]   ;;  %s3703_s1 = inlined_call_operand.vmem [shape: f32[8,24], index: 1, kind: input, shape index: {}]   ;;  %s3704_s2 = inlined_call_operand.hbm [shape: f32[128,8], index: 2, kind: input, shape index: {}]   ;;  %s3705_s3 = inlined_call_operand.vmem [shape: f32[8,8,24], index: 3, kind: input, shape index: {}]   ;;  %s3706_s4 = inlined_call_operand.hbm [shape: f32[1024,8], index: 4, kind: input, shape index: {}]   ;;  %s3707_s5 = inlined_call_operand.hbm [shape: f32[256,1024], index: 5, kind: input, shape index: {}]   ;;  %s3708_s6 = inlined_call_operand.vmem [shape: f32[8], index: 6, kind: input, shape index: {}]   ;;  %s3709_s7 = inlined_call_operand.vmem [shape: f32[8], index: 7, kind: input, shape index: {}]   ;;  %s3710_s8 = inlined_call_operand.hbm [shape: f32[256,1], index: 8, kind: input, shape index: {}]   ;;  %s3711_s9 = inlined_call_operand.vmem [shape: f32[256,24], index: 9, kind: output, shape index: {}]  }
   0x1   :  { %15 = vsyncpa [#allocation9], 0 }
   0x2   :  { %16 = vsyncpa [#allocation7], 0 }
   0x3   :  { %17 = vsyncpa [#allocation12], 0  ;;  %s41_s11 = sshll.u32 %s3706_s4, 4  ;;  %s3035_s12 = smov [#allocation8]   ;;  %s42_s11 = int_to_ptr.hbm [resolvable:$true] %s41_s11 }
   0x4   :  { %s43_s13 = sshll.u32 %s3035_s12, 4  ;;  %s26_s16 = sshll.u32 %s3704_s2, 4  ;;  %s44_s13 = int_to_ptr.vmem [resolvable:$true] %s43_s13  ;;  %s27_s16 = int_to_ptr.hbm [resolvable:$true] %s26_s16 }
   0x5   :  { %s3036_s17 = smov 128   ;;  %s3037_s18 = smov 8  }
   0x6   :  { %49 = dma.hbm_to_vmem [thread:$0]  %s42_s11, 16384, %s44_s13, [#allocation9], %s3036_s17, %s3036_s17, %s3037_s18  }
   0x7   :  { %s3038_s19 = smov [#allocation5]   ;;  %s55_s23 = sshll.u32 %s3708_s6, 4  ;;  %s56_s23 = int_to_ptr.vmem [resolvable:$true] %s55_s23 }
   0x8   :  { %s28_s20 = sshll.u32 %s3038_s19, 4  ;;  %s64_s25 = sshll.u32 %s3709_s7, 4  ;;  %s29_s20 = int_to_ptr.vmem [resolvable:$true] %s28_s20  ;;  %s65_s25 = int_to_ptr.vmem [resolvable:$true] %s64_s25 }
   0x9   :  { %34 = dma.hbm_to_vmem [thread:$0]  %s27_s16, 2048, %s29_s20, [#allocation6], %s3036_s17, %s3036_s17, %s3037_s18  }
   0xa   :  { %s3039_s26 = smov [#allocation10]   ;;  %s3040_s2 = smov [#allocation11]  }
   0xb   :  { %58 = dma.vmem_to_smem %s56_s23, 16, %s3039_s26, [#allocation7]  }
   0xc   :  { %67 = dma.vmem_to_smem %s65_s25, 16, %s3040_s2, [#allocation12]  }
   0xd   :  { %s72_s29 = sshll.u32 %s3710_s8, 4  ;;  %s3041_s30 = smov [#allocation13]   ;;  %s73_s29 = int_to_ptr.hbm [resolvable:$true] %s72_s29 }
   0xe   :  { %s74_s10 = sshll.u32 %s3041_s30, 4  ;;  %s75_s10 = int_to_ptr.vmem [resolvable:$true] %s74_s10 }
   0xf   :  { %80 = dma.hbm_to_vmem [thread:$0]  %s73_s29, 4096, %s75_s10, [#allocation9], %s3036_s17, %s3036_s17, %s3037_s18  }
  0x10   :  { %3023 = dma.done.wait [#allocation6], 2048  }
  0x11   :  { %3024 = vsyncadd [#allocation6], 4294965248 }
  0x12   :  { %3025 = dma.done.wait [#allocation9], 16384  }
  0x13   :  { %3026 = vsyncadd [#allocation9], 4294950912 }
  0x14   :  { %3027 = dma.done.wait [#allocation7], 16  }
  0x15   :  { %3028 = vsyncadd [#allocation7], 4294967280 }
  0x16   :  { %3029 = dma.done.wait [#allocation12], 16  }
  0x17   :  { %3030 = vsyncadd [#allocation12], 4294967280 }
  0x18   :  { %3031 = dma.done.wait [#allocation9], 4096  }
  0x19   :  { %3032 = vsyncadd [#allocation9], 4294963200 }
  0x1a   :  { %101 = sfence }
  0x1b   :  { %v158_v0 = vld [vmem:[#allocation5 + $0x78] sm:$0xff]  ;;  %v157_v1 = vld [vmem:[#allocation5 + $0x70] sm:$0xff]  ;;  %v156_v2 = vld [vmem:[#allocation5 + $0x68] sm:$0xff]  ;;  %vm119_vm0 = vcmask 195584   ;;  %v3042_v15 = vmov 4   ;;  %v3043_v16 = vmov 1  }
  0x1c   :  { %159 = vmatpush.msra.mxu1 %v158_v0  ;;  %v155_v3 = vld [vmem:[#allocation5 + $0x60] sm:$0xff]  ;;  %v154_v4 = vld [vmem:[#allocation5 + $0x58] sm:$0xff]  ;;  %v153_v5 = vld [vmem:[#allocation5 + $0x50] sm:$0xff]  ;;  %2859 = vset.pattern.permute.xlu0 %v3042_v15  ;;  %v3044_v24 = vmov 0   ;;  %v3045_v26 = vmov 3   ;;  %v3046_v27 = vmov 2  }
  0x1d   :  { %v117_v6 = vld [vmem:[%s3702_s0 + $0x10] sm:$0xff]  ;;  %v152_v7 = vld [vmem:[#allocation5 + $0x48] sm:$0xff]  ;;  %v151_v9 = vld [vmem:[#allocation5 + $0x40] sm:$0xff]  ;;  %2856 = vset.pattern.permute.xlu2 %v3043_v16  ;;  %2860 = vset.pattern.permute.xlu1 %v3043_v16  ;;  %v3047_v28 = vmov 6   ;;  %v3048_v29 = vmov 7   ;;  %v3049_v33 = vmov 5  }
  0x1e   :  { %160 = vmatpush.msra.mxu1 %v157_v1  ;;  %136 = vmatpush.msra.mxu0 %v117_v6  ;;  %v116_v8 = vld [vmem:[%s3702_s0 + $0x8] sm:$0xff]  ;;  %v115_v10 = vld [vmem:[%s3702_s0] sm:$0xff]  ;;  %v150_v11 = vld [vmem:[#allocation5 + $0x38] sm:$0xff]  ;;  %s2814_s0 = sld [smem:[#allocation10 + $0x3]]  ;;  %s109_s13 = sshll.u32 %s3707_s5, 4  ;;  %s110_s13 = int_to_ptr.hbm [resolvable:$true] %s109_s13 }
  0x1f   :  { %v149_v12 = vld [vmem:[#allocation5 + $0x30] sm:$0xff]  ;;  %v118_v13 = vld [vmem:[%s3703_s1] sm:$0xff]  ;;  %v148_v14 = vld [vmem:[#allocation5 + $0x28] sm:$0xff]  ;;  %s2807_s1 = sld [smem:[#allocation10 + $0x1]]  ;;  %s3050_s14 = smov [#allocation3]  }
  0x20   :  { %161 = vmatpush.msra.mxu1 %v156_v2  ;;  %137 = vmatpush.msra.mxu0 %v116_v8  ;;  %v147_v17 = vld [vmem:[#allocation5 + $0x20] sm:$0xff]  ;;  %v146_v18 = vld [vmem:[#allocation5 + $0x18] sm:$0xff]  ;;  %v145_v19 = vld [vmem:[#allocation5 + $0x10] sm:$0xff]  ;;  %s204_s16 = sld [smem:[#allocation10]]  ;;  %s111_s15 = sshll.u32 %s3050_s14, 4  ;;  %s112_s15 = int_to_ptr.vmem [resolvable:$true] %s111_s15 }
  0x21   :  { %v144_v20 = vld [vmem:[#allocation5 + $0x8] sm:$0xff]  ;;  %v143_v21 = vld [vmem:[#allocation5] sm:$0xff]  ;;  %v744_v30 = vld [vmem:[#allocation8 + $0x1f8] sm:$0xff]  ;;  %s2817_s19 = sld [smem:[#allocation10 + $0x4]] }
  0x22   :  { %162 = vmatpush.msra.mxu1 %v155_v3  ;;  %138 = vmatpush.msra.mxu0 %v115_v10  ;;  %v743_v31 = vld [vmem:[#allocation8 + $0x1f0] sm:$0xff]  ;;  %v742_v32 = vld [vmem:[#allocation8 + $0x1e8] sm:$0xff]  ;;  %v741_v34 = vld [vmem:[#allocation8 + $0x1e0] sm:$0xff]  ;;  %s3199_s20 = sld [smem:[#allocation10 + $0x6]] }
  0x23   :  { %2806 = vmatmul.msk.f32.vlgmr.msra.gmra.mxu0 %vm119_vm0, %v118_v13  ;;  %v740_v35 = vld [vmem:[#allocation8 + $0x1d8] sm:$0xff]  ;;  %v739_v36 = vld [vmem:[#allocation8 + $0x1d0] sm:$0xff]  ;;  %v738_v37 = vld [vmem:[#allocation8 + $0x1c8] sm:$0xff]  ;;  %s3212_s21 = sld [smem:[#allocation10 + $0x2]] }
  0x24   :  { %163 = vmatpush.msra.mxu1 %v154_v4  ;;  %v737_v38 = vld [vmem:[#allocation8 + $0x1c0] sm:$0xff]  ;;  %v736_v39 = vld [vmem:[#allocation8 + $0x1b8] sm:$0xff]  ;;  %v735_v40 = vld [vmem:[#allocation8 + $0x1b0] sm:$0xff]  ;;  %v3167_v51 = vstv %s2814_s0  ;;  %s3230_s22 = sld [smem:[#allocation10 + $0x5]] }
  0x25   :  { %v734_v41 = vld [vmem:[#allocation8 + $0x1a8] sm:$0xff]  ;;  %v733_v42 = vld [vmem:[#allocation8 + $0x1a0] sm:$0xff]  ;;  %v732_v43 = vld [vmem:[#allocation8 + $0x198] sm:$0xff]  ;;  %v239_v4 = vstv %s2807_s1  ;;  %s2826_s29 = sld [smem:[#allocation10 + $0x7]] }
  0x26   :  { %164 = vmatpush.msra.mxu1 %v153_v5  ;;  %v731_v44 = vld [vmem:[#allocation8 + $0x190] sm:$0xff]  ;;  %v730_v45 = vld [vmem:[#allocation8 + $0x188] sm:$0xff]  ;;  %v729_v46 = vld [vmem:[#allocation8 + $0x180] sm:$0xff]  ;;  %114 = dma.hbm_to_vmem [thread:$0]  %s110_s13, 32768, %s112_s15, [#allocation4] }
  0x27   :  { %s2830_s0 = sld [smem:[#allocation11 + $0x2]] }
  0x28   :  { %165 = vmatpush.msra.mxu1 %v152_v7  ;;  %s2831_s1 = sld [smem:[#allocation11 + $0x3]] }
  0x29   :  { %s1036_s5 = sld [smem:[#allocation11]] }
  0x2a   :  { %166 = vmatpush.msra.mxu1 %v151_v9  ;;  %s2829_s17 = sld [smem:[#allocation11 + $0x1]] }
  0x2b   :  { %s2833_s18 = sld [smem:[#allocation11 + $0x5]] }
  0x2c   :  { %167 = vmatpush.msra.mxu1 %v150_v11 }
  0x2e   :  { %168 = vmatpush.msra.mxu1 %v149_v12 }
  0x30   :  { %169 = vmatpush.msra.mxu1 %v148_v14 }
  0x32   :  { %170 = vmatpush.msra.mxu1 %v147_v17 }
  0x34   :  { %171 = vmatpush.msra.mxu1 %v146_v18 }
  0x36   :  { %172 = vmatpush.msra.mxu1 %v145_v19 }
  0x38   :  { %173 = vmatpush.msra.mxu1 %v144_v20 }
  0x3a   :  { %174 = vmatpush.msra.mxu1 %v143_v21  ;;  %v808_v21 = vld [vmem:[#allocation8 + $0x3f8] sm:$0xff] }
  0x3b   :  { %175 = vmatmul.f32.vlgmr.msra.gmra.mxu1 %v115_v10 }
  0x3c   :  { %887 = vmatpush.msrb.mxu1 %v744_v30  ;;  %v807_v30 = vld [vmem:[#allocation8 + $0x3f0] sm:$0xff] }
  0x3e   :  { %888 = vmatpush.msrb.mxu1 %v743_v31 }
  0x40   :  { %889 = vmatpush.msrb.mxu1 %v742_v32 }
  0x42   :  { %890 = vmatpush.msrb.mxu1 %v741_v34 }
  0x43   :  { %178 = vmatmul.f32.gmra.mxu1 %v116_v8 }
  0x44   :  { %891 = vmatpush.msrb.mxu1 %v740_v35  ;;  %v2808_v35 = vld [vmem:[%s3705_s3 + $0x8] sm:$0xff] }
  0x46   :  { %892 = vmatpush.msrb.mxu1 %v739_v36  ;;  %v806_v36 = vld [vmem:[#allocation8 + $0x3e8] sm:$0xff] }
  0x48   :  { %893 = vmatpush.msrb.mxu1 %v738_v37 }
  0x4a   :  { %894 = vmatpush.msrb.mxu1 %v737_v38 }
  0x4b   :  { %181 = vmatmul.f32.gmra.mxu1 %v117_v6 }
  0x4c   :  { %895 = vmatpush.msrb.mxu1 %v736_v39 }
  0x4e   :  { %896 = vmatpush.msrb.mxu1 %v735_v40  ;;  %v805_v40 = vld [vmem:[#allocation8 + $0x3e0] sm:$0xff] }
  0x50   :  { %897 = vmatpush.msrb.mxu1 %v734_v41 }
  0x52   :  { %898 = vmatpush.msrb.mxu1 %v733_v42 }
  0x54   :  { %899 = vmatpush.msrb.mxu1 %v732_v43 }
  0x56   :  { %900 = vmatpush.msrb.mxu1 %v731_v44 }
  0x58   :  { %901 = vmatpush.msrb.mxu1 %v730_v45 }
  0x5a   :  { %902 = vmatpush.msrb.mxu1 %v729_v46 }
  0x5c   :  { %991 = vmatpush.msra.mxu1 %v808_v21  ;;  %v799_v21 = vld [vmem:[#allocation8 + $0x3b0] sm:$0xff] }
  0x5e   :  { %992 = vmatpush.msra.mxu1 %v807_v30  ;;  %v221_v30 = vld [vmem:[%s3705_s3] sm:$0xff] }
  0x60   :  { %993 = vmatpush.msra.mxu1 %v806_v36 }
  0x62   :  { %994 = vmatpush.msra.mxu1 %v805_v40 }
  0xa0   :  { %v3162_v49 = vpop.f32.mrf.mxu0 }
  0xa1   :  { %v3165_v50 = vperm.slane %v3162_v49, 3  ;;  %v234_v0 = vperm.slane %v3162_v49, 1  ;;  %v200_v11 = vperm.slane %v3162_v49, 0  ;;  %v433_v41 = vperm.slane %v3162_v49, 4 }
  0xa2   :  { %v3204_v46 = vperm.slane %v3162_v49, 6 }
  0xb8   :  { %v3132_v22 = vpop.f32.mrf.mxu1 }
  0xb9   :  { %422 = vperm.xlu0 %2859, %v3132_v22   ;;  %223 = vperm.xlu2 %2856, %v3132_v22  }
  0xc0   :  { %v179_v23 = vpop.f32.mrf.mxu1 }
  0xc1   :  { %2857 = vset.pattern.permute.xlu2 %v3044_v24  ;;  %227 = vperm.xlu1 %2860, %v179_v23  }
  0xc2   :  { %187 = vperm.xlu2 %2857, %v3132_v22   ;;  %2864 = vset.pattern.permute.xlu0 %v3043_v16 }
  0xc8   :  { %v182_v25 = vpop.f32.mrf.mxu1 }
  0xc9   :  { %2861 = vset.pattern.permute.xlu1 %v3044_v24  ;;  %231 = vperm.xlu0 %2864, %v182_v25  }
  0xca   :  { %2858 = vset.pattern.permute.xlu2 %v3045_v26  ;;  %192 = vperm.xlu1 %2861, %v179_v23  }
  0xcb   :  { %363 = vperm.xlu2 %2858, %v3132_v22  }
  0xd1   :  { %2865 = vset.pattern.permute.xlu0 %v3044_v24 }
  0xd2   :  { %2862 = vset.pattern.permute.xlu1 %v3042_v15  ;;  %197 = vperm.xlu0 %2865, %v182_v25  }
  0xd3   :  { %367 = vperm.xlu2 %2858, %v179_v23   ;;  %426 = vperm.xlu1 %2862, %v179_v23  }
  0xda   :  { %2867 = vset.pattern.permute.xlu0 %v3042_v15 }
  0xdb   :  { %2863 = vset.pattern.permute.xlu2 %v3046_v27  ;;  %2866 = vset.pattern.permute.xlu1 %v3045_v26 }
  0xdc   :  { %430 = vperm.xlu0 %2867, %v182_v25   ;;  %308 = vperm.xlu2 %2863, %v179_v23  }
  0xdd   :  { %371 = vperm.xlu1 %2866, %v182_v25  }
  0xe4   :  { %2869 = vset.pattern.permute.xlu0 %v3047_v28  ;;  %2871 = vset.pattern.permute.xlu2 %v3048_v29 }
  0xe5   :  { %2868 = vset.pattern.permute.xlu1 %v3046_v27  ;;  %544 = vperm.xlu0 %2869, %v179_v23  }
  0xe6   :  { %603 = vperm.xlu2 %2871, %v179_v23   ;;  %312 = vperm.xlu1 %2868, %v182_v25  }
  0xed   :  { %2872 = vset.pattern.permute.xlu0 %v3049_v33 }
  0xee   :  { %2873 = vset.pattern.permute.xlu2 %v3047_v28  ;;  %304 = vperm.xlu1 %2868, %v3132_v22  }
  0xef   :  { %485 = vperm.xlu0 %2872, %v179_v23   ;;  %548 = vperm.xlu2 %2873, %v182_v25  }
  0xf6   :  { %2870 = vset.pattern.permute.xlu1 %v3047_v28 }
  0xf7   :  { %2875 = vset.pattern.permute.xlu2 %v3049_v33  ;;  %540 = vperm.xlu1 %2870, %v3132_v22  }
  0xf8   :  { %489 = vperm.xlu2 %2875, %v182_v25   ;;  %2880 = vset.pattern.permute.xlu0 %v3042_v15 }
  0xff   :  { %2874 = vset.pattern.permute.xlu1 %v3048_v29 }
 0x100   :  { %481 = vperm.xlu2 %2875, %v3132_v22   ;;  %607 = vperm.xlu1 %2874, %v182_v25  }
 0x108   :  { %599 = vperm.xlu1 %2874, %v3132_v22   ;;  %2878 = vset.pattern.permute.xlu2 %v3046_v27  ;;  %v205_v22 = vstv %s204_s16  ;;  %s2832_s16 = sld [smem:[#allocation11 + $0x4]] }
 0x110   :  { %2876 = vset.pattern.permute.xlu1 %v3044_v24 }
 0x113   :  { %v224_v47 = vpop.permute.xlu2 %223 }
 0x114   :  { %v235_v3 = vadd.f32 %v234_v0, %v224_v47 }
 0x116   :  { %v240_v9 = vadd.f32 %v239_v4, %v235_v3 }
 0x118   :  { %v246_v19 = vmul.f32 0.33, %v240_v9  ;;  %vm243_vm5 = vcmp.ge.f32.partialorder %v240_v9, 0.0 }
 0x11a   :  { %v3196_v37 = vsel %vm243_vm5, %v240_v9, %v246_v19 }
 0x11c   :  { %v188_v48 = vpop.permute.xlu2 %187 }
 0x11d   :  { %v201_v20 = vadd.f32 %v200_v11, %v188_v48 }
 0x11f   :  { %v206_v38 = vadd.f32 %v205_v22, %v201_v20 }
 0x121   :  { %v212_v48 = vmul.f32 0.33, %v206_v38  ;;  %vm209_vm8 = vcmp.ge.f32.partialorder %v206_v38, 0.0 }
 0x123   :  { %v3216_v3 = vsel %vm209_vm8, %v206_v38, %v212_v48  ;;  %v796_v48 = vld [vmem:[#allocation8 + $0x398] sm:$0xff] }
 0x125   :  { %v364_v52 = vpop.permute.xlu2 %363 }
 0x126   :  { %v375_v53 = vadd.f32 %v3165_v50, %v364_v52  ;;  %v804_v52 = vld [vmem:[#allocation8 + $0x3d8] sm:$0xff] }
 0x127   :  { %995 = vmatpush.msra.mxu1 %v804_v52 }
 0x128   :  { %v380_v54 = vadd.f32 %v3167_v51, %v375_v53 }
 0x12a   :  { %vm383_vm1 = vcmp.ge.f32.partialorder %v380_v54, 0.0  ;;  %v386_v55 = vmul.f32 0.33, %v380_v54 }
 0x12b   :  { %v3176_v61 = vpop.permute.xlu0 %422 }
 0x12c   :  { %v3171_v56 = vsel %vm383_vm1, %v380_v54, %v386_v55  ;;  %v434_v53 = vadd.f32 %v433_v41, %v3176_v61  ;;  %v803_v55 = vld [vmem:[#allocation8 + $0x3d0] sm:$0xff] }
 0x12d   :  { %v368_v57 = vpop.permute.xlu2 %367  ;;  %903 = vmatmul.f32.vlgmr.msrb.gmra.mxu1 %v3171_v56 }
 0x12e   :  { %v376_v58 = vadd.f32 %v3165_v50, %v368_v57  ;;  %v438_v57 = vstv %s2817_s19  ;;  %996 = vmatpush.msra.mxu1 %v803_v55  ;;  %v497_v55 = vstv %s3230_s22  ;;  %s2834_s19 = sld [smem:[#allocation11 + $0x6]] }
 0x130   :  { %v381_v59 = vadd.f32 %v3167_v51, %v376_v58 }
 0x132   :  { %vm384_vm2 = vcmp.ge.f32.partialorder %v381_v59, 0.0  ;;  %v387_v60 = vmul.f32 0.33, %v381_v59 }
 0x133   :  { %v228_v62 = vpop.permute.xlu1 %227 }
 0x134   :  { %v3178_v63 = vsel %vm384_vm2, %v381_v59, %v387_v60  ;;  %v236_v2 = vadd.f32 %v234_v0, %v228_v62  ;;  %v802_v59 = vld [vmem:[#allocation8 + $0x3c8] sm:$0xff] }
 0x135   :  { %906 = vmatmul.f32.gmra.mxu1 %v3178_v63 }
 0x136   :  { %v3182_v1 = vpop.permute.xlu2 %308  ;;  %v241_v6 = vadd.f32 %v239_v4, %v236_v2  ;;  %997 = vmatpush.msra.mxu1 %v802_v59 }
 0x138   :  { %v247_v14 = vmul.f32 0.33, %v241_v6  ;;  %vm244_vm4 = vcmp.ge.f32.partialorder %v241_v6, 0.0 }
 0x13a   :  { %v3190_v25 = vsel %vm244_vm4, %v241_v6, %v247_v14  ;;  %v3224_v6 = vperm.slane %v3162_v49, 2 }
 0x13b   :  { %v232_v5 = vpop.permute.xlu0 %231 }
 0x13c   :  { %v237_v7 = vadd.f32 %v234_v0, %v232_v5  ;;  %v193_v8 = vpop.permute.xlu1 %192  ;;  %v439_v5 = vadd.f32 %v438_v57, %v434_v53  ;;  %v317_v19 = vadd.f32 %v3224_v6, %v3182_v1 }
 0x13d   :  { %v202_v17 = vadd.f32 %v200_v11, %v193_v8  ;;  %v801_v8 = vld [vmem:[#allocation8 + $0x3c0] sm:$0xff] }
 0x13e   :  { %v242_v10 = vadd.f32 %v239_v4, %v237_v7  ;;  %v3219_v4 = vstv %s3199_s20  ;;  %998 = vmatpush.msra.mxu1 %v801_v8  ;;  %vm442_vm12 = vcmp.ge.f32.partialorder %v439_v5, 0.0  ;;  %s2835_s20 = sld [smem:[#allocation11 + $0x7]] }
 0x13f   :  { %v207_v31 = vadd.f32 %v205_v22, %v202_v17 }
 0x140   :  { %v3185_v12 = vpop.permute.xlu2 %603  ;;  %vm245_vm3 = vcmp.ge.f32.partialorder %v242_v10, 0.0  ;;  %v248_v13 = vmul.f32 0.33, %v242_v10 }
 0x141   :  { %v213_v44 = vmul.f32 0.33, %v207_v31  ;;  %vm210_vm7 = vcmp.ge.f32.partialorder %v207_v31, 0.0 }
 0x142   :  { %v3187_v18 = vsel %vm245_vm3, %v242_v10, %v248_v13 }
 0x143   :  { %273 = vmatpush.msra.mxu2 %v3187_v18  ;;  %v3210_v54 = vsel %vm210_vm7, %v207_v31, %v213_v44  ;;  %v2815_v44 = vld [vmem:[%s3705_s3 + $0x18] sm:$0xff] }
 0x144   :  { %v198_v23 = vpop.permute.xlu0 %197 }
 0x145   :  { %v203_v32 = vadd.f32 %v200_v11, %v198_v23  ;;  %v427_v34 = vpop.permute.xlu1 %426  ;;  %274 = vmatpush.msra.mxu2 %v3190_v25 }
 0x146   :  { %v435_v45 = vadd.f32 %v433_v41, %v427_v34  ;;  %v798_v34 = vld [vmem:[#allocation8 + $0x3a8] sm:$0xff] }
 0x147   :  { %v208_v39 = vadd.f32 %v205_v22, %v203_v32  ;;  %275 = vmatpush.msra.mxu2 %v3196_v37  ;;  %v3235_v22 = vstv %s3212_s21 }
 0x148   :  { %2809 = vmatmul.msk.f32.vlgmr.msra.gmra.mxu2 %vm119_vm0, %v2808_v35  ;;  %v440_v60 = vadd.f32 %v438_v57, %v435_v45  ;;  %v492_v35 = vperm.slane %v3162_v49, 5  ;;  %v322_v40 = vadd.f32 %v3235_v22, %v317_v19 }
 0x149   :  { %v549_v42 = vpop.permute.xlu2 %548  ;;  %vm211_vm6 = vcmp.ge.f32.partialorder %v208_v39, 0.0  ;;  %v214_v43 = vmul.f32 0.33, %v208_v39 }
 0x14a   :  { %v554_v62 = vadd.f32 %v3204_v46, %v549_v42  ;;  %v446_v14 = vmul.f32 0.33, %v440_v60  ;;  %vm443_vm11 = vcmp.ge.f32.partialorder %v440_v60, 0.0  ;;  %v328_v59 = vmul.f32 0.33, %v322_v40 }
 0x14b   :  { %v3206_v47 = vsel %vm211_vm6, %v208_v39, %v214_v43  ;;  %v797_v39 = vld [vmem:[#allocation8 + $0x3a0] sm:$0xff]  ;;  %vm325_vm1 = vcmp.ge.f32.partialorder %v322_v40, 0.0 }
 0x14c   :  { %296 = vmatpush.msra.mxu3 %v3206_v47  ;;  %v559_v10 = vadd.f32 %v3219_v4, %v554_v62  ;;  %v3242_v1 = vsel %vm443_vm11, %v440_v60, %v446_v14  ;;  %v795_v60 = vld [vmem:[#allocation8 + $0x390] sm:$0xff] }
 0x14e   :  { %v431_v58 = vpop.permute.xlu0 %430  ;;  %297 = vmatpush.msra.mxu3 %v3210_v54  ;;  %v565_v31 = vmul.f32 0.33, %v559_v10  ;;  %vm562_vm13 = vcmp.ge.f32.partialorder %v559_v10, 0.0 }
 0x14f   :  { %v436_v0 = vadd.f32 %v433_v41, %v431_v58  ;;  %v372_v2 = vpop.permute.xlu1 %371 }
 0x150   :  { %v377_v61 = vadd.f32 %v3165_v50, %v372_v2  ;;  %298 = vmatpush.msra.mxu3 %v3216_v3  ;;  %v800_v50 = vld [vmem:[#allocation8 + $0x3b8] sm:$0xff]  ;;  %v794_v2 = vld [vmem:[#allocation8 + $0x388] sm:$0xff] }
 0x151   :  { %v441_v7 = vadd.f32 %v438_v57, %v436_v0  ;;  %999 = vmatpush.msra.mxu1 %v800_v50  ;;  %2810 = vmatmul.msk.f32.vlgmr.msra.gmra.mxu3 %vm119_vm0, %v221_v30 }
 0x152   :  { %v382_v9 = vadd.f32 %v3167_v51, %v377_v61  ;;  %v490_v11 = vpop.permute.xlu2 %489  ;;  %v445_v51 = vmul.f32 0.33, %v439_v5 }
 0x153   :  { %vm444_vm9 = vcmp.ge.f32.partialorder %v441_v7, 0.0  ;;  %v447_v13 = vmul.f32 0.33, %v441_v7  ;;  %1000 = vmatpush.msra.mxu1 %v799_v21  ;;  %v495_v52 = vadd.f32 %v492_v35, %v490_v11  ;;  %v793_v11 = vld [vmem:[#allocation8 + $0x380] sm:$0xff] }
 0x154   :  { %vm385_vm10 = vcmp.ge.f32.partialorder %v382_v9, 0.0  ;;  %v388_v17 = vmul.f32 0.33, %v382_v9  ;;  %v3251_v42 = vsel %vm442_vm12, %v439_v5, %v445_v51 }
 0x155   :  { %v3232_v20 = vsel %vm444_vm9, %v441_v7, %v447_v13  ;;  %1001 = vmatpush.msra.mxu1 %v798_v34  ;;  %v500_v61 = vadd.f32 %v497_v55, %v495_v52  ;;  %v693_v52 = vld [vmem:[#allocation8 + $0x60] sm:$0xff] }
 0x156   :  { %472 = vmatpush.msrb.mxu3 %v3232_v20  ;;  %v391_v23 = vsel %vm385_vm10, %v382_v9, %v388_v17 }
 0x157   :  { %v545_v32 = vpop.permute.xlu0 %544  ;;  %413 = vmatpush.msrb.mxu2 %v391_v23  ;;  %909 = vmatmul.f32.gmra.mxu1 %v391_v23  ;;  %v506_v50 = vmul.f32 0.33, %v500_v61  ;;  %vm503_vm3 = vcmp.ge.f32.partialorder %v500_v61, 0.0  ;;  %v2812_v23 = vld [vmem:[%s3705_s3 + $0x10] sm:$0xff] }
 0x158   :  { %v553_v36 = vadd.f32 %v3204_v46, %v545_v32  ;;  %v313_v38 = vpop.permute.xlu1 %312  ;;  %473 = vmatpush.msrb.mxu3 %v3242_v1  ;;  %1002 = vmatpush.msra.mxu1 %v797_v39 }
 0x159   :  { %v318_v41 = vadd.f32 %v3224_v6, %v313_v38  ;;  %414 = vmatpush.msrb.mxu2 %v3178_v63  ;;  %v3261_v63 = vsel %vm562_vm13, %v559_v10, %v565_v31  ;;  %v3276_v10 = vsel %vm325_vm1, %v322_v40, %v328_v59  ;;  %v3287_v30 = vsel %vm503_vm3, %v500_v61, %v506_v50  ;;  %v695_v40 = vld [vmem:[#allocation8 + $0x70] sm:$0xff]  ;;  %v710_v59 = vld [vmem:[#allocation8 + $0xe8] sm:$0xff] }
 0x15a   :  { %v558_v43 = vadd.f32 %v3219_v4, %v553_v36  ;;  %474 = vmatpush.msrb.mxu3 %v3251_v42  ;;  %1003 = vmatpush.msra.mxu1 %v796_v48  ;;  %v482_v57 = vpop.permute.xlu2 %481  ;;  %v696_v36 = vld [vmem:[#allocation8 + $0x78] sm:$0xff]  ;;  %v2821_v48 = vld [vmem:[%s3705_s3 + $0x28] sm:$0xff] }
 0x15b   :  { %v323_v45 = vadd.f32 %v3235_v22, %v318_v41  ;;  %415 = vmatpush.msrb.mxu2 %v3171_v56  ;;  %v2818_v56 = vld [vmem:[%s3705_s3 + $0x20] sm:$0xff]  ;;  %v493_v5 = vadd.f32 %v492_v35, %v482_v57 }
 0x15c   :  { %vm561_vm14 = vcmp.ge.f32.partialorder %v558_v43, 0.0  ;;  %v564_v53 = vmul.f32 0.33, %v558_v43  ;;  %2816 = vmatmul.msk.f32.vlgmr.msrb.gmra.mxu2 %vm119_vm0, %v2815_v44  ;;  %1004 = vmatpush.msra.mxu1 %v795_v60  ;;  %v712_v44 = vld [vmem:[#allocation8 + $0xf8] sm:$0xff] }
 0x15d   :  { %590 = vmatpush.msra.mxu2 %v3261_v63  ;;  %vm326_vm15 = vcmp.ge.f32.partialorder %v323_v45, 0.0  ;;  %v329_v58 = vmul.f32 0.33, %v323_v45  ;;  %2819 = vmatmul.msk.f32.vlgmr.msrb.gmra.mxu3 %vm119_vm0, %v2818_v56  ;;  %v498_v17 = vadd.f32 %v497_v55, %v493_v5  ;;  %v691_v56 = vld [vmem:[#allocation8 + $0x50] sm:$0xff]  ;;  %v690_v5 = vld [vmem:[#allocation8 + $0x48] sm:$0xff] }
 0x15e   :  { %v3266_v62 = vsel %vm561_vm14, %v558_v43, %v564_v53  ;;  %1005 = vmatpush.msra.mxu1 %v794_v2  ;;  %v694_v43 = vld [vmem:[#allocation8 + $0x68] sm:$0xff]  ;;  %v711_v53 = vld [vmem:[#allocation8 + $0xf0] sm:$0xff]  ;;  %v709_v2 = vld [vmem:[#allocation8 + $0xe0] sm:$0xff] }
 0x15f   :  { %591 = vmatpush.msra.mxu2 %v3266_v62  ;;  %v3272_v0 = vsel %vm326_vm15, %v323_v45, %v329_v58  ;;  %vm501_vm5 = vcmp.ge.f32.partialorder %v498_v17, 0.0  ;;  %v615_v45 = vstv %s2826_s29  ;;  %v692_v58 = vld [vmem:[#allocation8 + $0x58] sm:$0xff] }
 0x160   :  { %v305_v7 = vpop.permute.xlu1 %304  ;;  %354 = vmatpush.msrb.mxu0 %v3272_v0  ;;  %1006 = vmatpush.msra.mxu1 %v793_v11  ;;  %v689_v11 = vld [vmem:[#allocation8 + $0x40] sm:$0xff] }
 0x161   :  { %v316_v8 = vadd.f32 %v3224_v6, %v305_v7  ;;  %v486_v9 = vpop.permute.xlu0 %485 }
 0x162   :  { %v494_v13 = vadd.f32 %v492_v35, %v486_v9  ;;  %355 = vmatpush.msrb.mxu0 %v3276_v10  ;;  %v610_v35 = vperm.slane %v3162_v49, 7 }
 0x163   :  { %v321_v14 = vadd.f32 %v3235_v22, %v316_v8  ;;  %v504_v22 = vmul.f32 0.33, %v498_v17  ;;  %v708_v8 = vld [vmem:[#allocation8 + $0xd8] sm:$0xff] }
 0x164   :  { %v499_v19 = vadd.f32 %v497_v55, %v494_v13 }
 0x165   :  { %vm324_vm2 = vcmp.ge.f32.partialorder %v321_v14, 0.0  ;;  %v327_v51 = vmul.f32 0.33, %v321_v14  ;;  %v3297_v39 = vsel %vm501_vm5, %v498_v17, %v504_v22  ;;  %v705_v22 = vld [vmem:[#allocation8 + $0xc0] sm:$0xff] }
 0x166   :  { %v505_v21 = vmul.f32 0.33, %v499_v19  ;;  %vm502_vm4 = vcmp.ge.f32.partialorder %v499_v19, 0.0 }
 0x167   :  { %v3281_v6 = vsel %vm324_vm2, %v321_v14, %v327_v51  ;;  %v707_v14 = vld [vmem:[#allocation8 + $0xd0] sm:$0xff]  ;;  %v706_v51 = vld [vmem:[#allocation8 + $0xc8] sm:$0xff] }
 0x168   :  { %356 = vmatpush.msrb.mxu0 %v3281_v6  ;;  %v3291_v34 = vsel %vm502_vm4, %v499_v19, %v505_v21  ;;  %v688_v19 = vld [vmem:[#allocation8 + $0x38] sm:$0xff] }
 0x169   :  { %v541_v31 = vpop.permute.xlu1 %540  ;;  %2813 = vmatmul.msk.f32.vlgmr.msrb.gmra.mxu0 %vm119_vm0, %v2812_v23  ;;  %v687_v23 = vld [vmem:[#allocation8 + $0x30] sm:$0xff] }
 0x16a   :  { %531 = vmatpush.msra.mxu0 %v3287_v30  ;;  %v552_v32 = vadd.f32 %v3204_v46, %v541_v31  ;;  %v612_v46 = vadd.f32 %v610_v35, %v3185_v12 }
 0x16c   :  { %532 = vmatpush.msra.mxu0 %v3291_v34  ;;  %v557_v38 = vadd.f32 %v3219_v4, %v552_v32  ;;  %v2824_v4 = vld [vmem:[%s3705_s3 + $0x30] sm:$0xff]  ;;  %v617_v12 = vadd.f32 %v615_v45, %v612_v46  ;;  %v686_v32 = vld [vmem:[#allocation8 + $0x28] sm:$0xff]  ;;  %v2827_v46 = vld [vmem:[%s3705_s3 + $0x38] sm:$0xff] }
 0x16e   :  { %533 = vmatpush.msra.mxu0 %v3297_v39  ;;  %vm560_vm6 = vcmp.ge.f32.partialorder %v557_v38, 0.0  ;;  %v563_v41 = vmul.f32 0.33, %v557_v38  ;;  %v623_v7 = vmul.f32 0.33, %v617_v12  ;;  %vm620_vm8 = vcmp.ge.f32.partialorder %v617_v12, 0.0 }
 0x170   :  { %809 = vmatpush.msrb.mxu0 %v696_v36  ;;  %v3301_v49 = vsel %vm560_vm6, %v557_v38, %v563_v41  ;;  %v626_v17 = vsel %vm620_vm8, %v617_v12, %v623_v7  ;;  %v704_v36 = vld [vmem:[#allocation8 + $0xb8] sm:$0xff]  ;;  %v703_v41 = vld [vmem:[#allocation8 + $0xb0] sm:$0xff]  ;;  %v697_v7 = vld [vmem:[#allocation8 + $0x80] sm:$0xff] }
 0x171   :  { %592 = vmatpush.msra.mxu2 %v3301_v49  ;;  %2822 = vmatmul.msk.f32.vlgmr.msra.gmra.mxu0 %vm119_vm0, %v2821_v48  ;;  %v683_v48 = vld [vmem:[#allocation8 + $0x10] sm:$0xff]  ;;  %v700_v12 = vld [vmem:[#allocation8 + $0x98] sm:$0xff] }
 0x172   :  { %810 = vmatpush.msrb.mxu0 %v695_v40  ;;  %v608_v55 = vpop.permute.xlu1 %607  ;;  %2825 = vmatmul.msk.f32.vlgmr.msra.gmra.mxu2 %vm119_vm0, %v2824_v4  ;;  %v685_v40 = vld [vmem:[#allocation8 + $0x20] sm:$0xff]  ;;  %v726_v4 = vld [vmem:[#allocation8 + $0x168] sm:$0xff] }
 0x173   :  { %835 = vmatpush.msrb.mxu2 %v712_v44  ;;  %v613_v57 = vadd.f32 %v610_v35, %v608_v55  ;;  %v684_v44 = vld [vmem:[#allocation8 + $0x18] sm:$0xff]  ;;  %v682_v55 = vld [vmem:[#allocation8 + $0x8] sm:$0xff] }
 0x174   :  { %811 = vmatpush.msrb.mxu0 %v694_v43  ;;  %v727_v43 = vld [vmem:[#allocation8 + $0x170] sm:$0xff] }
 0x175   :  { %836 = vmatpush.msrb.mxu2 %v711_v53  ;;  %v618_v60 = vadd.f32 %v615_v45, %v613_v57  ;;  %v725_v53 = vld [vmem:[#allocation8 + $0x160] sm:$0xff]  ;;  %v724_v57 = vld [vmem:[#allocation8 + $0x158] sm:$0xff] }
 0x176   :  { %812 = vmatpush.msrb.mxu0 %v693_v52  ;;  %v701_v52 = vld [vmem:[#allocation8 + $0xa0] sm:$0xff] }
 0x177   :  { %837 = vmatpush.msrb.mxu2 %v710_v59  ;;  %v624_v61 = vmul.f32 0.33, %v618_v60  ;;  %vm621_vm7 = vcmp.ge.f32.partialorder %v618_v60, 0.0  ;;  %v699_v59 = vld [vmem:[#allocation8 + $0x90] sm:$0xff] }
 0x178   :  { %813 = vmatpush.msrb.mxu0 %v692_v58  ;;  %v681_v58 = vld [vmem:[#allocation8] sm:$0xff] }
 0x179   :  { %838 = vmatpush.msrb.mxu2 %v709_v2  ;;  %v3312_v9 = vsel %vm621_vm7, %v618_v60, %v624_v61  ;;  %v723_v60 = vld [vmem:[#allocation8 + $0x150] sm:$0xff]  ;;  %v698_v2 = vld [vmem:[#allocation8 + $0x88] sm:$0xff] }
 0x17a   :  { %814 = vmatpush.msrb.mxu0 %v691_v56  ;;  %v600_v13 = vpop.permute.xlu1 %599  ;;  %649 = vmatpush.msra.mxu3 %v3312_v9  ;;  %v760_v56 = vld [vmem:[#allocation8 + $0x278] sm:$0xff]  ;;  %v722_v61 = vld [vmem:[#allocation8 + $0x148] sm:$0xff] }
 0x17b   :  { %v611_v50 = vadd.f32 %v610_v35, %v600_v13  ;;  %839 = vmatpush.msrb.mxu2 %v708_v8  ;;  %v728_v35 = vld [vmem:[#allocation8 + $0x178] sm:$0xff]  ;;  %v721_v8 = vld [vmem:[#allocation8 + $0x140] sm:$0xff] }
 0x17c   :  { %815 = vmatpush.msrb.mxu0 %v690_v5  ;;  %650 = vmatpush.msra.mxu3 %v626_v17  ;;  %v759_v5 = vld [vmem:[#allocation8 + $0x270] sm:$0xff]  ;;  %v776_v13 = vld [vmem:[#allocation8 + $0x2f8] sm:$0xff] }
 0x17d   :  { %v616_v21 = vadd.f32 %v615_v45, %v611_v50  ;;  %840 = vmatpush.msrb.mxu2 %v707_v14  ;;  %v702_v45 = vld [vmem:[#allocation8 + $0xa8] sm:$0xff]  ;;  %v720_v14 = vld [vmem:[#allocation8 + $0x138] sm:$0xff]  ;;  %v757_v50 = vld [vmem:[#allocation8 + $0x260] sm:$0xff] }
 0x17e   :  { %816 = vmatpush.msrb.mxu0 %v689_v11  ;;  %v758_v11 = vld [vmem:[#allocation8 + $0x268] sm:$0xff] }
 0x17f   :  { %841 = vmatpush.msrb.mxu2 %v706_v51  ;;  %vm619_vm9 = vcmp.ge.f32.partialorder %v616_v21, 0.0  ;;  %v622_v31 = vmul.f32 0.33, %v616_v21  ;;  %v774_v51 = vld [vmem:[#allocation8 + $0x2e8] sm:$0xff] }
 0x180   :  { %817 = vmatpush.msrb.mxu0 %v688_v19  ;;  %v756_v19 = vld [vmem:[#allocation8 + $0x258] sm:$0xff] }
 0x181   :  { %842 = vmatpush.msrb.mxu2 %v705_v22  ;;  %v625_v38 = vsel %vm619_vm9, %v616_v21, %v622_v31  ;;  %v718_v21 = vld [vmem:[#allocation8 + $0x128] sm:$0xff]  ;;  %v773_v22 = vld [vmem:[#allocation8 + $0x2e0] sm:$0xff] }
 0x182   :  { %818 = vmatpush.msrb.mxu0 %v687_v23  ;;  %651 = vmatpush.msra.mxu3 %v625_v38  ;;  %v755_v23 = vld [vmem:[#allocation8 + $0x250] sm:$0xff]  ;;  %v754_v31 = vld [vmem:[#allocation8 + $0x248] sm:$0xff] }
 0x183   :  { %843 = vmatpush.msrb.mxu2 %v704_v36  ;;  %1007 = vmatmul.f32.vlgmr.msra.gmra.mxu1 %v625_v38  ;;  %v753_v36 = vld [vmem:[#allocation8 + $0x240] sm:$0xff]  ;;  %v771_v38 = vld [vmem:[#allocation8 + $0x2d0] sm:$0xff] }
 0x184   :  { %819 = vmatpush.msrb.mxu0 %v686_v32  ;;  %861 = vmatpush.msrb.mxu3 %v728_v35  ;;  %v772_v32 = vld [vmem:[#allocation8 + $0x2d8] sm:$0xff] }
 0x185   :  { %844 = vmatpush.msrb.mxu2 %v703_v41  ;;  %2828 = vmatmul.msk.f32.vlgmr.msra.gmra.mxu3 %vm119_vm0, %v2827_v46  ;;  %v752_v35 = vld [vmem:[#allocation8 + $0x238] sm:$0xff]  ;;  %v714_v41 = vld [vmem:[#allocation8 + $0x108] sm:$0xff]  ;;  %v751_v46 = vld [vmem:[#allocation8 + $0x230] sm:$0xff] }
 0x186   :  { %820 = vmatpush.msrb.mxu0 %v685_v40  ;;  %862 = vmatpush.msrb.mxu3 %v727_v43  ;;  %v770_v40 = vld [vmem:[#allocation8 + $0x2c8] sm:$0xff]  ;;  %v769_v43 = vld [vmem:[#allocation8 + $0x2c0] sm:$0xff] }
 0x187   :  { %845 = vmatpush.msrb.mxu2 %v702_v45  ;;  %v768_v45 = vld [vmem:[#allocation8 + $0x2b8] sm:$0xff] }
 0x188   :  { %821 = vmatpush.msrb.mxu0 %v684_v44  ;;  %863 = vmatpush.msrb.mxu3 %v726_v4  ;;  %v750_v44 = vld [vmem:[#allocation8 + $0x228] sm:$0xff]  ;;  %v792_v4 = vld [vmem:[#allocation8 + $0x378] sm:$0xff] }
 0x189   :  { %846 = vmatpush.msrb.mxu2 %v701_v52  ;;  %v767_v52 = vld [vmem:[#allocation8 + $0x2b0] sm:$0xff] }
 0x18a   :  { %822 = vmatpush.msrb.mxu0 %v683_v48  ;;  %864 = vmatpush.msrb.mxu3 %v725_v53  ;;  %v749_v48 = vld [vmem:[#allocation8 + $0x220] sm:$0xff]  ;;  %v748_v53 = vld [vmem:[#allocation8 + $0x218] sm:$0xff] }
 0x18b   :  { %847 = vmatpush.msrb.mxu2 %v700_v12  ;;  %1010 = vmatmul.f32.gmra.mxu1 %v626_v17  ;;  %v775_v17 = vld [vmem:[#allocation8 + $0x2f0] sm:$0xff]  ;;  %v790_v12 = vld [vmem:[#allocation8 + $0x368] sm:$0xff] }
 0x18c   :  { %823 = vmatpush.msrb.mxu0 %v682_v55  ;;  %865 = vmatpush.msrb.mxu3 %v724_v57  ;;  %v766_v55 = vld [vmem:[#allocation8 + $0x2a8] sm:$0xff]  ;;  %v747_v57 = vld [vmem:[#allocation8 + $0x210] sm:$0xff] }
 0x18d   :  { %848 = vmatpush.msrb.mxu2 %v699_v59  ;;  %v746_v59 = vld [vmem:[#allocation8 + $0x208] sm:$0xff] }
 0x18e   :  { %824 = vmatpush.msrb.mxu0 %v681_v58  ;;  %866 = vmatpush.msrb.mxu3 %v723_v60  ;;  %v765_v58 = vld [vmem:[#allocation8 + $0x2a0] sm:$0xff]  ;;  %v764_v60 = vld [vmem:[#allocation8 + $0x298] sm:$0xff] }
 0x18f   :  { %825 = vmatmul.f32.vlgmr.msrb.gmra.mxu0 %v3216_v3  ;;  %849 = vmatpush.msrb.mxu2 %v698_v2  ;;  %v719_v3 = vld [vmem:[#allocation8 + $0x130] sm:$0xff] }
 0x190   :  { %913 = vmatpush.msra.mxu0 %v760_v56  ;;  %867 = vmatpush.msrb.mxu3 %v722_v61  ;;  %v788_v56 = vld [vmem:[#allocation8 + $0x358] sm:$0xff]  ;;  %v763_v2 = vld [vmem:[#allocation8 + $0x290] sm:$0xff] }
 0x191   :  { %850 = vmatpush.msrb.mxu2 %v697_v7  ;;  %v787_v61 = vld [vmem:[#allocation8 + $0x350] sm:$0xff]  ;;  %v786_v7 = vld [vmem:[#allocation8 + $0x348] sm:$0xff] }
 0x192   :  { %914 = vmatpush.msra.mxu0 %v759_v5  ;;  %851 = vmatmul.f32.vlgmr.msrb.gmra.mxu2 %v3196_v37  ;;  %v717_v37 = vld [vmem:[#allocation8 + $0x120] sm:$0xff]  ;;  %v762_v5 = vld [vmem:[#allocation8 + $0x288] sm:$0xff] }
 0x193   :  { %868 = vmatpush.msrb.mxu3 %v721_v8  ;;  %939 = vmatpush.msra.mxu2 %v776_v13  ;;  %v761_v8 = vld [vmem:[#allocation8 + $0x280] sm:$0xff]  ;;  %v784_v13 = vld [vmem:[#allocation8 + $0x338] sm:$0xff] }
 0x194   :  { %915 = vmatpush.msra.mxu0 %v758_v11  ;;  %1013 = vmatmul.f32.gmra.mxu1 %v3312_v9  ;;  %v716_v9 = vld [vmem:[#allocation8 + $0x118] sm:$0xff]  ;;  %v785_v11 = vld [vmem:[#allocation8 + $0x340] sm:$0xff] }
 0x195   :  { %869 = vmatpush.msrb.mxu3 %v720_v14  ;;  %940 = vmatpush.msra.mxu2 %v775_v17  ;;  %v782_v14 = vld [vmem:[#allocation8 + $0x328] sm:$0xff]  ;;  %v779_v17 = vld [vmem:[#allocation8 + $0x310] sm:$0xff] }
 0x196   :  { %916 = vmatpush.msra.mxu0 %v757_v50  ;;  %v780_v50 = vld [vmem:[#allocation8 + $0x318] sm:$0xff] }
 0x197   :  { %828 = vmatmul.f32.gmra.mxu0 %v3210_v54  ;;  %870 = vmatpush.msrb.mxu3 %v719_v3  ;;  %v715_v54 = vld [vmem:[#allocation8 + $0x110] sm:$0xff]  ;;  %v777_v3 = vld [vmem:[#allocation8 + $0x300] sm:$0xff] }
 0x198   :  { %917 = vmatpush.msra.mxu0 %v756_v19  ;;  %941 = vmatpush.msra.mxu2 %v774_v51 }
 0x199   :  { %871 = vmatpush.msrb.mxu3 %v718_v21 }
 0x19a   :  { %918 = vmatpush.msra.mxu0 %v755_v23  ;;  %942 = vmatpush.msra.mxu2 %v773_v22 }
 0x19b   :  { %854 = vmatmul.f32.gmra.mxu2 %v3190_v25  ;;  %872 = vmatpush.msrb.mxu3 %v717_v37  ;;  %v713_v25 = vld [vmem:[#allocation8 + $0x100] sm:$0xff] }
 0x19c   :  { %919 = vmatpush.msra.mxu0 %v754_v31  ;;  %943 = vmatpush.msra.mxu2 %v772_v32 }
 0x19d   :  { %873 = vmatpush.msrb.mxu3 %v716_v9 }
 0x19e   :  { %920 = vmatpush.msra.mxu0 %v753_v36  ;;  %944 = vmatpush.msra.mxu2 %v771_v38 }
 0x19f   :  { %831 = vmatmul.f32.gmra.mxu0 %v3206_v47  ;;  %874 = vmatpush.msrb.mxu3 %v715_v54  ;;  %v791_v47 = vld [vmem:[#allocation8 + $0x370] sm:$0xff] }
 0x1a0   :  { %921 = vmatpush.msra.mxu0 %v752_v35  ;;  %945 = vmatpush.msra.mxu2 %v770_v40 }
 0x1a1   :  { %875 = vmatpush.msrb.mxu3 %v714_v41 }
 0x1a2   :  { %922 = vmatpush.msra.mxu0 %v751_v46  ;;  %946 = vmatpush.msra.mxu2 %v769_v43 }
 0x1a3   :  { %857 = vmatmul.f32.gmra.mxu2 %v3187_v18  ;;  %876 = vmatpush.msrb.mxu3 %v713_v25  ;;  %v789_v18 = vld [vmem:[#allocation8 + $0x360] sm:$0xff] }
 0x1a4   :  { %923 = vmatpush.msra.mxu0 %v750_v44  ;;  %947 = vmatpush.msra.mxu2 %v768_v45 }
 0x1a5   :  { %877 = vmatmul.f32.vlgmr.msrb.gmra.mxu3 %v3281_v6  ;;  %v745_v6 = vld [vmem:[#allocation8 + $0x200] sm:$0xff] }
 0x1a6   :  { %965 = vmatpush.msra.mxu3 %v792_v4  ;;  %924 = vmatpush.msra.mxu0 %v749_v48 }
 0x1a7   :  { %948 = vmatpush.msra.mxu2 %v767_v52 }
 0x1a8   :  { %966 = vmatpush.msra.mxu3 %v791_v47  ;;  %925 = vmatpush.msra.mxu0 %v748_v53 }
 0x1a9   :  { %949 = vmatpush.msra.mxu2 %v766_v55 }
 0x1aa   :  { %967 = vmatpush.msra.mxu3 %v790_v12  ;;  %926 = vmatpush.msra.mxu0 %v747_v57  ;;  %v904_v54 = vpop.f32.mrf.mxu1 }
 0x1ab   :  { %950 = vmatpush.msra.mxu2 %v765_v58 }
 0x1ac   :  { %968 = vmatpush.msra.mxu3 %v789_v18  ;;  %927 = vmatpush.msra.mxu0 %v746_v59 }
 0x1ad   :  { %951 = vmatpush.msra.mxu2 %v764_v60  ;;  %880 = vmatmul.f32.gmra.mxu3 %v3276_v10  ;;  %v783_v10 = vld [vmem:[#allocation8 + $0x330] sm:$0xff] }
 0x1ae   :  { %969 = vmatpush.msra.mxu3 %v788_v56  ;;  %928 = vmatpush.msra.mxu0 %v745_v6 }
 0x1af   :  { %952 = vmatpush.msra.mxu2 %v763_v2  ;;  %929 = vmatmul.f32.vlgmr.msra.gmra.mxu0 %v3251_v42  ;;  %v781_v42 = vld [vmem:[#allocation8 + $0x320] sm:$0xff] }
 0x1b0   :  { %970 = vmatpush.msra.mxu3 %v787_v61 }
 0x1b1   :  { %953 = vmatpush.msra.mxu2 %v762_v5 }
 0x1b2   :  { %971 = vmatpush.msra.mxu3 %v786_v7  ;;  %v907_v46 = vpop.f32.mrf.mxu1 }
 0x1b3   :  { %954 = vmatpush.msra.mxu2 %v761_v8 }
 0x1b4   :  { %955 = vmatmul.f32.vlgmr.msra.gmra.mxu2 %v3297_v39  ;;  %972 = vmatpush.msra.mxu3 %v785_v11  ;;  %v778_v39 = vld [vmem:[#allocation8 + $0x308] sm:$0xff] }
 0x1b5   :  { %883 = vmatmul.f32.gmra.mxu3 %v3272_v0 }
 0x1b6   :  { %973 = vmatpush.msra.mxu3 %v784_v13 }
 0x1b7   :  { %932 = vmatmul.f32.gmra.mxu0 %v3242_v1 }
 0x1b8   :  { %974 = vmatpush.msra.mxu3 %v783_v10 }
 0x1ba   :  { %975 = vmatpush.msra.mxu3 %v782_v14 }
 0x1bc   :  { %958 = vmatmul.f32.gmra.mxu2 %v3291_v34  ;;  %976 = vmatpush.msra.mxu3 %v781_v42 }
 0x1be   :  { %977 = vmatpush.msra.mxu3 %v780_v50 }
 0x1bf   :  { %935 = vmatmul.f32.gmra.mxu0 %v3232_v20 }
 0x1c0   :  { %978 = vmatpush.msra.mxu3 %v779_v17 }
 0x1c2   :  { %979 = vmatpush.msra.mxu3 %v778_v39 }
 0x1c4   :  { %961 = vmatmul.f32.gmra.mxu2 %v3287_v30  ;;  %980 = vmatpush.msra.mxu3 %v777_v3 }
 0x1c5   :  { %981 = vmatmul.f32.vlgmr.msra.gmra.mxu3 %v3301_v49 }
 0x1cb   :  { %v277_v1 = vpop.f32.mrf.mxu2 }
 0x1cd   :  { %984 = vmatmul.f32.gmra.mxu3 %v3266_v62 }
 0x1d4   :  { %v300_v0 = vpop.f32.mrf.mxu3  ;;  %v910_v4 = vpop.f32.mrf.mxu1 }
 0x1d5   :  { %987 = vmatmul.f32.gmra.mxu3 %v3261_v63  ;;  %v301_v34 = vadd.f32 %v300_v0, %v277_v1 }
 0x1df   :  { %v417_v21 = vpop.f32.mrf.mxu2 }
 0x1e0   :  { %v476_v23 = vpop.f32.mrf.mxu3 }
 0x1e6   :  { %v358_v19 = vpop.f32.mrf.mxu0 }
 0x1e7   :  { %v361_v51 = vadd.f32 %v358_v19, %v301_v34 }
 0x1e9   :  { %v420_v20 = vadd.f32 %v417_v21, %v361_v51 }
 0x1eb   :  { %v479_v22 = vadd.f32 %v476_v23, %v420_v20 }
 0x1ee   :  { %v535_v37 = vpop.f32.mrf.mxu0 }
 0x1ef   :  { %v538_v31 = vadd.f32 %v535_v37, %v479_v22 }
 0x1f5   :  { %v594_v32 = vpop.f32.mrf.mxu2 }
 0x1f6   :  { %v597_v30 = vadd.f32 %v594_v32, %v538_v31 }
 0x200   :  { %v1008_v58 = vpop.f32.mrf.mxu1 }
 0x208   :  { %v653_v9 = vpop.f32.mrf.mxu3  ;;  %v1011_v10 = vpop.f32.mrf.mxu1 }
 0x209   :  { %v3338_v36 = vadd.f32 %v653_v9, %v597_v30  ;;  %v1037_v30 = vstv %s1036_s5 }
 0x20b   :  { %v3374_v21 = vperm.slane %v3338_v36, 3  ;;  %v1032_v32 = vperm.slane %v3338_v36, 0 }
 0x20c   :  { %v826_v49 = vpop.f32.mrf.mxu0 }
 0x211   :  { %v1014_v34 = vpop.f32.mrf.mxu1 }
 0x214   :  { %v829_v63 = vpop.f32.mrf.mxu0 }
 0x215   :  { %v852_v62 = vpop.f32.mrf.mxu2 }
 0x216   :  { %v853_v25 = vadd.f32 %v852_v62, %v826_v49 }
 0x21c   :  { %v832_v41 = vpop.f32.mrf.mxu0 }
 0x21e   :  { %v855_v35 = vpop.f32.mrf.mxu2 }
 0x21f   :  { %v856_v53 = vadd.f32 %v855_v35, %v829_v63 }
 0x226   :  { %v858_v43 = vpop.f32.mrf.mxu2 }
 0x227   :  { %v859_v61 = vadd.f32 %v858_v43, %v832_v41 }
 0x228   :  { %v878_v38 = vpop.f32.mrf.mxu3 }
 0x229   :  { %v879_v44 = vadd.f32 %v878_v38, %v853_v25  ;;  %v3384_v38 = vperm.slane %v3338_v36, 4 }
 0x22b   :  { %v905_v52 = vadd.f32 %v904_v54, %v879_v44  ;;  %v3386_v54 = vstv %s2832_s16 }
 0x22c   :  { %v930_v45 = vpop.f32.mrf.mxu0 }
 0x22d   :  { %v931_v55 = vadd.f32 %v930_v45, %v905_v52  ;;  %v3393_v45 = vperm.slane %v3338_v36, 1 }
 0x230   :  { %v881_v40 = vpop.f32.mrf.mxu3 }
 0x231   :  { %v882_v12 = vadd.f32 %v881_v40, %v856_v53 }
 0x233   :  { %v908_v59 = vadd.f32 %v907_v46, %v882_v12 }
 0x234   :  { %v933_v60 = vpop.f32.mrf.mxu0 }
 0x235   :  { %v934_v5 = vadd.f32 %v933_v60, %v908_v59 }
 0x237   :  { %v956_v47 = vpop.f32.mrf.mxu2 }
 0x238   :  { %v884_v48 = vpop.f32.mrf.mxu3  ;;  %v957_v57 = vadd.f32 %v956_v47, %v931_v55 }
 0x239   :  { %v885_v7 = vadd.f32 %v884_v48, %v859_v61  ;;  %v3395_v48 = vstv %s2829_s17 }
 0x23b   :  { %v911_v14 = vadd.f32 %v910_v4, %v885_v7 }
 0x23c   :  { %v936_v42 = vpop.f32.mrf.mxu0 }
 0x23d   :  { %v937_v39 = vadd.f32 %v936_v42, %v911_v14 }
 0x23f   :  { %v959_v6 = vpop.f32.mrf.mxu2 }
 0x240   :  { %v960_v8 = vadd.f32 %v959_v6, %v934_v5  ;;  %v1197_v5 = vperm.slane %v3338_v36, 5 }
 0x247   :  { %v962_v17 = vpop.f32.mrf.mxu2 }
 0x248   :  { %v982_v18 = vpop.f32.mrf.mxu3  ;;  %v963_v3 = vadd.f32 %v962_v17, %v937_v39 }
 0x249   :  { %v983_v56 = vadd.f32 %v982_v18, %v957_v57 }
 0x24b   :  { %v1009_v2 = vadd.f32 %v1008_v58, %v983_v56 }
 0x24d   :  { %1153 = vperm.xlu0 %2880, %v1009_v2   ;;  %1087 = vperm.xlu2 %2878, %v1009_v2  }
 0x24e   :  { %1019 = vperm.xlu1 %2876, %v1009_v2  }
 0x250   :  { %v985_v11 = vpop.f32.mrf.mxu3 }
 0x251   :  { %v986_v13 = vadd.f32 %v985_v11, %v960_v8  ;;  %v1202_v8 = vstv %s2833_s18 }
 0x253   :  { %v1012_v50 = vadd.f32 %v1011_v10, %v986_v13 }
 0x255   :  { %2885 = vset.pattern.permute.xlu0 %v3046_v27  ;;  %2879 = vset.pattern.permute.xlu2 %v3045_v26 }
 0x256   :  { %2877 = vset.pattern.permute.xlu1 %v3043_v16  ;;  %1091 = vperm.xlu0 %2885, %v1012_v50  }
 0x257   :  { %1120 = vperm.xlu2 %2879, %v1009_v2   ;;  %1054 = vperm.xlu1 %2877, %v1009_v2  }
 0x258   :  { %v988_v1 = vpop.f32.mrf.mxu3 }
 0x259   :  { %v989_v0 = vadd.f32 %v988_v1, %v963_v3 }
 0x25b   :  { %v1015_v19 = vadd.f32 %v1014_v34, %v989_v0 }
 0x25e   :  { %2890 = vset.pattern.permute.xlu0 %v3044_v24 }
 0x25f   :  { %2883 = vset.pattern.permute.xlu2 %v3044_v24  ;;  %2881 = vset.pattern.permute.xlu1 %v3049_v33 }
 0x260   :  { %1029 = vperm.xlu0 %2890, %v1015_v19   ;;  %1024 = vperm.xlu2 %2883, %v1012_v50  }
 0x261   :  { %1186 = vperm.xlu1 %2881, %v1009_v2  }
 0x268   :  { %2895 = vset.pattern.permute.xlu0 %v3049_v33  ;;  %2884 = vset.pattern.permute.xlu2 %v3043_v16 }
 0x269   :  { %2882 = vset.pattern.permute.xlu1 %v3047_v28  ;;  %1194 = vperm.xlu0 %2895, %v1015_v19  }
 0x26a   :  { %1058 = vperm.xlu2 %2884, %v1012_v50   ;;  %1219 = vperm.xlu1 %2882, %v1009_v2  }
 0x271   :  { %2898 = vset.pattern.permute.xlu0 %v3048_v29 }
 0x272   :  { %2888 = vset.pattern.permute.xlu2 %v3049_v33  ;;  %2886 = vset.pattern.permute.xlu1 %v3045_v26 }
 0x273   :  { %1256 = vperm.xlu0 %2898, %v1012_v50   ;;  %1190 = vperm.xlu2 %2888, %v1012_v50  }
 0x274   :  { %1124 = vperm.xlu1 %2886, %v1012_v50  }
 0x27b   :  { %2889 = vset.pattern.permute.xlu2 %v3047_v28 }
 0x27c   :  { %2887 = vset.pattern.permute.xlu1 %v3042_v15  ;;  %1223 = vperm.xlu2 %2889, %v1012_v50  }
 0x27d   :  { %1157 = vperm.xlu1 %2887, %v1012_v50  }
 0x284   :  { %2893 = vset.pattern.permute.xlu2 %v3045_v26 }
 0x285   :  { %2891 = vset.pattern.permute.xlu1 %v3043_v16  ;;  %1128 = vperm.xlu2 %2893, %v1015_v19   ;;  %v3367_v16 = vstv %s2830_s0 }
 0x286   :  { %1062 = vperm.xlu1 %2891, %v1015_v19  }
 0x28d   :  { %2894 = vset.pattern.permute.xlu2 %v3042_v15  ;;  %v3365_v15 = vperm.slane %v3338_v36, 2 }
 0x28e   :  { %2892 = vset.pattern.permute.xlu1 %v3046_v27  ;;  %1161 = vperm.xlu2 %2894, %v1015_v19  }
 0x28f   :  { %1095 = vperm.xlu1 %2892, %v1015_v19  }
 0x296   :  { %2897 = vset.pattern.permute.xlu2 %v3048_v29 }
 0x297   :  { %2896 = vset.pattern.permute.xlu1 %v3047_v28  ;;  %1252 = vperm.xlu2 %2897, %v1009_v2  }
 0x298   :  { %1227 = vperm.xlu1 %2896, %v1015_v19  }
 0x2a0   :  { %2899 = vset.pattern.permute.xlu1 %v3048_v29  ;;  %v3376_v29 = vstv %s2831_s1 }
 0x2a1   :  { %1260 = vperm.xlu1 %2899, %v1015_v19  }
 0x2a7   :  { %v1088_v26 = vpop.permute.xlu2 %1087 }
 0x2a8   :  { %v1099_v27 = vadd.f32 %v3365_v15, %v1088_v26  ;;  %v3417_v26 = vperm.slane %v3338_v36, 6 }
 0x2aa   :  { %v1104_v28 = vadd.f32 %v3367_v16, %v1099_v27 }
 0x2ac   :  { %vm1107_vm10 = vcmp.ge.f32.partialorder %v1104_v28, 0.0  ;;  %v1110_v33 = vmul.f32 0.33, %v1104_v28 }
 0x2ae   :  { %v3371_v51 = vsel %vm1107_vm10, %v1104_v28, %v1110_v33  ;;  %v3419_v28 = vstv %s2834_s19 }
 0x2b1   :  { %v1121_v20 = vpop.permute.xlu2 %1120 }
 0x2b2   :  { %v1132_v23 = vadd.f32 %v3374_v21, %v1121_v20 }
 0x2b4   :  { %v1137_v22 = vadd.f32 %v3376_v29, %v1132_v23 }
 0x2b6   :  { %vm1140_vm11 = vcmp.ge.f32.partialorder %v1137_v22, 0.0  ;;  %v1143_v37 = vmul.f32 0.33, %v1137_v22 }
 0x2b8   :  { %v3380_v31 = vsel %vm1140_vm11, %v1137_v22, %v1143_v37 }
 0x2ba   :  { %v1025_v9 = vpop.permute.xlu2 %1024 }
 0x2bb   :  { %v1034_v49 = vadd.f32 %v1032_v32, %v1025_v9 }
 0x2bd   :  { %v1039_v62 = vadd.f32 %v1037_v30, %v1034_v49 }
 0x2bf   :  { %vm1042_vm12 = vcmp.ge.f32.partialorder %v1039_v62, 0.0  ;;  %v1045_v63 = vmul.f32 0.33, %v1039_v62  ;;  %v1154_v35 = vpop.permute.xlu0 %1153 }
 0x2c0   :  { %v1165_v40 = vadd.f32 %v3384_v38, %v1154_v35  ;;  %v1020_v41 = vpop.permute.xlu1 %1019 }
 0x2c1   :  { %v3389_v46 = vsel %vm1042_vm12, %v1039_v62, %v1045_v63  ;;  %v1033_v43 = vadd.f32 %v1032_v32, %v1020_v41 }
 0x2c2   :  { %v1170_v25 = vadd.f32 %v3386_v54, %v1165_v40 }
 0x2c3   :  { %v1038_v44 = vadd.f32 %v1037_v30, %v1033_v43 }
 0x2c4   :  { %vm1173_vm13 = vcmp.ge.f32.partialorder %v1170_v25, 0.0  ;;  %v1176_v4 = vmul.f32 0.33, %v1170_v25  ;;  %v1059_v52 = vpop.permute.xlu2 %1058 }
 0x2c5   :  { %vm1041_vm14 = vcmp.ge.f32.partialorder %v1038_v44, 0.0  ;;  %v1044_v47 = vmul.f32 0.33, %v1038_v44  ;;  %v1067_v53 = vadd.f32 %v3393_v45, %v1059_v52 }
 0x2c6   :  { %v3398_v55 = vsel %vm1173_vm13, %v1170_v25, %v1176_v4 }
 0x2c7   :  { %v3400_v12 = vsel %vm1041_vm14, %v1038_v44, %v1044_v47  ;;  %v1072_v57 = vadd.f32 %v3395_v48, %v1067_v53 }
 0x2c8   :  { %v1092_v58 = vpop.permute.xlu0 %1091 }
 0x2c9   :  { %vm1075_vm15 = vcmp.ge.f32.partialorder %v1072_v57, 0.0  ;;  %v1078_v18 = vmul.f32 0.33, %v1072_v57  ;;  %v1100_v59 = vadd.f32 %v3365_v15, %v1092_v58  ;;  %v1055_v60 = vpop.permute.xlu1 %1054 }
 0x2ca   :  { %v1066_v56 = vadd.f32 %v3393_v45, %v1055_v60 }
 0x2cb   :  { %v3405_v6 = vsel %vm1075_vm15, %v1072_v57, %v1078_v18  ;;  %v1105_v2 = vadd.f32 %v3367_v16, %v1100_v59  ;;  %v1263_v18 = vperm.slane %v3338_v36, 7  ;;  %v1268_v59 = vstv %s2835_s20 }
 0x2cc   :  { %v1071_v61 = vadd.f32 %v3395_v48, %v1066_v56 }
 0x2cd   :  { %vm1108_vm1 = vcmp.ge.f32.partialorder %v1105_v2, 0.0  ;;  %v1111_v7 = vmul.f32 0.33, %v1105_v2  ;;  %v1191_v11 = vpop.permute.xlu2 %1190 }
 0x2ce   :  { %vm1074_vm2 = vcmp.ge.f32.partialorder %v1071_v61, 0.0  ;;  %v1077_v13 = vmul.f32 0.33, %v1071_v61  ;;  %v1199_v10 = vadd.f32 %v1197_v5, %v1191_v11 }
 0x2cf   :  { %v3410_v14 = vsel %vm1108_vm1, %v1105_v2, %v1111_v7 }
 0x2d0   :  { %v3412_v42 = vsel %vm1074_vm2, %v1071_v61, %v1077_v13  ;;  %v1204_v50 = vadd.f32 %v1202_v8, %v1199_v10 }
 0x2d2   :  { %vm1207_vm3 = vcmp.ge.f32.partialorder %v1204_v50, 0.0  ;;  %v1210_v17 = vmul.f32 0.33, %v1204_v50  ;;  %v1030_v39 = vpop.permute.xlu0 %1029 }
 0x2d3   :  { %v1035_v3 = vadd.f32 %v1032_v32, %v1030_v39  ;;  %v1187_v1 = vpop.permute.xlu1 %1186 }
 0x2d4   :  { %v3414_v0 = vsel %vm1207_vm3, %v1204_v50, %v1210_v17  ;;  %v1198_v34 = vadd.f32 %v1197_v5, %v1187_v1 }
 0x2d5   :  { %v1040_v19 = vadd.f32 %v1037_v30, %v1035_v3 }
 0x2d6   :  { %v1203_v27 = vadd.f32 %v1202_v8, %v1198_v34  ;;  %v1224_v33 = vpop.permute.xlu2 %1223 }
 0x2d7   :  { %vm1043_vm4 = vcmp.ge.f32.partialorder %v1040_v19, 0.0  ;;  %v1046_v20 = vmul.f32 0.33, %v1040_v19  ;;  %v1232_v23 = vadd.f32 %v3417_v26, %v1224_v33 }
 0x2d8   :  { %vm1206_vm5 = vcmp.ge.f32.partialorder %v1203_v27, 0.0  ;;  %v1209_v22 = vmul.f32 0.33, %v1203_v27 }
 0x2d9   :  { %v3422_v37 = vsel %vm1043_vm4, %v1040_v19, %v1046_v20  ;;  %v1237_v32 = vadd.f32 %v3419_v28, %v1232_v23 }
 0x2da   :  { %v3425_v9 = vsel %vm1206_vm5, %v1203_v27, %v1209_v22  ;;  %1773 = vmatpush.xpose.msrb.mxu0 %v3422_v37 }
 0x2db   :  { %vm1240_vm6 = vcmp.ge.f32.partialorder %v1237_v32, 0.0  ;;  %v1243_v30 = vmul.f32 0.33, %v1237_v32  ;;  %v1195_v49 = vpop.permute.xlu0 %1194 }
 0x2dc   :  { %v1200_v62 = vadd.f32 %v1197_v5, %v1195_v49  ;;  %v1220_v63 = vpop.permute.xlu1 %1219 }
 0x2dd   :  { %v3427_v35 = vsel %vm1240_vm6, %v1237_v32, %v1243_v30  ;;  %v1231_v40 = vadd.f32 %v3417_v26, %v1220_v63 }
 0x2de   :  { %v1205_v41 = vadd.f32 %v1202_v8, %v1200_v62 }
 0x2df   :  { %v1236_v43 = vadd.f32 %v3419_v28, %v1231_v40  ;;  %v1129_v25 = vpop.permute.xlu2 %1128 }
 0x2e0   :  { %vm1208_vm7 = vcmp.ge.f32.partialorder %v1205_v41, 0.0  ;;  %v1211_v44 = vmul.f32 0.33, %v1205_v41  ;;  %v1134_v4 = vadd.f32 %v3374_v21, %v1129_v25 }
 0x2e1   :  { %vm1239_vm8 = vcmp.ge.f32.partialorder %v1236_v43, 0.0  ;;  %v1242_v52 = vmul.f32 0.33, %v1236_v43 }
 0x2e2   :  { %v3432_v47 = vsel %vm1208_vm7, %v1205_v41, %v1211_v44  ;;  %v1139_v53 = vadd.f32 %v3376_v29, %v1134_v4 }
 0x2e3   :  { %v3435_v57 = vsel %vm1239_vm8, %v1236_v43, %v1242_v52 }
 0x2e4   :  { %vm1142_vm9 = vcmp.ge.f32.partialorder %v1139_v53, 0.0  ;;  %v1145_v58 = vmul.f32 0.33, %v1139_v53 }
 0x2e5   :  { %v1257_v60 = vpop.permute.xlu0 %1256 }
 0x2e6   :  { %v1148_v56 = vsel %vm1142_vm9, %v1139_v53, %v1145_v58  ;;  %v1265_v2 = vadd.f32 %v1263_v18, %v1257_v60  ;;  %v1125_v61 = vpop.permute.xlu1 %1124 }
 0x2e7   :  { %v1133_v5 = vadd.f32 %v3374_v21, %v1125_v61 }
 0x2e8   :  { %v1270_v7 = vadd.f32 %v1268_v59, %v1265_v2  ;;  %v1162_v8 = vpop.permute.xlu2 %1161 }
 0x2e9   :  { %v1138_v11 = vadd.f32 %v3376_v29, %v1133_v5  ;;  %v1167_v13 = vadd.f32 %v3384_v38, %v1162_v8 }
 0x2ea   :  { %vm1273_vm10 = vcmp.ge.f32.partialorder %v1270_v7, 0.0  ;;  %v1276_v10 = vmul.f32 0.33, %v1270_v7 }
 0x2eb   :  { %vm1141_vm11 = vcmp.ge.f32.partialorder %v1138_v11, 0.0  ;;  %v1144_v50 = vmul.f32 0.33, %v1138_v11  ;;  %v1172_v17 = vadd.f32 %v3386_v54, %v1167_v13 }
 0x2ec   :  { %v3442_v36 = vsel %vm1273_vm10, %v1270_v7, %v1276_v10 }
 0x2ed   :  { %v1147_v39 = vsel %vm1141_vm11, %v1138_v11, %v1144_v50  ;;  %vm1175_vm12 = vcmp.ge.f32.partialorder %v1172_v17, 0.0  ;;  %v1178_v3 = vmul.f32 0.33, %v1172_v17 }
 0x2ef   :  { %v1181_v1 = vsel %vm1175_vm12, %v1172_v17, %v1178_v3  ;;  %v1158_v34 = vpop.permute.xlu1 %1157 }
 0x2f0   :  { %v1166_v21 = vadd.f32 %v3384_v38, %v1158_v34 }
 0x2f1   :  { %v1253_v19 = vpop.permute.xlu2 %1252 }
 0x2f2   :  { %v1171_v29 = vadd.f32 %v3386_v54, %v1166_v21  ;;  %v1264_v27 = vadd.f32 %v1263_v18, %v1253_v19 }
 0x2f4   :  { %vm1174_vm13 = vcmp.ge.f32.partialorder %v1171_v29, 0.0  ;;  %v1177_v33 = vmul.f32 0.33, %v1171_v29  ;;  %v1269_v20 = vadd.f32 %v1268_v59, %v1264_v27 }
 0x2f6   :  { %v1180_v23 = vsel %vm1174_vm13, %v1171_v29, %v1177_v33  ;;  %vm1272_vm14 = vcmp.ge.f32.partialorder %v1269_v20, 0.0  ;;  %v1275_v22 = vmul.f32 0.33, %v1269_v20 }
 0x2f8   :  { %v3446_v32 = vsel %vm1272_vm14, %v1269_v20, %v1275_v22  ;;  %v1063_v30 = vpop.permute.xlu1 %1062 }
 0x2f9   :  { %v1068_v49 = vadd.f32 %v3393_v45, %v1063_v30 }
 0x2fb   :  { %v1073_v62 = vadd.f32 %v3395_v48, %v1068_v49 }
 0x2fd   :  { %vm1076_vm15 = vcmp.ge.f32.partialorder %v1073_v62, 0.0  ;;  %v1079_v63 = vmul.f32 0.33, %v1073_v62 }
 0x2ff   :  { %v1082_v38 = vsel %vm1076_vm15, %v1073_v62, %v1079_v63 }
 0x300   :  { %1886 = vmatpush.xpose.msrb.mxu2 %v1082_v38 }
 0x301   :  { %v1096_v40 = vpop.permute.xlu1 %1095 }
 0x302   :  { %v1101_v54 = vadd.f32 %v3365_v15, %v1096_v40 }
 0x304   :  { %v1106_v41 = vadd.f32 %v3367_v16, %v1101_v54 }
 0x306   :  { %vm1109_vm1 = vcmp.ge.f32.partialorder %v1106_v41, 0.0  ;;  %v1112_v43 = vmul.f32 0.33, %v1106_v41 }
 0x308   :  { %v1115_v25 = vsel %vm1109_vm1, %v1106_v41, %v1112_v43 }
 0x30a   :  { %v1228_v44 = vpop.permute.xlu1 %1227 }
 0x30b   :  { %v1233_v4 = vadd.f32 %v3417_v26, %v1228_v44 }
 0x30d   :  { %v1238_v52 = vadd.f32 %v3419_v28, %v1233_v4 }
 0x30f   :  { %vm1241_vm2 = vcmp.ge.f32.partialorder %v1238_v52, 0.0  ;;  %v1244_v45 = vmul.f32 0.33, %v1238_v52 }
 0x311   :  { %v1247_v53 = vsel %vm1241_vm2, %v1238_v52, %v1244_v45 }
 0x313   :  { %v1261_v48 = vpop.permute.xlu1 %1260 }
 0x314   :  { %v1266_v58 = vadd.f32 %v1263_v18, %v1261_v48 }
 0x316   :  { %v1271_v60 = vadd.f32 %v1268_v59, %v1266_v58 }
 0x318   :  { %vm1274_vm3 = vcmp.ge.f32.partialorder %v1271_v60, 0.0  ;;  %v1277_v2 = vmul.f32 0.33, %v1271_v60 }
 0x31a   :  { %v1280_v61 = vsel %vm1274_vm3, %v1271_v60, %v1277_v2 }
 0x31b   :  { %3033 = dma.done.wait [#allocation4], 32768 }
 0x31c   :  { %3034 = vsyncadd [#allocation4], 4294934528  ;;  %1999 = vmatpush.xpose.msrb.mxu3 %v1115_v25  ;;  %2112 = vmatpush.xpose.msrb.mxu1 %v1148_v56  ;;  %v1288_v15 = vld [vmem:[#allocation3] sm:$0xff]  ;;  %v1289_v16 = vld [vmem:[#allocation3 + $0x8] sm:$0xff] }
 0x31d   :  { %2900 = vset.pattern.permute.xlu0 %v3044_v24  ;;  %2901 = vset.pattern.permute.xlu1 %v3044_v24  ;;  %v1290_v26 = vld [vmem:[#allocation3 + $0x10] sm:$0xff]  ;;  %v1299_v28 = vld [vmem:[#allocation3 + $0x58] sm:$0xff]  ;;  %v1305_v37 = vld [vmem:[#allocation3 + $0x88] sm:$0xff] }
 0x31e   :  { %2902 = vset.pattern.permute.xlu2 %v3044_v24  ;;  %1774 = vmatpush.xpose.msrb.mxu0 %v3389_v46  ;;  %v1568_v24 = vld [vmem:[#allocation13] sm:$0xff]  ;;  %v1291_v46 = vld [vmem:[#allocation3 + $0x18] sm:$0xff]  ;;  %v1574_v59 = vld [vmem:[#allocation13 + $0x30] sm:$0xff] }
 0x31f   :  { %1887 = vmatpush.xpose.msrb.mxu2 %v3405_v6  ;;  %v1570_v6 = vld [vmem:[#allocation13 + $0x10] sm:$0xff]  ;;  %1602 = vperm.xlu0 %2900, %v1568_v24   ;;  %v1315_v18 = vld [vmem:[#allocation3 + $0xd8] sm:$0xff]  ;;  %v1320_v56 = vld [vmem:[#allocation3 + $0x100] sm:$0xff] }
 0x320   :  { %2000 = vmatpush.xpose.msrb.mxu3 %v3410_v14  ;;  %2113 = vmatpush.xpose.msrb.mxu1 %v1147_v39  ;;  %v1298_v14 = vld [vmem:[#allocation3 + $0x50] sm:$0xff]  ;;  %v1321_v5 = vld [vmem:[#allocation3 + $0x108] sm:$0xff]  ;;  %v1323_v8 = vld [vmem:[#allocation3 + $0x118] sm:$0xff] }
 0x321   :  { %1612 = vperm.xlu1 %2901, %v1570_v6   ;;  %v1322_v7 = vld [vmem:[#allocation3 + $0x110] sm:$0xff]  ;;  %v1572_v11 = vld [vmem:[#allocation13 + $0x20] sm:$0xff]  ;;  %v1575_v13 = vld [vmem:[#allocation13 + $0x38] sm:$0xff] }
 0x322   :  { %1775 = vmatpush.xpose.msrb.mxu0 %v3400_v12  ;;  %v1297_v12 = vld [vmem:[#allocation3 + $0x48] sm:$0xff]  ;;  %1622 = vperm.xlu2 %2902, %v1572_v11   ;;  %v1328_v10 = vld [vmem:[#allocation3 + $0x140] sm:$0xff]  ;;  %v1330_v17 = vld [vmem:[#allocation3 + $0x150] sm:$0xff] }
 0x323   :  { %1888 = vmatpush.xpose.msrb.mxu2 %v3412_v42  ;;  %v1569_v42 = vld [vmem:[#allocation13 + $0x8] sm:$0xff]  ;;  %v1336_v3 = vld [vmem:[#allocation3 + $0x180] sm:$0xff]  ;;  %v1338_v34 = vld [vmem:[#allocation3 + $0x190] sm:$0xff] }
 0x324   :  { %2001 = vmatpush.xpose.msrb.mxu3 %v3371_v51  ;;  %2114 = vmatpush.xpose.msrb.mxu1 %v3380_v31  ;;  %v1296_v51 = vld [vmem:[#allocation3 + $0x40] sm:$0xff]  ;;  %v1571_v31 = vld [vmem:[#allocation13 + $0x18] sm:$0xff]  ;;  %v1329_v50 = vld [vmem:[#allocation3 + $0x148] sm:$0xff] }
 0x325   :  { %1776 = vmatmul.f32.vlgmr.msrb.gmra.mxu0 %v1288_v15  ;;  %v1573_v39 = vld [vmem:[#allocation13 + $0x28] sm:$0xff]  ;;  %v1339_v21 = vld [vmem:[#allocation3 + $0x198] sm:$0xff]  ;;  %v1344_v29 = vld [vmem:[#allocation3 + $0x1c0] sm:$0xff] }
 0x326   :  { %2225 = vmatpush.xpose.msra.mxu0 %v1181_v1  ;;  %1889 = vmatmul.f32.vlgmr.msrb.gmra.mxu2 %v1289_v16  ;;  %v1337_v1 = vld [vmem:[#allocation3 + $0x188] sm:$0xff]  ;;  %v1346_v33 = vld [vmem:[#allocation3 + $0x1d0] sm:$0xff]  ;;  %v1347_v20 = vld [vmem:[#allocation3 + $0x1d8] sm:$0xff] }
 0x327   :  { %2338 = vmatpush.xpose.msra.mxu2 %v3432_v47  ;;  %2002 = vmatmul.f32.vlgmr.msrb.gmra.mxu3 %v1290_v26  ;;  %v1312_v47 = vld [vmem:[#allocation3 + $0xc0] sm:$0xff]  ;;  %v1577_v19 = vld [vmem:[#allocation13 + $0x48] sm:$0xff]  ;;  %v1354_v30 = vld [vmem:[#allocation3 + $0x210] sm:$0xff] }
 0x328   :  { %2451 = vmatpush.xpose.msra.mxu3 %v1247_v53  ;;  %2837 = vmatpush.xpose.msra.mxu1 %v1280_v61  ;;  %v1345_v27 = vld [vmem:[#allocation3 + $0x1c8] sm:$0xff]  ;;  %v1352_v22 = vld [vmem:[#allocation3 + $0x200] sm:$0xff]  ;;  %v1355_v49 = vld [vmem:[#allocation3 + $0x218] sm:$0xff] }
 0x329   :  { %2115 = vmatmul.f32.vlgmr.msrb.gmra.mxu1 %v1291_v46  ;;  %1607 = vperm.xlu0 %2900, %v1569_v42   ;;  %v1576_v62 = vld [vmem:[#allocation13 + $0x40] sm:$0xff]  ;;  %v1361_v38 = vld [vmem:[#allocation3 + $0x248] sm:$0xff]  ;;  %v1362_v40 = vld [vmem:[#allocation3 + $0x250] sm:$0xff] }
 0x32a   :  { %2226 = vmatpush.xpose.msra.mxu0 %v1180_v23  ;;  %1617 = vperm.xlu1 %2901, %v1571_v31   ;;  %v1578_v23 = vld [vmem:[#allocation13 + $0x50] sm:$0xff]  ;;  %v1360_v63 = vld [vmem:[#allocation3 + $0x240] sm:$0xff]  ;;  %v1363_v54 = vld [vmem:[#allocation3 + $0x258] sm:$0xff] }
 0x32b   :  { %2339 = vmatpush.xpose.msra.mxu2 %v3414_v0  ;;  %v1304_v0 = vld [vmem:[#allocation3 + $0x80] sm:$0xff]  ;;  %1627 = vperm.xlu2 %2902, %v1573_v39   ;;  %v1369_v25 = vld [vmem:[#allocation3 + $0x288] sm:$0xff]  ;;  %v1370_v44 = vld [vmem:[#allocation3 + $0x290] sm:$0xff] }
 0x32c   :  { %2452 = vmatpush.xpose.msra.mxu3 %v3427_v35  ;;  %2838 = vmatpush.xpose.msra.mxu1 %v3442_v36  ;;  %v1306_v35 = vld [vmem:[#allocation3 + $0x90] sm:$0xff]  ;;  %v1580_v41 = vld [vmem:[#allocation13 + $0x60] sm:$0xff]  ;;  %v1371_v4 = vld [vmem:[#allocation3 + $0x298] sm:$0xff] }
 0x32d   :  { %1779 = vmatmul.f32.gmra.mxu0 %v1296_v51  ;;  %v1368_v43 = vld [vmem:[#allocation3 + $0x280] sm:$0xff]  ;;  %v1581_v52 = vld [vmem:[#allocation13 + $0x68] sm:$0xff]  ;;  %v1378_v48 = vld [vmem:[#allocation3 + $0x2d0] sm:$0xff] }
 0x32e   :  { %1892 = vmatmul.f32.gmra.mxu2 %v1297_v12  ;;  %2227 = vmatpush.xpose.msra.mxu0 %v3398_v55  ;;  %v1313_v55 = vld [vmem:[#allocation3 + $0xc8] sm:$0xff]  ;;  %v1376_v45 = vld [vmem:[#allocation3 + $0x2c0] sm:$0xff]  ;;  %v1379_v58 = vld [vmem:[#allocation3 + $0x2d8] sm:$0xff] }
 0x32f   :  { %2340 = vmatpush.xpose.msra.mxu2 %v3425_v9  ;;  %2005 = vmatmul.f32.gmra.mxu3 %v1298_v14  ;;  %v1307_v9 = vld [vmem:[#allocation3 + $0x98] sm:$0xff]  ;;  %v1377_v53 = vld [vmem:[#allocation3 + $0x2c8] sm:$0xff]  ;;  %v1384_v2 = vld [vmem:[#allocation3 + $0x300] sm:$0xff] }
 0x330   :  { %2453 = vmatpush.xpose.msra.mxu3 %v3435_v57  ;;  %2839 = vmatpush.xpose.msra.mxu1 %v3446_v32  ;;  %v1314_v57 = vld [vmem:[#allocation3 + $0xd0] sm:$0xff]  ;;  %v1579_v60 = vld [vmem:[#allocation13 + $0x58] sm:$0xff]  ;;  %v1392_v24 = vld [vmem:[#allocation3 + $0x340] sm:$0xff] }
 0x331   :  { %2118 = vmatmul.f32.gmra.mxu1 %v1299_v28  ;;  %1632 = vperm.xlu0 %2900, %v1574_v59   ;;  %v1386_v15 = vld [vmem:[#allocation3 + $0x310] sm:$0xff]  ;;  %v1387_v16 = vld [vmem:[#allocation3 + $0x318] sm:$0xff]  ;;  %v1393_v46 = vld [vmem:[#allocation3 + $0x348] sm:$0xff] }
 0x332   :  { %2564 = vmatpush.xpose.msrb.mxu0 %v1280_v61  ;;  %1637 = vperm.xlu1 %2901, %v1575_v13   ;;  %v1385_v61 = vld [vmem:[#allocation3 + $0x308] sm:$0xff]  ;;  %v1583_v26 = vld [vmem:[#allocation13 + $0x78] sm:$0xff]  ;;  %v1394_v6 = vld [vmem:[#allocation3 + $0x350] sm:$0xff] }
 0x333   :  { %1642 = vperm.xlu2 %2902, %v1576_v62   ;;  %v1395_v51 = vld [vmem:[#allocation3 + $0x358] sm:$0xff]  ;;  %v1584_v12 = vld [vmem:[#allocation13 + $0x80] sm:$0xff]  ;;  %v1401_v42 = vld [vmem:[#allocation3 + $0x388] sm:$0xff] }
 0x334   :  { %v1400_v14 = vld [vmem:[#allocation3 + $0x380] sm:$0xff]  ;;  %v1402_v31 = vld [vmem:[#allocation3 + $0x390] sm:$0xff]  ;;  %v1403_v28 = vld [vmem:[#allocation3 + $0x398] sm:$0xff] }
 0x335   :  { %1782 = vmatmul.f32.gmra.mxu0 %v1304_v0  ;;  %v1582_v0 = vld [vmem:[#allocation13 + $0x70] sm:$0xff]  ;;  %v1416_v59 = vld [vmem:[#allocation3 + $0x400] sm:$0xff] }
 0x336   :  { %1895 = vmatmul.f32.gmra.mxu2 %v1305_v37  ;;  %2565 = vmatpush.xpose.msrb.mxu0 %v3442_v36  ;;  %v1331_v36 = vld [vmem:[#allocation3 + $0x158] sm:$0xff]  ;;  %v1408_v37 = vld [vmem:[#allocation3 + $0x3c0] sm:$0xff] }
 0x337   :  { %2008 = vmatmul.f32.gmra.mxu3 %v1306_v35  ;;  %v1409_v35 = vld [vmem:[#allocation3 + $0x3c8] sm:$0xff]  ;;  %v1424_v39 = vld [vmem:[#allocation3 + $0x440] sm:$0xff] }
 0x338   :  { %v1432_v62 = vld [vmem:[#allocation3 + $0x480] sm:$0xff] }
 0x339   :  { %2121 = vmatmul.f32.gmra.mxu1 %v1307_v9  ;;  %1647 = vperm.xlu0 %2900, %v1577_v19   ;;  %v1410_v9 = vld [vmem:[#allocation3 + $0x3d0] sm:$0xff] }
 0x33a   :  { %2566 = vmatpush.xpose.msrb.mxu0 %v3446_v32  ;;  %1652 = vperm.xlu1 %2901, %v1578_v23   ;;  %v1353_v32 = vld [vmem:[#allocation3 + $0x208] sm:$0xff] }
 0x33b   :  { %1657 = vperm.xlu2 %2902, %v1579_v60  }
 0x33d   :  { %1785 = vmatmul.f32.gmra.mxu0 %v1312_v47  ;;  %v1411_v47 = vld [vmem:[#allocation3 + $0x3d8] sm:$0xff] }
 0x33e   :  { %1898 = vmatmul.f32.gmra.mxu2 %v1313_v55  ;;  %v1586_v55 = vld [vmem:[#allocation13 + $0x90] sm:$0xff] }
 0x33f   :  { %2011 = vmatmul.f32.gmra.mxu3 %v1314_v57 }
 0x341   :  { %2124 = vmatmul.f32.gmra.mxu1 %v1315_v18  ;;  %1662 = vperm.xlu0 %2900, %v1580_v41  }
 0x342   :  { %1667 = vperm.xlu1 %2901, %v1581_v52  }
 0x343   :  { %1672 = vperm.xlu2 %2902, %v1582_v0  }
 0x345   :  { %1788 = vmatmul.f32.gmra.mxu0 %v1320_v56  ;;  %v1417_v56 = vld [vmem:[#allocation3 + $0x408] sm:$0xff] }
 0x346   :  { %1901 = vmatmul.f32.gmra.mxu2 %v1321_v5  ;;  %v1418_v5 = vld [vmem:[#allocation3 + $0x410] sm:$0xff] }
 0x347   :  { %2014 = vmatmul.f32.gmra.mxu3 %v1322_v7 }
 0x349   :  { %2127 = vmatmul.f32.gmra.mxu1 %v1323_v8  ;;  %1677 = vperm.xlu0 %2900, %v1583_v26   ;;  %v1419_v8 = vld [vmem:[#allocation3 + $0x418] sm:$0xff] }
 0x34a   :  { %1682 = vperm.xlu1 %2901, %v1584_v12   ;;  %v1443_v26 = vld [vmem:[#allocation3 + $0x4d8] sm:$0xff]  ;;  %v1590_v12 = vld [vmem:[#allocation13 + $0xb0] sm:$0xff] }
 0x34d   :  { %1791 = vmatmul.f32.gmra.mxu0 %v1328_v10 }
 0x34e   :  { %1904 = vmatmul.f32.gmra.mxu2 %v1329_v50 }
 0x34f   :  { %2017 = vmatmul.f32.gmra.mxu3 %v1330_v17  ;;  %v1587_v17 = vld [vmem:[#allocation13 + $0x98] sm:$0xff] }
 0x351   :  { %2130 = vmatmul.f32.gmra.mxu1 %v1331_v36  ;;  %1692 = vperm.xlu0 %2900, %v1586_v55  }
 0x352   :  { %1697 = vperm.xlu1 %2901, %v1587_v17  }
 0x355   :  { %1794 = vmatmul.f32.gmra.mxu0 %v1336_v3  ;;  %v1425_v3 = vld [vmem:[#allocation3 + $0x448] sm:$0xff] }
 0x356   :  { %1907 = vmatmul.f32.gmra.mxu2 %v1337_v1 }
 0x357   :  { %2020 = vmatmul.f32.gmra.mxu3 %v1338_v34  ;;  %v1426_v34 = vld [vmem:[#allocation3 + $0x450] sm:$0xff] }
 0x359   :  { %2133 = vmatmul.f32.gmra.mxu1 %v1339_v21 }
 0x35a   :  { %1712 = vperm.xlu1 %2901, %v1590_v12   ;;  %v1482_v12 = vld [vmem:[#allocation3 + $0x610] sm:$0xff] }
 0x35d   :  { %1797 = vmatmul.f32.gmra.mxu0 %v1344_v29 }
 0x35e   :  { %1910 = vmatmul.f32.gmra.mxu2 %v1345_v27  ;;  %v1427_v27 = vld [vmem:[#allocation3 + $0x458] sm:$0xff] }
 0x35f   :  { %2023 = vmatmul.f32.gmra.mxu3 %v1346_v33 }
 0x361   :  { %2136 = vmatmul.f32.gmra.mxu1 %v1347_v20 }
 0x365   :  { %1800 = vmatmul.f32.gmra.mxu0 %v1352_v22 }
 0x366   :  { %1913 = vmatmul.f32.gmra.mxu2 %v1353_v32  ;;  %v1585_v32 = vld [vmem:[#allocation13 + $0x88] sm:$0xff] }
 0x367   :  { %2026 = vmatmul.f32.gmra.mxu3 %v1354_v30  ;;  %1687 = vperm.xlu2 %2902, %v1585_v32  }
 0x369   :  { %2139 = vmatmul.f32.gmra.mxu1 %v1355_v49 }
 0x36d   :  { %1803 = vmatmul.f32.gmra.mxu0 %v1360_v63  ;;  %v1433_v63 = vld [vmem:[#allocation3 + $0x488] sm:$0xff] }
 0x36e   :  { %1916 = vmatmul.f32.gmra.mxu2 %v1361_v38 }
 0x36f   :  { %2029 = vmatmul.f32.gmra.mxu3 %v1362_v40  ;;  %v1434_v40 = vld [vmem:[#allocation3 + $0x490] sm:$0xff] }
 0x371   :  { %2142 = vmatmul.f32.gmra.mxu1 %v1363_v54 }
 0x375   :  { %1806 = vmatmul.f32.gmra.mxu0 %v1368_v43  ;;  %v1435_v43 = vld [vmem:[#allocation3 + $0x498] sm:$0xff] }
 0x376   :  { %1919 = vmatmul.f32.gmra.mxu2 %v1369_v25 }
 0x377   :  { %2032 = vmatmul.f32.gmra.mxu3 %v1370_v44 }
 0x379   :  { %2145 = vmatmul.f32.gmra.mxu1 %v1371_v4 }
 0x37d   :  { %1809 = vmatmul.f32.gmra.mxu0 %v1376_v45  ;;  %v1589_v45 = vld [vmem:[#allocation13 + $0xa8] sm:$0xff] }
 0x37e   :  { %1922 = vmatmul.f32.gmra.mxu2 %v1377_v53  ;;  %1707 = vperm.xlu0 %2900, %v1589_v45  }
 0x37f   :  { %2035 = vmatmul.f32.gmra.mxu3 %v1378_v48  ;;  %v1440_v48 = vld [vmem:[#allocation3 + $0x4c0] sm:$0xff] }
 0x381   :  { %2148 = vmatmul.f32.gmra.mxu1 %v1379_v58  ;;  %v1441_v58 = vld [vmem:[#allocation3 + $0x4c8] sm:$0xff] }
 0x385   :  { %1812 = vmatmul.f32.gmra.mxu0 %v1384_v2  ;;  %v1442_v2 = vld [vmem:[#allocation3 + $0x4d0] sm:$0xff] }
 0x386   :  { %1925 = vmatmul.f32.gmra.mxu2 %v1385_v61 }
 0x387   :  { %2038 = vmatmul.f32.gmra.mxu3 %v1386_v15 }
 0x389   :  { %2151 = vmatmul.f32.gmra.mxu1 %v1387_v16 }
 0x38d   :  { %1815 = vmatmul.f32.gmra.mxu0 %v1392_v24 }
 0x38e   :  { %1928 = vmatmul.f32.gmra.mxu2 %v1393_v46 }
 0x38f   :  { %2041 = vmatmul.f32.gmra.mxu3 %v1394_v6 }
 0x391   :  { %2154 = vmatmul.f32.gmra.mxu1 %v1395_v51  ;;  %v1603_v18 = vpop.permute.xlu0 %1602 }
 0x393   :  { %v1613_v49 = vpop.permute.xlu1 %1612 }
 0x395   :  { %1818 = vmatmul.f32.gmra.mxu0 %v1400_v14 }
 0x396   :  { %1931 = vmatmul.f32.gmra.mxu2 %v1401_v42  ;;  %v1623_v42 = vpop.permute.xlu2 %1622 }
 0x397   :  { %2044 = vmatmul.f32.gmra.mxu3 %v1402_v31  ;;  %v1448_v31 = vld [vmem:[#allocation3 + $0x500] sm:$0xff] }
 0x399   :  { %2157 = vmatmul.f32.gmra.mxu1 %v1403_v28  ;;  %v1449_v28 = vld [vmem:[#allocation3 + $0x508] sm:$0xff] }
 0x39b   :  { %v1608_v21 = vpop.permute.xlu0 %1607 }
 0x39c   :  { %v1618_v61 = vpop.permute.xlu1 %1617 }
 0x39d   :  { %1821 = vmatmul.f32.gmra.mxu0 %v1408_v37  ;;  %v1450_v37 = vld [vmem:[#allocation3 + $0x510] sm:$0xff] }
 0x39e   :  { %1934 = vmatmul.f32.gmra.mxu2 %v1409_v35 }
 0x39f   :  { %2047 = vmatmul.f32.gmra.mxu3 %v1410_v9 }
 0x3a1   :  { %2160 = vmatmul.f32.gmra.mxu1 %v1411_v47  ;;  %v1451_v47 = vld [vmem:[#allocation3 + $0x518] sm:$0xff] }
 0x3a2   :  { %v1777_v57 = vpop.f32.mrf.mxu0 }
 0x3a3   :  { %v1778_v11 = vadd.f32 %v1777_v57, %v1603_v18 }
 0x3a4   :  { %v1638_v45 = vpop.permute.xlu1 %1637 }
 0x3a5   :  { %1824 = vmatmul.f32.gmra.mxu0 %v1416_v59 }
 0x3a6   :  { %1937 = vmatmul.f32.gmra.mxu2 %v1417_v56  ;;  %v2116_v7 = vpop.f32.mrf.mxu1  ;;  %v1588_v56 = vld [vmem:[#allocation13 + $0xa0] sm:$0xff] }
 0x3a7   :  { %2050 = vmatmul.f32.gmra.mxu3 %v1418_v5  ;;  %1702 = vperm.xlu2 %2902, %v1588_v56  }
 0x3a9   :  { %v1890_v13 = vpop.f32.mrf.mxu2  ;;  %2163 = vmatmul.f32.gmra.mxu1 %v1419_v8  ;;  %v1457_v8 = vld [vmem:[#allocation3 + $0x548] sm:$0xff] }
 0x3aa   :  { %v1891_v10 = vadd.f32 %v1890_v13, %v1778_v11  ;;  %v2003_v50 = vpop.f32.mrf.mxu3  ;;  %v1780_v36 = vpop.f32.mrf.mxu0  ;;  %v1458_v13 = vld [vmem:[#allocation3 + $0x550] sm:$0xff] }
 0x3ab   :  { %v1781_v33 = vadd.f32 %v1780_v36, %v1608_v21  ;;  %v1459_v36 = vld [vmem:[#allocation3 + $0x558] sm:$0xff]  ;;  %v1592_v21 = vld [vmem:[#allocation13 + $0xc0] sm:$0xff] }
 0x3ac   :  { %v2004_v1 = vadd.f32 %v2003_v50, %v1891_v10  ;;  %v1628_v10 = vpop.permute.xlu2 %1627  ;;  %1722 = vperm.xlu0 %2900, %v1592_v21   ;;  %v1497_v21 = vld [vmem:[#allocation3 + $0x688] sm:$0xff] }
 0x3ad   :  { %1827 = vmatmul.f32.gmra.mxu0 %v1424_v39 }
 0x3ae   :  { %v3475_v19 = vadd.f32 %v2116_v7, %v2004_v1  ;;  %1940 = vmatmul.f32.gmra.mxu2 %v1425_v3  ;;  %v2119_v29 = vpop.f32.mrf.mxu1  ;;  %v1456_v7 = vld [vmem:[#allocation3 + $0x540] sm:$0xff] }
 0x3af   :  { %2053 = vmatmul.f32.gmra.mxu3 %v1426_v34 }
 0x3b1   :  { %v1893_v20 = vpop.f32.mrf.mxu2  ;;  %2166 = vmatmul.f32.gmra.mxu1 %v1427_v27  ;;  %v1464_v27 = vld [vmem:[#allocation3 + $0x580] sm:$0xff] }
 0x3b2   :  { %v1894_v23 = vadd.f32 %v1893_v20, %v1781_v33  ;;  %v2006_v22 = vpop.f32.mrf.mxu3  ;;  %v1783_v30 = vpop.f32.mrf.mxu0  ;;  %v1465_v33 = vld [vmem:[#allocation3 + $0x588] sm:$0xff] }
 0x3b3   :  { %v1784_v25 = vadd.f32 %v1783_v30, %v1613_v49  ;;  %v1467_v49 = vld [vmem:[#allocation3 + $0x598] sm:$0xff] }
 0x3b4   :  { %v2007_v38 = vadd.f32 %v2006_v22, %v1894_v23  ;;  %v1466_v23 = vld [vmem:[#allocation3 + $0x590] sm:$0xff]  ;;  %v1633_v22 = vpop.permute.xlu0 %1632 }
 0x3b5   :  { %1830 = vmatmul.f32.gmra.mxu0 %v1432_v62 }
 0x3b6   :  { %v3477_v54 = vadd.f32 %v2119_v29, %v2007_v38  ;;  %1943 = vmatmul.f32.gmra.mxu2 %v1433_v63  ;;  %v2122_v41 = vpop.f32.mrf.mxu1 }
 0x3b7   :  { %2056 = vmatmul.f32.gmra.mxu3 %v1434_v40 }
 0x3b9   :  { %v1896_v44 = vpop.f32.mrf.mxu2  ;;  %2169 = vmatmul.f32.gmra.mxu1 %v1435_v43 }
 0x3ba   :  { %v1897_v4 = vadd.f32 %v1896_v44, %v1784_v25  ;;  %v2009_v52 = vpop.f32.mrf.mxu3  ;;  %v1786_v53 = vpop.f32.mrf.mxu0  ;;  %v1472_v25 = vld [vmem:[#allocation3 + $0x5c0] sm:$0xff]  ;;  %v1473_v44 = vld [vmem:[#allocation3 + $0x5c8] sm:$0xff] }
 0x3bb   :  { %v1787_v24 = vadd.f32 %v1786_v53, %v1618_v61 }
 0x3bc   :  { %v2010_v60 = vadd.f32 %v2009_v52, %v1897_v4  ;;  %v1474_v52 = vld [vmem:[#allocation3 + $0x5d0] sm:$0xff] }
 0x3bd   :  { %1833 = vmatmul.f32.gmra.mxu0 %v1440_v48 }
 0x3be   :  { %v3479_v15 = vadd.f32 %v2122_v41, %v2010_v60  ;;  %1946 = vmatmul.f32.gmra.mxu2 %v1441_v58  ;;  %v2125_v16 = vpop.f32.mrf.mxu1  ;;  %v1593_v41 = vld [vmem:[#allocation13 + $0xc8] sm:$0xff]  ;;  %v1475_v58 = vld [vmem:[#allocation3 + $0x5d8] sm:$0xff] }
 0x3bf   :  { %2059 = vmatmul.f32.gmra.mxu3 %v1442_v2  ;;  %1727 = vperm.xlu1 %2901, %v1593_v41   ;;  %v1504_v41 = vld [vmem:[#allocation3 + $0x6c0] sm:$0xff] }
 0x3c1   :  { %v1899_v46 = vpop.f32.mrf.mxu2  ;;  %2172 = vmatmul.f32.gmra.mxu1 %v1443_v26  ;;  %v1591_v26 = vld [vmem:[#allocation13 + $0xb8] sm:$0xff] }
 0x3c2   :  { %v1900_v6 = vadd.f32 %v1899_v46, %v1787_v24  ;;  %v2012_v51 = vpop.f32.mrf.mxu3  ;;  %v1789_v14 = vpop.f32.mrf.mxu0  ;;  %v1480_v46 = vld [vmem:[#allocation3 + $0x600] sm:$0xff]  ;;  %1717 = vperm.xlu2 %2902, %v1591_v26  }
 0x3c3   :  { %v1790_v55 = vadd.f32 %v1789_v14, %v1623_v42  ;;  %v1643_v14 = vpop.permute.xlu2 %1642 }
 0x3c4   :  { %v2013_v0 = vadd.f32 %v2012_v51, %v1900_v6  ;;  %v1481_v6 = vld [vmem:[#allocation3 + $0x608] sm:$0xff] }
 0x3c5   :  { %1836 = vmatmul.f32.gmra.mxu0 %v1448_v31 }
 0x3c6   :  { %v3481_v35 = vadd.f32 %v2125_v16, %v2013_v0  ;;  %1949 = vmatmul.f32.gmra.mxu2 %v1449_v28  ;;  %v2128_v9 = vpop.f32.mrf.mxu1  ;;  %v1483_v28 = vld [vmem:[#allocation3 + $0x618] sm:$0xff] }
 0x3c7   :  { %2062 = vmatmul.f32.gmra.mxu3 %v1450_v37 }
 0x3c9   :  { %v1902_v57 = vpop.f32.mrf.mxu2  ;;  %2175 = vmatmul.f32.gmra.mxu1 %v1451_v47 }
 0x3ca   :  { %v1903_v18 = vadd.f32 %v1902_v57, %v1790_v55  ;;  %v2015_v59 = vpop.f32.mrf.mxu3  ;;  %v1792_v5 = vpop.f32.mrf.mxu0  ;;  %v1595_v55 = vld [vmem:[#allocation13 + $0xd8] sm:$0xff] }
 0x3cb   :  { %v1793_v39 = vadd.f32 %v1792_v5, %v1628_v10  ;;  %1737 = vperm.xlu0 %2900, %v1595_v55   ;;  %v1490_v5 = vld [vmem:[#allocation3 + $0x650] sm:$0xff]  ;;  %v1599_v55 = vld [vmem:[#allocation13 + $0xf8] sm:$0xff] }
 0x3cc   :  { %v2016_v11 = vadd.f32 %v2015_v59, %v1903_v18  ;;  %v1488_v18 = vld [vmem:[#allocation3 + $0x640] sm:$0xff]  ;;  %v1489_v59 = vld [vmem:[#allocation3 + $0x648] sm:$0xff] }
 0x3cd   :  { %1839 = vmatmul.f32.gmra.mxu0 %v1456_v7  ;;  %v1648_v7 = vpop.permute.xlu0 %1647 }
 0x3ce   :  { %v3483_v50 = vadd.f32 %v2128_v9, %v2016_v11  ;;  %1952 = vmatmul.f32.gmra.mxu2 %v1457_v8  ;;  %v2131_v17 = vpop.f32.mrf.mxu1 }
 0x3cf   :  { %2065 = vmatmul.f32.gmra.mxu3 %v1458_v13  ;;  %v1491_v13 = vld [vmem:[#allocation3 + $0x658] sm:$0xff] }
 0x3d1   :  { %v1905_v3 = vpop.f32.mrf.mxu2  ;;  %2178 = vmatmul.f32.gmra.mxu1 %v1459_v36 }
 0x3d2   :  { %v1906_v1 = vadd.f32 %v1905_v3, %v1793_v39  ;;  %v2018_v34 = vpop.f32.mrf.mxu3  ;;  %v1795_v29 = vpop.f32.mrf.mxu0  ;;  %v1596_v3 = vld [vmem:[#allocation13 + $0xe0] sm:$0xff] }
 0x3d3   :  { %v1796_v62 = vadd.f32 %v1795_v29, %v1633_v22  ;;  %1742 = vperm.xlu1 %2901, %v1596_v3   ;;  %v1499_v22 = vld [vmem:[#allocation3 + $0x698] sm:$0xff] }
 0x3d4   :  { %v2019_v20 = vadd.f32 %v2018_v34, %v1906_v1  ;;  %v1496_v34 = vld [vmem:[#allocation3 + $0x680] sm:$0xff] }
 0x3d5   :  { %1842 = vmatmul.f32.gmra.mxu0 %v1464_v27  ;;  %v1498_v27 = vld [vmem:[#allocation3 + $0x690] sm:$0xff] }
 0x3d6   :  { %v3485_v32 = vadd.f32 %v2131_v17, %v2019_v20  ;;  %1955 = vmatmul.f32.gmra.mxu2 %v1465_v33  ;;  %v2134_v30 = vpop.f32.mrf.mxu1  ;;  %v1653_v33 = vpop.permute.xlu1 %1652 }
 0x3d7   :  { %2068 = vmatmul.f32.gmra.mxu3 %v1466_v23 }
 0x3d9   :  { %v1908_v63 = vpop.f32.mrf.mxu2  ;;  %2181 = vmatmul.f32.gmra.mxu1 %v1467_v49 }
 0x3da   :  { %v1909_v38 = vadd.f32 %v1908_v63, %v1796_v62  ;;  %v2021_v40 = vpop.f32.mrf.mxu3  ;;  %v1798_v43 = vpop.f32.mrf.mxu0 }
 0x3db   :  { %v1799_v60 = vadd.f32 %v1798_v43, %v1638_v45  ;;  %v1505_v43 = vld [vmem:[#allocation3 + $0x6c8] sm:$0xff]  ;;  %1757 = vperm.xlu1 %2901, %v1599_v55  }
 0x3dc   :  { %v2022_v4 = vadd.f32 %v2021_v40, %v1909_v38  ;;  %v1594_v38 = vld [vmem:[#allocation13 + $0xd0] sm:$0xff] }
 0x3dd   :  { %1845 = vmatmul.f32.gmra.mxu0 %v1472_v25  ;;  %1732 = vperm.xlu2 %2902, %v1594_v38  }
 0x3de   :  { %v3487_v53 = vadd.f32 %v2134_v30, %v2022_v4  ;;  %1958 = vmatmul.f32.gmra.mxu2 %v1473_v44  ;;  %v2137_v48 = vpop.f32.mrf.mxu1  ;;  %v1506_v44 = vld [vmem:[#allocation3 + $0x6d0] sm:$0xff]  ;;  %v1658_v4 = vpop.permute.xlu2 %1657 }
 0x3df   :  { %2071 = vmatmul.f32.gmra.mxu3 %v1474_v52 }
 0x3e1   :  { %v1911_v2 = vpop.f32.mrf.mxu2  ;;  %2184 = vmatmul.f32.gmra.mxu1 %v1475_v58 }
 0x3e2   :  { %v1912_v61 = vadd.f32 %v1911_v2, %v1799_v60  ;;  %v2024_v16 = vpop.f32.mrf.mxu3  ;;  %v1801_v24 = vpop.f32.mrf.mxu0 }
 0x3e3   :  { %v1802_v0 = vadd.f32 %v1801_v24, %v1643_v14  ;;  %v1512_v24 = vld [vmem:[#allocation3 + $0x700] sm:$0xff] }
 0x3e4   :  { %v2025_v51 = vadd.f32 %v2024_v16, %v1912_v61  ;;  %v1598_v16 = vld [vmem:[#allocation13 + $0xf0] sm:$0xff] }
 0x3e5   :  { %1848 = vmatmul.f32.gmra.mxu0 %v1480_v46  ;;  %v1513_v46 = vld [vmem:[#allocation3 + $0x708] sm:$0xff]  ;;  %1752 = vperm.xlu0 %2900, %v1598_v16  }
 0x3e6   :  { %v3489_v42 = vadd.f32 %v2137_v48, %v2025_v51  ;;  %1961 = vmatmul.f32.gmra.mxu2 %v1481_v6  ;;  %v2140_v31 = vpop.f32.mrf.mxu1  ;;  %v1507_v48 = vld [vmem:[#allocation3 + $0x6d8] sm:$0xff]  ;;  %v1514_v51 = vld [vmem:[#allocation3 + $0x710] sm:$0xff] }
 0x3e7   :  { %2074 = vmatmul.f32.gmra.mxu3 %v1482_v12  ;;  %v1663_v12 = vpop.permute.xlu0 %1662 }
 0x3e9   :  { %v1914_v37 = vpop.f32.mrf.mxu2  ;;  %2187 = vmatmul.f32.gmra.mxu1 %v1483_v28  ;;  %v1515_v28 = vld [vmem:[#allocation3 + $0x718] sm:$0xff] }
 0x3ea   :  { %v1915_v9 = vadd.f32 %v1914_v37, %v1802_v0  ;;  %v2027_v47 = vpop.f32.mrf.mxu3  ;;  %v1804_v57 = vpop.f32.mrf.mxu0 }
 0x3eb   :  { %v1805_v10 = vadd.f32 %v1804_v57, %v1648_v7  ;;  %v1668_v7 = vpop.permute.xlu1 %1667 }
 0x3ec   :  { %v2028_v56 = vadd.f32 %v2027_v47, %v1915_v9 }
 0x3ed   :  { %1851 = vmatmul.f32.gmra.mxu0 %v1488_v18  ;;  %v1520_v18 = vld [vmem:[#allocation3 + $0x740] sm:$0xff] }
 0x3ee   :  { %v3491_v8 = vadd.f32 %v2140_v31, %v2028_v56  ;;  %1964 = vmatmul.f32.gmra.mxu2 %v1489_v59  ;;  %v2143_v11 = vpop.f32.mrf.mxu1  ;;  %v1521_v59 = vld [vmem:[#allocation3 + $0x748] sm:$0xff] }
 0x3ef   :  { %2077 = vmatmul.f32.gmra.mxu3 %v1490_v5  ;;  %v1522_v5 = vld [vmem:[#allocation3 + $0x750] sm:$0xff] }
 0x3f1   :  { %v1917_v17 = vpop.f32.mrf.mxu2  ;;  %2190 = vmatmul.f32.gmra.mxu1 %v1491_v13 }
 0x3f2   :  { %v1918_v36 = vadd.f32 %v1917_v17, %v1805_v10  ;;  %v2030_v39 = vpop.f32.mrf.mxu3  ;;  %v1807_v1 = vpop.f32.mrf.mxu0  ;;  %v1523_v10 = vld [vmem:[#allocation3 + $0x758] sm:$0xff] }
 0x3f3   :  { %v1808_v30 = vadd.f32 %v1807_v1, %v1653_v33  ;;  %v1597_v1 = vld [vmem:[#allocation13 + $0xe8] sm:$0xff]  ;;  %v1530_v33 = vld [vmem:[#allocation3 + $0x790] sm:$0xff] }
 0x3f4   :  { %v2031_v29 = vadd.f32 %v2030_v39, %v1918_v36  ;;  %1747 = vperm.xlu2 %2902, %v1597_v1  }
 0x3f5   :  { %1854 = vmatmul.f32.gmra.mxu0 %v1496_v34 }
 0x3f6   :  { %v3493_v20 = vadd.f32 %v2143_v11, %v2031_v29  ;;  %1967 = vmatmul.f32.gmra.mxu2 %v1497_v21  ;;  %v2146_v23 = vpop.f32.mrf.mxu1  ;;  %v1528_v21 = vld [vmem:[#allocation3 + $0x780] sm:$0xff]  ;;  %v1529_v29 = vld [vmem:[#allocation3 + $0x788] sm:$0xff] }
 0x3f7   :  { %2080 = vmatmul.f32.gmra.mxu3 %v1498_v27 }
 0x3f9   :  { %v1920_v49 = vpop.f32.mrf.mxu2  ;;  %2193 = vmatmul.f32.gmra.mxu1 %v1499_v22 }
 0x3fa   :  { %v1921_v62 = vadd.f32 %v1920_v49, %v1808_v30  ;;  %v2033_v63 = vpop.f32.mrf.mxu3  ;;  %v1810_v40 = vpop.f32.mrf.mxu0  ;;  %v1531_v49 = vld [vmem:[#allocation3 + $0x798] sm:$0xff] }
 0x3fb   :  { %v1811_v58 = vadd.f32 %v1810_v40, %v1658_v4  ;;  %v1538_v4 = vld [vmem:[#allocation3 + $0x7d0] sm:$0xff] }
 0x3fc   :  { %v2034_v25 = vadd.f32 %v2033_v63, %v1921_v62 }
 0x3fd   :  { %1857 = vmatmul.f32.gmra.mxu0 %v1504_v41 }
 0x3fe   :  { %v3495_v52 = vadd.f32 %v2146_v23, %v2034_v25  ;;  %1970 = vmatmul.f32.gmra.mxu2 %v1505_v43  ;;  %v2149_v45 = vpop.f32.mrf.mxu1  ;;  %v1673_v23 = vpop.permute.xlu2 %1672  ;;  %v1536_v43 = vld [vmem:[#allocation3 + $0x7c0] sm:$0xff]  ;;  %v1537_v25 = vld [vmem:[#allocation3 + $0x7c8] sm:$0xff] }
 0x3ff   :  { %2083 = vmatmul.f32.gmra.mxu3 %v1506_v44 }
 0x401   :  { %v1923_v60 = vpop.f32.mrf.mxu2  ;;  %2196 = vmatmul.f32.gmra.mxu1 %v1507_v48 }
 0x402   :  { %v1924_v2 = vadd.f32 %v1923_v60, %v1811_v58  ;;  %v2036_v61 = vpop.f32.mrf.mxu3  ;;  %v1813_v26 = vpop.f32.mrf.mxu0  ;;  %v1539_v60 = vld [vmem:[#allocation3 + $0x7d8] sm:$0xff] }
 0x403   :  { %v1814_v0 = vadd.f32 %v1813_v26, %v1663_v12  ;;  %v1294_v12 = vld [vmem:[#allocation3 + $0x30] sm:$0xff] }
 0x404   :  { %v2037_v6 = vadd.f32 %v2036_v61, %v1924_v2 }
 0x405   :  { %1860 = vmatmul.f32.gmra.mxu0 %v1512_v24 }
 0x406   :  { %v3497_v14 = vadd.f32 %v2149_v45, %v2037_v6  ;;  %1973 = vmatmul.f32.gmra.mxu2 %v1513_v46  ;;  %v2152_v31 = vpop.f32.mrf.mxu1  ;;  %v1678_v45 = vpop.permute.xlu0 %1677  ;;  %v1292_v46 = vld [vmem:[#allocation3 + $0x20] sm:$0xff]  ;;  %v1293_v6 = vld [vmem:[#allocation3 + $0x28] sm:$0xff] }
 0x407   :  { %2086 = vmatmul.f32.gmra.mxu3 %v1514_v51 }
 0x409   :  { %v1926_v37 = vpop.f32.mrf.mxu2  ;;  %2199 = vmatmul.f32.gmra.mxu1 %v1515_v28 }
 0x40a   :  { %v1927_v9 = vadd.f32 %v1926_v37, %v1814_v0  ;;  %v2039_v47 = vpop.f32.mrf.mxu3  ;;  %v1816_v57 = vpop.f32.mrf.mxu0  ;;  %v1303_v37 = vld [vmem:[#allocation3 + $0x78] sm:$0xff] }
 0x40b   :  { %v1817_v17 = vadd.f32 %v1816_v57, %v1668_v7  ;;  %v1302_v7 = vld [vmem:[#allocation3 + $0x70] sm:$0xff] }
 0x40c   :  { %v2040_v56 = vadd.f32 %v2039_v47, %v1927_v9 }
 0x40d   :  { %1863 = vmatmul.f32.gmra.mxu0 %v1520_v18 }
 0x40e   :  { %v3499_v11 = vadd.f32 %v2152_v31, %v2040_v56  ;;  %1976 = vmatmul.f32.gmra.mxu2 %v1521_v59  ;;  %v2155_v13 = vpop.f32.mrf.mxu1  ;;  %v1683_v31 = vpop.permute.xlu1 %1682  ;;  %v1300_v59 = vld [vmem:[#allocation3 + $0x60] sm:$0xff]  ;;  %v1301_v56 = vld [vmem:[#allocation3 + $0x68] sm:$0xff] }
 0x40f   :  { %2089 = vmatmul.f32.gmra.mxu3 %v1522_v5 }
 0x411   :  { %v1929_v36 = vpop.f32.mrf.mxu2  ;;  %2202 = vmatmul.f32.gmra.mxu1 %v1523_v10 }
 0x412   :  { %v1930_v39 = vadd.f32 %v1929_v36, %v1817_v17  ;;  %v2042_v3 = vpop.f32.mrf.mxu3  ;;  %v1819_v34 = vpop.f32.mrf.mxu0  ;;  %v1311_v36 = vld [vmem:[#allocation3 + $0xb8] sm:$0xff] }
 0x413   :  { %v1820_v62 = vadd.f32 %v1819_v34, %v1673_v23  ;;  %v1310_v23 = vld [vmem:[#allocation3 + $0xb0] sm:$0xff] }
 0x414   :  { %v2043_v27 = vadd.f32 %v2042_v3, %v1930_v39 }
 0x415   :  { %1866 = vmatmul.f32.gmra.mxu0 %v1528_v21 }
 0x416   :  { %v3501_v22 = vadd.f32 %v2155_v13, %v2043_v27  ;;  %1979 = vmatmul.f32.gmra.mxu2 %v1529_v29  ;;  %v2158_v30 = vpop.f32.mrf.mxu1  ;;  %v1688_v13 = vpop.permute.xlu2 %1687  ;;  %v1308_v29 = vld [vmem:[#allocation3 + $0xa0] sm:$0xff]  ;;  %v1309_v27 = vld [vmem:[#allocation3 + $0xa8] sm:$0xff] }
 0x417   :  { %2092 = vmatmul.f32.gmra.mxu3 %v1530_v33 }
 0x419   :  { %v1932_v63 = vpop.f32.mrf.mxu2  ;;  %2205 = vmatmul.f32.gmra.mxu1 %v1531_v49 }
 0x41a   :  { %v1933_v38 = vadd.f32 %v1932_v63, %v1820_v62  ;;  %v2045_v40 = vpop.f32.mrf.mxu3  ;;  %v1822_v41 = vpop.f32.mrf.mxu0  ;;  %v1319_v63 = vld [vmem:[#allocation3 + $0xf8] sm:$0xff] }
 0x41b   :  { %v1823_v2 = vadd.f32 %v1822_v41, %v1678_v45 }
 0x41c   :  { %v2046_v44 = vadd.f32 %v2045_v40, %v1933_v38 }
 0x41d   :  { %1869 = vmatmul.f32.gmra.mxu0 %v1536_v43 }
 0x41e   :  { %v3503_v48 = vadd.f32 %v2158_v30, %v2046_v44  ;;  %1982 = vmatmul.f32.gmra.mxu2 %v1537_v25  ;;  %v2161_v58 = vpop.f32.mrf.mxu1  ;;  %v1693_v30 = vpop.permute.xlu0 %1692  ;;  %v1316_v44 = vld [vmem:[#allocation3 + $0xe0] sm:$0xff] }
 0x41f   :  { %2095 = vmatmul.f32.gmra.mxu3 %v1538_v4  ;;  %v1317_v4 = vld [vmem:[#allocation3 + $0xe8] sm:$0xff] }
 0x421   :  { %v1935_v61 = vpop.f32.mrf.mxu2  ;;  %2208 = vmatmul.f32.gmra.mxu1 %v1539_v60  ;;  %v1698_v60 = vpop.permute.xlu1 %1697 }
 0x422   :  { %v1936_v16 = vadd.f32 %v1935_v61, %v1823_v2  ;;  %v2048_v26 = vpop.f32.mrf.mxu3  ;;  %v1825_v24 = vpop.f32.mrf.mxu0 }
 0x423   :  { %v1826_v9 = vadd.f32 %v1825_v24, %v1683_v31  ;;  %v1325_v31 = vld [vmem:[#allocation3 + $0x128] sm:$0xff] }
 0x424   :  { %v2049_v51 = vadd.f32 %v2048_v26, %v1936_v16  ;;  %v1327_v16 = vld [vmem:[#allocation3 + $0x138] sm:$0xff] }
 0x425   :  { %2228 = vmatmul.f32.vlgmr.msra.gmra.mxu0 %v1292_v46 }
 0x426   :  { %v3505_v28 = vadd.f32 %v2161_v58, %v2049_v51  ;;  %2341 = vmatmul.f32.vlgmr.msra.gmra.mxu2 %v1293_v6  ;;  %v2164_v0 = vpop.f32.mrf.mxu1  ;;  %v1318_v58 = vld [vmem:[#allocation3 + $0xf0] sm:$0xff] }
 0x427   :  { %2454 = vmatmul.f32.vlgmr.msra.gmra.mxu3 %v1294_v12  ;;  %v1324_v12 = vld [vmem:[#allocation3 + $0x120] sm:$0xff] }
 0x429   :  { %v1938_v47 = vpop.f32.mrf.mxu2  ;;  %2570 = vmatmul.f32.vlgmr.msra.gmra.mxu1 %v1303_v37  ;;  %v1326_v37 = vld [vmem:[#allocation3 + $0x130] sm:$0xff] }
 0x42a   :  { %v1939_v55 = vadd.f32 %v1938_v47, %v1826_v9  ;;  %v2051_v57 = vpop.f32.mrf.mxu3  ;;  %v1828_v18 = vpop.f32.mrf.mxu0 }
 0x42b   :  { %v1829_v39 = vadd.f32 %v1828_v18, %v1688_v13  ;;  %v1703_v9 = vpop.permute.xlu2 %1702  ;;  %v1332_v13 = vld [vmem:[#allocation3 + $0x160] sm:$0xff] }
 0x42c   :  { %v2052_v5 = vadd.f32 %v2051_v57, %v1939_v55  ;;  %v1335_v57 = vld [vmem:[#allocation3 + $0x178] sm:$0xff] }
 0x42d   :  { %2231 = vmatmul.f32.gmra.mxu0 %v1300_v59 }
 0x42e   :  { %v3507_v10 = vadd.f32 %v2164_v0, %v2052_v5  ;;  %2344 = vmatmul.f32.gmra.mxu2 %v1301_v56  ;;  %v2167_v17 = vpop.f32.mrf.mxu1 }
 0x42f   :  { %2457 = vmatmul.f32.gmra.mxu3 %v1302_v7 }
 0x431   :  { %v1941_v3 = vpop.f32.mrf.mxu2  ;;  %2573 = vmatmul.f32.gmra.mxu1 %v1311_v36 }
 0x432   :  { %v1942_v1 = vadd.f32 %v1941_v3, %v1829_v39  ;;  %v2054_v34 = vpop.f32.mrf.mxu3  ;;  %v1831_v21 = vpop.f32.mrf.mxu0  ;;  %v1334_v39 = vld [vmem:[#allocation3 + $0x170] sm:$0xff] }
 0x433   :  { %v1832_v38 = vadd.f32 %v1831_v21, %v1693_v30  ;;  %v1708_v3 = vpop.permute.xlu0 %1707  ;;  %v1343_v21 = vld [vmem:[#allocation3 + $0x1b8] sm:$0xff] }
 0x434   :  { %v2055_v33 = vadd.f32 %v2054_v34, %v1942_v1 }
 0x435   :  { %2234 = vmatmul.f32.gmra.mxu0 %v1308_v29 }
 0x436   :  { %v3509_v49 = vadd.f32 %v2167_v17, %v2055_v33  ;;  %2347 = vmatmul.f32.gmra.mxu2 %v1309_v27  ;;  %v2170_v62 = vpop.f32.mrf.mxu1  ;;  %v1333_v17 = vld [vmem:[#allocation3 + $0x168] sm:$0xff] }
 0x437   :  { %2460 = vmatmul.f32.gmra.mxu3 %v1310_v23 }
 0x439   :  { %v1944_v40 = vpop.f32.mrf.mxu2  ;;  %2576 = vmatmul.f32.gmra.mxu1 %v1319_v63  ;;  %v1341_v63 = vld [vmem:[#allocation3 + $0x1a8] sm:$0xff] }
 0x43a   :  { %v1945_v41 = vadd.f32 %v1944_v40, %v1832_v38  ;;  %v2057_v43 = vpop.f32.mrf.mxu3  ;;  %v1834_v25 = vpop.f32.mrf.mxu0  ;;  %v1342_v40 = vld [vmem:[#allocation3 + $0x1b0] sm:$0xff] }
 0x43b   :  { %v1835_v26 = vadd.f32 %v1834_v25, %v1698_v60 }
 0x43c   :  { %v2058_v45 = vadd.f32 %v2057_v43, %v1945_v41  ;;  %v1713_v41 = vpop.permute.xlu1 %1712 }
 0x43d   :  { %2237 = vmatmul.f32.gmra.mxu0 %v1316_v44  ;;  %v1351_v44 = vld [vmem:[#allocation3 + $0x1f8] sm:$0xff] }
 0x43e   :  { %v3511_v2 = vadd.f32 %v2170_v62, %v2058_v45  ;;  %2350 = vmatmul.f32.gmra.mxu2 %v1317_v4  ;;  %v2173_v61 = vpop.f32.mrf.mxu1  ;;  %v1340_v62 = vld [vmem:[#allocation3 + $0x1a0] sm:$0xff] }
 0x43f   :  { %2463 = vmatmul.f32.gmra.mxu3 %v1318_v58 }
 0x441   :  { %v1947_v24 = vpop.f32.mrf.mxu2  ;;  %2579 = vmatmul.f32.gmra.mxu1 %v1327_v16  ;;  %v1348_v16 = vld [vmem:[#allocation3 + $0x1e0] sm:$0xff] }
 0x442   :  { %v1948_v46 = vadd.f32 %v1947_v24, %v1835_v26  ;;  %v2060_v6 = vpop.f32.mrf.mxu3  ;;  %v1837_v51 = vpop.f32.mrf.mxu0  ;;  %v1349_v26 = vld [vmem:[#allocation3 + $0x1e8] sm:$0xff] }
 0x443   :  { %v1838_v18 = vadd.f32 %v1837_v51, %v1703_v9 }
 0x444   :  { %v2061_v0 = vadd.f32 %v2060_v6, %v1948_v46  ;;  %v1350_v46 = vld [vmem:[#allocation3 + $0x1f0] sm:$0xff]  ;;  %v1718_v6 = vpop.permute.xlu2 %1717 }
 0x445   :  { %2240 = vmatmul.f32.gmra.mxu0 %v1324_v12 }
 0x446   :  { %v3513_v47 = vadd.f32 %v2173_v61, %v2061_v0  ;;  %2353 = vmatmul.f32.gmra.mxu2 %v1325_v31  ;;  %v2176_v55 = vpop.f32.mrf.mxu1  ;;  %v1359_v31 = vld [vmem:[#allocation3 + $0x238] sm:$0xff] }
 0x447   :  { %2466 = vmatmul.f32.gmra.mxu3 %v1326_v37 }
 0x449   :  { %v1950_v59 = vpop.f32.mrf.mxu2  ;;  %2582 = vmatmul.f32.gmra.mxu1 %v1335_v57 }
 0x44a   :  { %v1951_v56 = vadd.f32 %v1950_v59, %v1838_v18  ;;  %v2063_v5 = vpop.f32.mrf.mxu3  ;;  %v1840_v7 = vpop.f32.mrf.mxu0  ;;  %v1356_v18 = vld [vmem:[#allocation3 + $0x220] sm:$0xff]  ;;  %v1357_v59 = vld [vmem:[#allocation3 + $0x228] sm:$0xff] }
 0x44b   :  { %v1841_v29 = vadd.f32 %v1840_v7, %v1708_v3  ;;  %v1723_v7 = vpop.permute.xlu0 %1722 }
 0x44c   :  { %v2064_v36 = vadd.f32 %v2063_v5, %v1951_v56  ;;  %v1358_v5 = vld [vmem:[#allocation3 + $0x230] sm:$0xff] }
 0x44d   :  { %2243 = vmatmul.f32.gmra.mxu0 %v1332_v13 }
 0x44e   :  { %v3515_v1 = vadd.f32 %v2176_v55, %v2064_v36  ;;  %2356 = vmatmul.f32.gmra.mxu2 %v1333_v17  ;;  %v2179_v34 = vpop.f32.mrf.mxu1  ;;  %v1367_v36 = vld [vmem:[#allocation3 + $0x278] sm:$0xff] }
 0x44f   :  { %2469 = vmatmul.f32.gmra.mxu3 %v1334_v39 }
 0x451   :  { %v1953_v27 = vpop.f32.mrf.mxu2  ;;  %2585 = vmatmul.f32.gmra.mxu1 %v1343_v21 }
 0x452   :  { %v1954_v33 = vadd.f32 %v1953_v27, %v1841_v29  ;;  %v2066_v23 = vpop.f32.mrf.mxu3  ;;  %v1843_v30 = vpop.f32.mrf.mxu0  ;;  %v1364_v27 = vld [vmem:[#allocation3 + $0x260] sm:$0xff] }
 0x453   :  { %v1844_v4 = vadd.f32 %v1843_v30, %v1713_v41  ;;  %v1366_v30 = vld [vmem:[#allocation3 + $0x270] sm:$0xff] }
 0x454   :  { %v2067_v38 = vadd.f32 %v2066_v23, %v1954_v33  ;;  %v1365_v33 = vld [vmem:[#allocation3 + $0x268] sm:$0xff] }
 0x455   :  { %2246 = vmatmul.f32.gmra.mxu0 %v1340_v62  ;;  %v1728_v62 = vpop.permute.xlu1 %1727 }
 0x456   :  { %v3517_v43 = vadd.f32 %v2179_v34, %v2067_v38  ;;  %2359 = vmatmul.f32.gmra.mxu2 %v1341_v63  ;;  %v2182_v25 = vpop.f32.mrf.mxu1 }
 0x457   :  { %2472 = vmatmul.f32.gmra.mxu3 %v1342_v40  ;;  %v1375_v40 = vld [vmem:[#allocation3 + $0x2b8] sm:$0xff] }
 0x459   :  { %v1956_v45 = vpop.f32.mrf.mxu2  ;;  %2588 = vmatmul.f32.gmra.mxu1 %v1351_v44 }
 0x45a   :  { %v1957_v58 = vadd.f32 %v1956_v45, %v1844_v4  ;;  %v2069_v60 = vpop.f32.mrf.mxu3  ;;  %v1846_v61 = vpop.f32.mrf.mxu0 }
 0x45b   :  { %v1847_v0 = vadd.f32 %v1846_v61, %v1718_v6  ;;  %v1383_v6 = vld [vmem:[#allocation3 + $0x2f8] sm:$0xff] }
 0x45c   :  { %v2070_v24 = vadd.f32 %v2069_v60, %v1957_v58  ;;  %v1372_v58 = vld [vmem:[#allocation3 + $0x2a0] sm:$0xff]  ;;  %v1373_v60 = vld [vmem:[#allocation3 + $0x2a8] sm:$0xff] }
 0x45d   :  { %2249 = vmatmul.f32.gmra.mxu0 %v1348_v16  ;;  %v1374_v16 = vld [vmem:[#allocation3 + $0x2b0] sm:$0xff] }
 0x45e   :  { %v3519_v51 = vadd.f32 %v2182_v25, %v2070_v24  ;;  %2362 = vmatmul.f32.gmra.mxu2 %v1349_v26  ;;  %v2185_v12 = vpop.f32.mrf.mxu1  ;;  %v1733_v26 = vpop.permute.xlu2 %1732 }
 0x45f   :  { %2475 = vmatmul.f32.gmra.mxu3 %v1350_v46 }
 0x461   :  { %v1959_v37 = vpop.f32.mrf.mxu2  ;;  %2591 = vmatmul.f32.gmra.mxu1 %v1359_v31 }
 0x462   :  { %v1960_v9 = vadd.f32 %v1959_v37, %v1847_v0  ;;  %v2072_v55 = vpop.f32.mrf.mxu3  ;;  %v1849_v57 = vpop.f32.mrf.mxu0 }
 0x463   :  { %v1850_v39 = vadd.f32 %v1849_v57, %v1723_v7  ;;  %v1381_v57 = vld [vmem:[#allocation3 + $0x2e8] sm:$0xff] }
 0x464   :  { %v2073_v56 = vadd.f32 %v2072_v55, %v1960_v9  ;;  %v1380_v55 = vld [vmem:[#allocation3 + $0x2e0] sm:$0xff] }
 0x465   :  { %2252 = vmatmul.f32.gmra.mxu0 %v1356_v18 }
 0x466   :  { %v3521_v13 = vadd.f32 %v2185_v12, %v2073_v56  ;;  %2365 = vmatmul.f32.gmra.mxu2 %v1357_v59  ;;  %v2188_v17 = vpop.f32.mrf.mxu1  ;;  %v1382_v59 = vld [vmem:[#allocation3 + $0x2f0] sm:$0xff]  ;;  %v1738_v56 = vpop.permute.xlu0 %1737 }
 0x467   :  { %2478 = vmatmul.f32.gmra.mxu3 %v1358_v5 }
 0x469   :  { %v1962_v3 = vpop.f32.mrf.mxu2  ;;  %2594 = vmatmul.f32.gmra.mxu1 %v1367_v36 }
 0x46a   :  { %v1963_v34 = vadd.f32 %v1962_v3, %v1850_v39  ;;  %v2075_v21 = vpop.f32.mrf.mxu3  ;;  %v1852_v29 = vpop.f32.mrf.mxu0 }
 0x46b   :  { %v1853_v41 = vadd.f32 %v1852_v29, %v1728_v62  ;;  %v1388_v29 = vld [vmem:[#allocation3 + $0x320] sm:$0xff] }
 0x46c   :  { %v2076_v23 = vadd.f32 %v2075_v21, %v1963_v34 }
 0x46d   :  { %2255 = vmatmul.f32.gmra.mxu0 %v1364_v27  ;;  %v1389_v27 = vld [vmem:[#allocation3 + $0x328] sm:$0xff] }
 0x46e   :  { %v3523_v63 = vadd.f32 %v2188_v17, %v2076_v23  ;;  %2368 = vmatmul.f32.gmra.mxu2 %v1365_v33  ;;  %v2191_v38 = vpop.f32.mrf.mxu1  ;;  %v1391_v17 = vld [vmem:[#allocation3 + $0x338] sm:$0xff]  ;;  %v1390_v23 = vld [vmem:[#allocation3 + $0x330] sm:$0xff] }
 0x46f   :  { %2481 = vmatmul.f32.gmra.mxu3 %v1366_v30  ;;  %v1743_v30 = vpop.permute.xlu1 %1742 }
 0x471   :  { %v1965_v25 = vpop.f32.mrf.mxu2  ;;  %2597 = vmatmul.f32.gmra.mxu1 %v1375_v40  ;;  %v1399_v40 = vld [vmem:[#allocation3 + $0x378] sm:$0xff] }
 0x472   :  { %v1966_v44 = vadd.f32 %v1965_v25, %v1853_v41  ;;  %v2078_v4 = vpop.f32.mrf.mxu3  ;;  %v1855_v45 = vpop.f32.mrf.mxu0 }
 0x473   :  { %v1856_v12 = vadd.f32 %v1855_v45, %v1733_v26  ;;  %v1748_v26 = vpop.permute.xlu2 %1747 }
 0x474   :  { %v2079_v61 = vadd.f32 %v2078_v4, %v1966_v44 }
 0x475   :  { %2258 = vmatmul.f32.gmra.mxu0 %v1372_v58  ;;  %v1396_v58 = vld [vmem:[#allocation3 + $0x360] sm:$0xff] }
 0x476   :  { %v3525_v24 = vadd.f32 %v2191_v38, %v2079_v61  ;;  %2371 = vmatmul.f32.gmra.mxu2 %v1373_v60  ;;  %v2194_v46 = vpop.f32.mrf.mxu1  ;;  %v1397_v60 = vld [vmem:[#allocation3 + $0x368] sm:$0xff] }
 0x477   :  { %2484 = vmatmul.f32.gmra.mxu3 %v1374_v16  ;;  %v1398_v16 = vld [vmem:[#allocation3 + $0x370] sm:$0xff] }
 0x479   :  { %v1968_v31 = vpop.f32.mrf.mxu2  ;;  %2600 = vmatmul.f32.gmra.mxu1 %v1383_v6 }
 0x47a   :  { %v1969_v0 = vadd.f32 %v1968_v31, %v1856_v12  ;;  %v2081_v37 = vpop.f32.mrf.mxu3  ;;  %v1858_v9 = vpop.f32.mrf.mxu0  ;;  %v1407_v12 = vld [vmem:[#allocation3 + $0x3b8] sm:$0xff] }
 0x47b   :  { %v1859_v36 = vadd.f32 %v1858_v9, %v1738_v56  ;;  %v1406_v56 = vld [vmem:[#allocation3 + $0x3b0] sm:$0xff] }
 0x47c   :  { %v2082_v18 = vadd.f32 %v2081_v37, %v1969_v0 }
 0x47d   :  { %2261 = vmatmul.f32.gmra.mxu0 %v1380_v55 }
 0x47e   :  { %v3527_v5 = vadd.f32 %v2194_v46, %v2082_v18  ;;  %2374 = vmatmul.f32.gmra.mxu2 %v1381_v57  ;;  %v2197_v7 = vpop.f32.mrf.mxu1  ;;  %v1404_v57 = vld [vmem:[#allocation3 + $0x3a0] sm:$0xff]  ;;  %v1405_v18 = vld [vmem:[#allocation3 + $0x3a8] sm:$0xff] }
 0x47f   :  { %2487 = vmatmul.f32.gmra.mxu3 %v1382_v59 }
 0x481   :  { %v1971_v39 = vpop.f32.mrf.mxu2  ;;  %2603 = vmatmul.f32.gmra.mxu1 %v1391_v17 }
 0x482   :  { %v1972_v3 = vadd.f32 %v1971_v39, %v1859_v36  ;;  %v2084_v34 = vpop.f32.mrf.mxu3  ;;  %v1861_v21 = vpop.f32.mrf.mxu0  ;;  %v1415_v39 = vld [vmem:[#allocation3 + $0x3f8] sm:$0xff] }
 0x483   :  { %v1862_v41 = vadd.f32 %v1861_v21, %v1743_v30 }
 0x484   :  { %v2085_v33 = vadd.f32 %v2084_v34, %v1972_v3 }
 0x485   :  { %2264 = vmatmul.f32.gmra.mxu0 %v1388_v29 }
 0x486   :  { %v3529_v62 = vadd.f32 %v2197_v7, %v2085_v33  ;;  %2377 = vmatmul.f32.gmra.mxu2 %v1389_v27  ;;  %v2200_v38 = vpop.f32.mrf.mxu1  ;;  %v1753_v7 = vpop.permute.xlu0 %1752  ;;  %v1412_v33 = vld [vmem:[#allocation3 + $0x3e0] sm:$0xff] }
 0x487   :  { %2490 = vmatmul.f32.gmra.mxu3 %v1390_v23  ;;  %v1413_v23 = vld [vmem:[#allocation3 + $0x3e8] sm:$0xff] }
 0x489   :  { %v1974_v25 = vpop.f32.mrf.mxu2  ;;  %2606 = vmatmul.f32.gmra.mxu1 %v1399_v40  ;;  %v1758_v40 = vpop.permute.xlu1 %1757 }
 0x48a   :  { %v1975_v44 = vadd.f32 %v1974_v25, %v1862_v41  ;;  %v2087_v4 = vpop.f32.mrf.mxu3  ;;  %v1864_v45 = vpop.f32.mrf.mxu0 }
 0x48b   :  { %v1865_v31 = vadd.f32 %v1864_v45, %v1748_v26  ;;  %v1421_v26 = vld [vmem:[#allocation3 + $0x428] sm:$0xff] }
 0x48c   :  { %v2088_v61 = vadd.f32 %v2087_v4, %v1975_v44  ;;  %v1423_v44 = vld [vmem:[#allocation3 + $0x438] sm:$0xff] }
 0x48d   :  { %2267 = vmatmul.f32.gmra.mxu0 %v1396_v58 }
 0x48e   :  { %v3531_v46 = vadd.f32 %v2200_v38, %v2088_v61  ;;  %2380 = vmatmul.f32.gmra.mxu2 %v1397_v60  ;;  %v2203_v6 = vpop.f32.mrf.mxu1  ;;  %v1414_v38 = vld [vmem:[#allocation3 + $0x3f0] sm:$0xff] }
 0x48f   :  { %2493 = vmatmul.f32.gmra.mxu3 %v1398_v16  ;;  %v1420_v16 = vld [vmem:[#allocation3 + $0x420] sm:$0xff] }
 0x491   :  { %v1977_v0 = vpop.f32.mrf.mxu2  ;;  %2609 = vmatmul.f32.gmra.mxu1 %v1407_v12  ;;  %v1422_v12 = vld [vmem:[#allocation3 + $0x430] sm:$0xff] }
 0x492   :  { %v1978_v37 = vadd.f32 %v1977_v0, %v1865_v31  ;;  %v2090_v9 = vpop.f32.mrf.mxu3  ;;  %v1867_v55 = vpop.f32.mrf.mxu0 }
 0x493   :  { %v1868_v3 = vadd.f32 %v1867_v55, %v1753_v7  ;;  %v1429_v7 = vld [vmem:[#allocation3 + $0x468] sm:$0xff] }
 0x494   :  { %v2091_v59 = vadd.f32 %v2090_v9, %v1978_v37  ;;  %v1431_v37 = vld [vmem:[#allocation3 + $0x478] sm:$0xff] }
 0x495   :  { %2270 = vmatmul.f32.gmra.mxu0 %v1404_v57 }
 0x496   :  { %v3533_v17 = vadd.f32 %v2203_v6, %v2091_v59  ;;  %2383 = vmatmul.f32.gmra.mxu2 %v1405_v18  ;;  %v2206_v36 = vpop.f32.mrf.mxu1 }
 0x497   :  { %2496 = vmatmul.f32.gmra.mxu3 %v1406_v56  ;;  %v1428_v56 = vld [vmem:[#allocation3 + $0x460] sm:$0xff] }
 0x499   :  { %v1980_v34 = vpop.f32.mrf.mxu2  ;;  %2612 = vmatmul.f32.gmra.mxu1 %v1415_v39  ;;  %v1430_v39 = vld [vmem:[#allocation3 + $0x470] sm:$0xff] }
 0x49a   :  { %v1981_v21 = vadd.f32 %v1980_v34, %v1868_v3  ;;  %v2093_v29 = vpop.f32.mrf.mxu3  ;;  %v1870_v27 = vpop.f32.mrf.mxu0  ;;  %v1439_v34 = vld [vmem:[#allocation3 + $0x4b8] sm:$0xff] }
 0x49b   :  { %v1871_v4 = vadd.f32 %v1870_v27, %v1758_v40  ;;  %v1438_v40 = vld [vmem:[#allocation3 + $0x4b0] sm:$0xff] }
 0x49c   :  { %v2094_v30 = vadd.f32 %v2093_v29, %v1981_v21 }
 0x49d   :  { %2273 = vmatmul.f32.gmra.mxu0 %v1412_v33 }
 0x49e   :  { %v3535_v41 = vadd.f32 %v2206_v36, %v2094_v30  ;;  %2386 = vmatmul.f32.gmra.mxu2 %v1413_v23  ;;  %v2209_v25 = vpop.f32.mrf.mxu1  ;;  %v1436_v23 = vld [vmem:[#allocation3 + $0x4a0] sm:$0xff]  ;;  %v1437_v30 = vld [vmem:[#allocation3 + $0x4a8] sm:$0xff] }
 0x49f   :  { %2499 = vmatmul.f32.gmra.mxu3 %v1414_v38 }
 0x4a1   :  { %v1983_v45 = vpop.f32.mrf.mxu2  ;;  %2615 = vmatmul.f32.gmra.mxu1 %v1423_v44 }
 0x4a2   :  { %v1984_v58 = vadd.f32 %v1983_v45, %v1871_v4  ;;  %v2096_v60 = vpop.f32.mrf.mxu3  ;;  %v2229_v61 = vpop.f32.mrf.mxu0  ;;  %v1447_v4 = vld [vmem:[#allocation3 + $0x4f8] sm:$0xff] }
 0x4a3   :  { %v2230_v9 = vadd.f32 %v2229_v61, %v3475_v19 }
 0x4a4   :  { %v2097_v6 = vadd.f32 %v2096_v60, %v1984_v58 }
 0x4a5   :  { %2276 = vmatmul.f32.gmra.mxu0 %v1420_v16 }
 0x4a6   :  { %v3537_v31 = vadd.f32 %v2209_v25, %v2097_v6  ;;  %2389 = vmatmul.f32.gmra.mxu2 %v1421_v26  ;;  %v2571_v0 = vpop.f32.mrf.mxu1  ;;  %v1444_v6 = vld [vmem:[#allocation3 + $0x4e0] sm:$0xff] }
 0x4a7   :  { %2502 = vmatmul.f32.gmra.mxu3 %v1422_v12  ;;  %v1445_v12 = vld [vmem:[#allocation3 + $0x4e8] sm:$0xff] }
 0x4a9   :  { %v2342_v55 = vpop.f32.mrf.mxu2  ;;  %2618 = vmatmul.f32.gmra.mxu1 %v1431_v37  ;;  %v1446_v37 = vld [vmem:[#allocation3 + $0x4f0] sm:$0xff] }
 0x4aa   :  { %v2343_v57 = vadd.f32 %v2342_v55, %v2230_v9  ;;  %v2455_v18 = vpop.f32.mrf.mxu3  ;;  %v2232_v59 = vpop.f32.mrf.mxu0  ;;  %v1455_v55 = vld [vmem:[#allocation3 + $0x538] sm:$0xff] }
 0x4ab   :  { %v2233_v21 = vadd.f32 %v2232_v59, %v3477_v54 }
 0x4ac   :  { %v3540_v36 = vadd.f32 %v2455_v18, %v2343_v57 }
 0x4ad   :  { %2279 = vmatmul.f32.gmra.mxu0 %v1428_v56 }
 0x4ae   :  { %2392 = vmatmul.f32.gmra.mxu2 %v1429_v7  ;;  %v2574_v3 = vpop.f32.mrf.mxu1 }
 0x4af   :  { %2505 = vmatmul.f32.gmra.mxu3 %v1430_v39 }
 0x4b1   :  { %v2345_v29 = vpop.f32.mrf.mxu2  ;;  %2621 = vmatmul.f32.gmra.mxu1 %v1439_v34  ;;  %v1452_v34 = vld [vmem:[#allocation3 + $0x520] sm:$0xff] }
 0x4b2   :  { %v2346_v27 = vadd.f32 %v2345_v29, %v2233_v21  ;;  %v2458_v19 = vpop.f32.mrf.mxu3  ;;  %v2235_v33 = vpop.f32.mrf.mxu0  ;;  %v1453_v21 = vld [vmem:[#allocation3 + $0x528] sm:$0xff] }
 0x4b3   :  { %v2236_v45 = vadd.f32 %v2235_v33, %v3479_v15  ;;  %v1463_v33 = vld [vmem:[#allocation3 + $0x578] sm:$0xff] }
 0x4b4   :  { %v2459_v38 = vadd.f32 %v2458_v19, %v2346_v27  ;;  %v1454_v27 = vld [vmem:[#allocation3 + $0x530] sm:$0xff] }
 0x4b5   :  { %2282 = vmatmul.f32.gmra.mxu0 %v1436_v23 }
 0x4b6   :  { %v2572_v25 = vadd.f32 %v2571_v0, %v2459_v38  ;;  %2395 = vmatmul.f32.gmra.mxu2 %v1437_v30  ;;  %v2577_v44 = vpop.f32.mrf.mxu1 }
 0x4b7   :  { %2508 = vmatmul.f32.gmra.mxu3 %v1438_v40 }
 0x4b8   :  { %vm2665_vm4 = vcmp.ge.f32.partialorder %v2572_v25, 0.0  ;;  %v2697_v58 = vmul.f32 0.33, %v2572_v25 }
 0x4b9   :  { %v2348_v54 = vpop.f32.mrf.mxu2  ;;  %2624 = vmatmul.f32.gmra.mxu1 %v1447_v4 }
 0x4ba   :  { %v2729_v60 = vsel %vm2665_vm4, %v2572_v25, %v2697_v58  ;;  %v2349_v61 = vadd.f32 %v2348_v54, %v2236_v45  ;;  %v2461_v16 = vpop.f32.mrf.mxu3  ;;  %v2238_v26 = vpop.f32.mrf.mxu0  ;;  %v1460_v45 = vld [vmem:[#allocation3 + $0x560] sm:$0xff]  ;;  %v1461_v58 = vld [vmem:[#allocation3 + $0x568] sm:$0xff] }
 0x4bb   :  { %2761 = vst.msk [vmem:[%s3711_s9 + $0x8] sm:$0xff] %vm119_vm0, %v2729_v60  ;;  %v2239_v57 = vadd.f32 %v2238_v26, %v3481_v35  ;;  %v1462_v60 = vld [vmem:[#allocation3 + $0x570] sm:$0xff] }
 0x4bc   :  { %v2462_v0 = vadd.f32 %v2461_v16, %v2349_v61  ;;  %v1471_v16 = vld [vmem:[#allocation3 + $0x5b8] sm:$0xff] }
 0x4bd   :  { %2285 = vmatmul.f32.gmra.mxu0 %v1444_v6 }
 0x4be   :  { %v2575_v9 = vadd.f32 %v2574_v3, %v2462_v0  ;;  %2398 = vmatmul.f32.gmra.mxu2 %v1445_v12  ;;  %v2580_v15 = vpop.f32.mrf.mxu1 }
 0x4bf   :  { %2511 = vmatmul.f32.gmra.mxu3 %v1446_v37 }
 0x4c0   :  { %vm2666_vm5 = vcmp.ge.f32.partialorder %v2575_v9, 0.0  ;;  %v2698_v18 = vmul.f32 0.33, %v2575_v9 }
 0x4c1   :  { %v2351_v59 = vpop.f32.mrf.mxu2  ;;  %2627 = vmatmul.f32.gmra.mxu1 %v1455_v55  ;;  %v1468_v55 = vld [vmem:[#allocation3 + $0x5a0] sm:$0xff] }
 0x4c2   :  { %v2730_v56 = vsel %vm2666_vm5, %v2575_v9, %v2698_v18  ;;  %v2352_v7 = vadd.f32 %v2351_v59, %v2239_v57  ;;  %v2464_v39 = vpop.f32.mrf.mxu3  ;;  %v2241_v3 = vpop.f32.mrf.mxu0  ;;  %v1469_v57 = vld [vmem:[#allocation3 + $0x5a8] sm:$0xff]  ;;  %v1470_v59 = vld [vmem:[#allocation3 + $0x5b0] sm:$0xff] }
 0x4c3   :  { %2762 = vst.msk [vmem:[%s3711_s9 + $0x10] sm:$0xff] %vm119_vm0, %v2730_v56  ;;  %v2242_v23 = vadd.f32 %v2241_v3, %v3483_v50 }
 0x4c4   :  { %v2465_v29 = vadd.f32 %v2464_v39, %v2352_v7  ;;  %v1479_v7 = vld [vmem:[#allocation3 + $0x5f8] sm:$0xff] }
 0x4c5   :  { %2288 = vmatmul.f32.gmra.mxu0 %v1452_v34 }
 0x4c6   :  { %v2578_v19 = vadd.f32 %v2577_v44, %v2465_v29  ;;  %2401 = vmatmul.f32.gmra.mxu2 %v1453_v21  ;;  %v2583_v35 = vpop.f32.mrf.mxu1 }
 0x4c7   :  { %2514 = vmatmul.f32.gmra.mxu3 %v1454_v27 }
 0x4c8   :  { %vm2667_vm6 = vcmp.ge.f32.partialorder %v2578_v19, 0.0  ;;  %v2699_v30 = vmul.f32 0.33, %v2578_v19 }
 0x4c9   :  { %v2354_v38 = vpop.f32.mrf.mxu2  ;;  %2630 = vmatmul.f32.gmra.mxu1 %v1463_v33  ;;  %v1477_v33 = vld [vmem:[#allocation3 + $0x5e8] sm:$0xff] }
 0x4ca   :  { %v2731_v40 = vsel %vm2667_vm6, %v2578_v19, %v2699_v30  ;;  %v2355_v25 = vadd.f32 %v2354_v38, %v2242_v23  ;;  %v2467_v4 = vpop.f32.mrf.mxu3  ;;  %v2244_v44 = vpop.f32.mrf.mxu0  ;;  %v1478_v30 = vld [vmem:[#allocation3 + $0x5f0] sm:$0xff] }
 0x4cb   :  { %2763 = vst.msk [vmem:[%s3711_s9 + $0x18] sm:$0xff] %vm119_vm0, %v2731_v40  ;;  %v2245_v26 = vadd.f32 %v2244_v44, %v3485_v32  ;;  %v1487_v40 = vld [vmem:[#allocation3 + $0x638] sm:$0xff] }
 0x4cc   :  { %v2468_v54 = vadd.f32 %v2467_v4, %v2355_v25 }
 0x4cd   :  { %2291 = vmatmul.f32.gmra.mxu0 %v1460_v45 }
 0x4ce   :  { %v2581_v61 = vadd.f32 %v2580_v15, %v2468_v54  ;;  %2404 = vmatmul.f32.gmra.mxu2 %v1461_v58  ;;  %v2586_v50 = vpop.f32.mrf.mxu1 }
 0x4cf   :  { %2517 = vmatmul.f32.gmra.mxu3 %v1462_v60 }
 0x4d0   :  { %vm2668_vm7 = vcmp.ge.f32.partialorder %v2581_v61, 0.0  ;;  %v2700_v6 = vmul.f32 0.33, %v2581_v61 }
 0x4d1   :  { %v2357_v12 = vpop.f32.mrf.mxu2  ;;  %2633 = vmatmul.f32.gmra.mxu1 %v1471_v16 }
 0x4d2   :  { %v2732_v0 = vsel %vm2668_vm7, %v2581_v61, %v2700_v6  ;;  %v2358_v37 = vadd.f32 %v2357_v12, %v2245_v26  ;;  %v2470_v9 = vpop.f32.mrf.mxu3  ;;  %v2247_v15 = vpop.f32.mrf.mxu0  ;;  %v1484_v61 = vld [vmem:[#allocation3 + $0x620] sm:$0xff]  ;;  %v1486_v26 = vld [vmem:[#allocation3 + $0x630] sm:$0xff]  ;;  %v1495_v12 = vld [vmem:[#allocation3 + $0x678] sm:$0xff] }
 0x4d3   :  { %2764 = vst.msk [vmem:[%s3711_s9 + $0x20] sm:$0xff] %vm119_vm0, %v2732_v0  ;;  %v2248_v39 = vadd.f32 %v2247_v15, %v3487_v53 }
 0x4d4   :  { %v2471_v18 = vadd.f32 %v2470_v9, %v2358_v37 }
 0x4d5   :  { %2294 = vmatmul.f32.gmra.mxu0 %v1468_v55 }
 0x4d6   :  { %v2584_v56 = vadd.f32 %v2583_v35, %v2471_v18  ;;  %2407 = vmatmul.f32.gmra.mxu2 %v1469_v57  ;;  %v2589_v32 = vpop.f32.mrf.mxu1  ;;  %v1476_v35 = vld [vmem:[#allocation3 + $0x5e0] sm:$0xff] }
 0x4d7   :  { %2520 = vmatmul.f32.gmra.mxu3 %v1470_v59  ;;  %v1492_v59 = vld [vmem:[#allocation3 + $0x660] sm:$0xff] }
 0x4d8   :  { %vm2669_vm8 = vcmp.ge.f32.partialorder %v2584_v56, 0.0  ;;  %v2701_v3 = vmul.f32 0.33, %v2584_v56 }
 0x4d9   :  { %v2360_v34 = vpop.f32.mrf.mxu2  ;;  %2636 = vmatmul.f32.gmra.mxu1 %v1479_v7  ;;  %v1494_v7 = vld [vmem:[#allocation3 + $0x670] sm:$0xff] }
 0x4da   :  { %v2733_v21 = vsel %vm2669_vm8, %v2584_v56, %v2701_v3  ;;  %v2361_v29 = vadd.f32 %v2360_v34, %v2248_v39  ;;  %v2473_v27 = vpop.f32.mrf.mxu3  ;;  %v2250_v19 = vpop.f32.mrf.mxu0  ;;  %v1493_v56 = vld [vmem:[#allocation3 + $0x668] sm:$0xff]  ;;  %v1503_v3 = vld [vmem:[#allocation3 + $0x6b8] sm:$0xff] }
 0x4db   :  { %2765 = vst.msk [vmem:[%s3711_s9 + $0x28] sm:$0xff] %vm119_vm0, %v2733_v21  ;;  %v2251_v25 = vadd.f32 %v2250_v19, %v3489_v42 }
 0x4dc   :  { %v2474_v23 = vadd.f32 %v2473_v27, %v2361_v29 }
 0x4dd   :  { %2297 = vmatmul.f32.gmra.mxu0 %v1476_v35 }
 0x4de   :  { %v2587_v38 = vadd.f32 %v2586_v50, %v2474_v23  ;;  %2410 = vmatmul.f32.gmra.mxu2 %v1477_v33  ;;  %v2592_v53 = vpop.f32.mrf.mxu1  ;;  %v1485_v50 = vld [vmem:[#allocation3 + $0x628] sm:$0xff]  ;;  %v1500_v23 = vld [vmem:[#allocation3 + $0x6a0] sm:$0xff] }
 0x4df   :  { %2523 = vmatmul.f32.gmra.mxu3 %v1478_v30  ;;  %v1501_v30 = vld [vmem:[#allocation3 + $0x6a8] sm:$0xff] }
 0x4e0   :  { %vm2670_vm9 = vcmp.ge.f32.partialorder %v2587_v38, 0.0  ;;  %v2702_v4 = vmul.f32 0.33, %v2587_v38 }
 0x4e1   :  { %v2363_v44 = vpop.f32.mrf.mxu2  ;;  %2639 = vmatmul.f32.gmra.mxu1 %v1487_v40 }
 0x4e2   :  { %v2734_v45 = vsel %vm2670_vm9, %v2587_v38, %v2702_v4  ;;  %v2364_v58 = vadd.f32 %v2363_v44, %v2251_v25  ;;  %v2476_v54 = vpop.f32.mrf.mxu3  ;;  %v2253_v60 = vpop.f32.mrf.mxu0  ;;  %v1511_v25 = vld [vmem:[#allocation3 + $0x6f8] sm:$0xff] }
 0x4e3   :  { %2766 = vst.msk [vmem:[%s3711_s9 + $0x30] sm:$0xff] %vm119_vm0, %v2734_v45  ;;  %v2254_v0 = vadd.f32 %v2253_v60, %v3491_v8 }
 0x4e4   :  { %v2477_v16 = vadd.f32 %v2476_v54, %v2364_v58 }
 0x4e5   :  { %2300 = vmatmul.f32.gmra.mxu0 %v1484_v61 }
 0x4e6   :  { %v2590_v6 = vadd.f32 %v2589_v32, %v2477_v16  ;;  %2413 = vmatmul.f32.gmra.mxu2 %v1485_v50  ;;  %v2595_v42 = vpop.f32.mrf.mxu1  ;;  %v1508_v50 = vld [vmem:[#allocation3 + $0x6e0] sm:$0xff]  ;;  %v1509_v16 = vld [vmem:[#allocation3 + $0x6e8] sm:$0xff] }
 0x4e7   :  { %2526 = vmatmul.f32.gmra.mxu3 %v1486_v26 }
 0x4e8   :  { %vm2671_vm10 = vcmp.ge.f32.partialorder %v2590_v6, 0.0  ;;  %v2703_v37 = vmul.f32 0.33, %v2590_v6 }
 0x4e9   :  { %v2366_v9 = vpop.f32.mrf.mxu2  ;;  %2642 = vmatmul.f32.gmra.mxu1 %v1495_v12  ;;  %v1519_v12 = vld [vmem:[#allocation3 + $0x738] sm:$0xff] }
 0x4ea   :  { %v2735_v15 = vsel %vm2671_vm10, %v2590_v6, %v2703_v37  ;;  %v2367_v55 = vadd.f32 %v2366_v9, %v2254_v0  ;;  %v2479_v57 = vpop.f32.mrf.mxu3  ;;  %v2256_v18 = vpop.f32.mrf.mxu0  ;;  %v1510_v6 = vld [vmem:[#allocation3 + $0x6f0] sm:$0xff] }
 0x4eb   :  { %2767 = vst.msk [vmem:[%s3711_s9 + $0x38] sm:$0xff] %vm119_vm0, %v2735_v15  ;;  %v2257_v34 = vadd.f32 %v2256_v18, %v3493_v20 }
 0x4ec   :  { %v2480_v32 = vadd.f32 %v2479_v57, %v2367_v55 }
 0x4ed   :  { %2303 = vmatmul.f32.gmra.mxu0 %v1492_v59  ;;  %v1516_v59 = vld [vmem:[#allocation3 + $0x720] sm:$0xff] }
 0x4ee   :  { %v2593_v39 = vadd.f32 %v2592_v53, %v2480_v32  ;;  %2416 = vmatmul.f32.gmra.mxu2 %v1493_v56  ;;  %v2598_v8 = vpop.f32.mrf.mxu1  ;;  %v1502_v53 = vld [vmem:[#allocation3 + $0x6b0] sm:$0xff]  ;;  %v1517_v56 = vld [vmem:[#allocation3 + $0x728] sm:$0xff] }
 0x4ef   :  { %2529 = vmatmul.f32.gmra.mxu3 %v1494_v7  ;;  %v1518_v7 = vld [vmem:[#allocation3 + $0x730] sm:$0xff] }
 0x4f0   :  { %vm2672_vm11 = vcmp.ge.f32.partialorder %v2593_v39, 0.0  ;;  %v2704_v21 = vmul.f32 0.33, %v2593_v39 }
 0x4f1   :  { %v2369_v29 = vpop.f32.mrf.mxu2  ;;  %2645 = vmatmul.f32.gmra.mxu1 %v1503_v3 }
 0x4f2   :  { %v2736_v27 = vsel %vm2672_vm11, %v2593_v39, %v2704_v21  ;;  %v2370_v19 = vadd.f32 %v2369_v29, %v2257_v34  ;;  %v2482_v35 = vpop.f32.mrf.mxu3  ;;  %v2259_v33 = vpop.f32.mrf.mxu0 }
 0x4f3   :  { %2768 = vst.msk [vmem:[%s3711_s9 + $0x40] sm:$0xff] %vm119_vm0, %v2736_v27  ;;  %v2260_v4 = vadd.f32 %v2259_v33, %v3495_v52  ;;  %v1524_v33 = vld [vmem:[#allocation3 + $0x760] sm:$0xff] }
 0x4f4   :  { %v2483_v38 = vadd.f32 %v2482_v35, %v2370_v19 }
 0x4f5   :  { %2306 = vmatmul.f32.gmra.mxu0 %v1500_v23  ;;  %v1525_v23 = vld [vmem:[#allocation3 + $0x768] sm:$0xff] }
 0x4f6   :  { %v2596_v40 = vadd.f32 %v2595_v42, %v2483_v38  ;;  %2419 = vmatmul.f32.gmra.mxu2 %v1501_v30  ;;  %v2601_v20 = vpop.f32.mrf.mxu1  ;;  %v1526_v38 = vld [vmem:[#allocation3 + $0x770] sm:$0xff] }
 0x4f7   :  { %2532 = vmatmul.f32.gmra.mxu3 %v1502_v53 }
 0x4f8   :  { %vm2673_vm12 = vcmp.ge.f32.partialorder %v2596_v40, 0.0  ;;  %v2705_v44 = vmul.f32 0.33, %v2596_v40 }
 0x4f9   :  { %v2372_v45 = vpop.f32.mrf.mxu2  ;;  %2648 = vmatmul.f32.gmra.mxu1 %v1511_v25 }
 0x4fa   :  { %v2737_v58 = vsel %vm2673_vm12, %v2596_v40, %v2705_v44  ;;  %v2373_v54 = vadd.f32 %v2372_v45, %v2260_v4  ;;  %v2485_v60 = vpop.f32.mrf.mxu3  ;;  %v2262_v61 = vpop.f32.mrf.mxu0  ;;  %v1535_v40 = vld [vmem:[#allocation3 + $0x7b8] sm:$0xff] }
 0x4fb   :  { %2769 = vst.msk [vmem:[%s3711_s9 + $0x48] sm:$0xff] %vm119_vm0, %v2737_v58  ;;  %v2263_v0 = vadd.f32 %v2262_v61, %v3497_v14  ;;  %v1533_v61 = vld [vmem:[#allocation3 + $0x7a8] sm:$0xff] }
 0x4fc   :  { %v2486_v26 = vadd.f32 %v2485_v60, %v2373_v54  ;;  %v1532_v60 = vld [vmem:[#allocation3 + $0x7a0] sm:$0xff] }
 0x4fd   :  { %2309 = vmatmul.f32.gmra.mxu0 %v1508_v50 }
 0x4fe   :  { %v2599_v42 = vadd.f32 %v2598_v8, %v2486_v26  ;;  %2422 = vmatmul.f32.gmra.mxu2 %v1509_v16  ;;  %v2604_v52 = vpop.f32.mrf.mxu1  ;;  %v1527_v8 = vld [vmem:[#allocation3 + $0x778] sm:$0xff]  ;;  %v1534_v16 = vld [vmem:[#allocation3 + $0x7b0] sm:$0xff] }
 0x4ff   :  { %2535 = vmatmul.f32.gmra.mxu3 %v1510_v6  ;;  %v1543_v6 = vld [vmem:[#allocation3 + $0x7f8] sm:$0xff] }
 0x500   :  { %vm2674_vm13 = vcmp.ge.f32.partialorder %v2599_v42, 0.0  ;;  %v2706_v37 = vmul.f32 0.33, %v2599_v42 }
 0x501   :  { %v2375_v9 = vpop.f32.mrf.mxu2  ;;  %2651 = vmatmul.f32.gmra.mxu1 %v1519_v12 }
 0x502   :  { %v2738_v15 = vsel %vm2674_vm13, %v2599_v42, %v2706_v37  ;;  %v2376_v55 = vadd.f32 %v2375_v9, %v2263_v0  ;;  %v2488_v57 = vpop.f32.mrf.mxu3  ;;  %v2265_v18 = vpop.f32.mrf.mxu0 }
 0x503   :  { %2770 = vst.msk [vmem:[%s3711_s9 + $0x50] sm:$0xff] %vm119_vm0, %v2738_v15  ;;  %v2266_v3 = vadd.f32 %v2265_v18, %v3499_v11 }
 0x504   :  { %v2489_v32 = vadd.f32 %v2488_v57, %v2376_v55  ;;  %v1540_v55 = vld [vmem:[#allocation3 + $0x7e0] sm:$0xff]  ;;  %v1541_v57 = vld [vmem:[#allocation3 + $0x7e8] sm:$0xff] }
 0x505   :  { %2312 = vmatmul.f32.gmra.mxu0 %v1516_v59  ;;  %v1542_v59 = vld [vmem:[#allocation3 + $0x7f0] sm:$0xff] }
 0x506   :  { %v2602_v39 = vadd.f32 %v2601_v20, %v2489_v32  ;;  %2425 = vmatmul.f32.gmra.mxu2 %v1517_v56  ;;  %v2607_v14 = vpop.f32.mrf.mxu1 }
 0x507   :  { %2538 = vmatmul.f32.gmra.mxu3 %v1518_v7 }
 0x508   :  { %vm2675_vm14 = vcmp.ge.f32.partialorder %v2602_v39, 0.0  ;;  %v2707_v34 = vmul.f32 0.33, %v2602_v39 }
 0x509   :  { %v2378_v21 = vpop.f32.mrf.mxu2  ;;  %2654 = vmatmul.f32.gmra.mxu1 %v1527_v8 }
 0x50a   :  { %v2739_v29 = vsel %vm2675_vm14, %v2602_v39, %v2707_v34  ;;  %v2379_v27 = vadd.f32 %v2378_v21, %v2266_v3  ;;  %v2491_v19 = vpop.f32.mrf.mxu3  ;;  %v2268_v35 = vpop.f32.mrf.mxu0  ;;  %v1295_v21 = vld [vmem:[#allocation3 + $0x38] sm:$0xff] }
 0x50b   :  { %2771 = vst.msk [vmem:[%s3711_s9 + $0x58] sm:$0xff] %vm119_vm0, %v2739_v29  ;;  %v2269_v20 = vadd.f32 %v2268_v35, %v3501_v22 }
 0x50c   :  { %v2492_v30 = vadd.f32 %v2491_v19, %v2379_v27 }
 0x50d   :  { %2315 = vmatmul.f32.gmra.mxu0 %v1524_v33 }
 0x50e   :  { %v2605_v53 = vadd.f32 %v2604_v52, %v2492_v30  ;;  %2428 = vmatmul.f32.gmra.mxu2 %v1525_v23  ;;  %v2610_v11 = vpop.f32.mrf.mxu1 }
 0x50f   :  { %2541 = vmatmul.f32.gmra.mxu3 %v1526_v38 }
 0x510   :  { %vm2676_vm15 = vcmp.ge.f32.partialorder %v2605_v53, 0.0  ;;  %v2708_v25 = vmul.f32 0.33, %v2605_v53 }
 0x511   :  { %v2381_v4 = vpop.f32.mrf.mxu2  ;;  %2657 = vmatmul.f32.gmra.mxu1 %v1535_v40 }
 0x512   :  { %v2740_v44 = vsel %vm2676_vm15, %v2605_v53, %v2708_v25  ;;  %v2382_v45 = vadd.f32 %v2381_v4, %v2269_v20  ;;  %v2494_v58 = vpop.f32.mrf.mxu3  ;;  %v2271_v54 = vpop.f32.mrf.mxu0 }
 0x513   :  { %2772 = vst.msk [vmem:[%s3711_s9 + $0x60] sm:$0xff] %vm119_vm0, %v2740_v44  ;;  %v2272_v42 = vadd.f32 %v2271_v54, %v3503_v48 }
 0x514   :  { %v2495_v50 = vadd.f32 %v2494_v58, %v2382_v45 }
 0x515   :  { %2318 = vmatmul.f32.gmra.mxu0 %v1532_v60 }
 0x516   :  { %v2608_v26 = vadd.f32 %v2607_v14, %v2495_v50  ;;  %2431 = vmatmul.f32.gmra.mxu2 %v1533_v61  ;;  %v2613_v22 = vpop.f32.mrf.mxu1 }
 0x517   :  { %2544 = vmatmul.f32.gmra.mxu3 %v1534_v16 }
 0x518   :  { %vm2677_vm1 = vcmp.ge.f32.partialorder %v2608_v26, 0.0  ;;  %v2709_v52 = vmul.f32 0.33, %v2608_v26 }
 0x519   :  { %v2384_v12 = vpop.f32.mrf.mxu2  ;;  %2660 = vmatmul.f32.gmra.mxu1 %v1543_v6 }
 0x51a   :  { %v2741_v0 = vsel %vm2677_vm1, %v2608_v26, %v2709_v52  ;;  %v2385_v37 = vadd.f32 %v2384_v12, %v2272_v42  ;;  %v2497_v9 = vpop.f32.mrf.mxu3  ;;  %v2274_v15 = vpop.f32.mrf.mxu0 }
 0x51b   :  { %2773 = vst.msk [vmem:[%s3711_s9 + $0x68] sm:$0xff] %vm119_vm0, %v2741_v0  ;;  %v2275_v32 = vadd.f32 %v2274_v15, %v3505_v28 }
 0x51c   :  { %v2498_v18 = vadd.f32 %v2497_v9, %v2385_v37 }
 0x51d   :  { %2321 = vmatmul.f32.gmra.mxu0 %v1540_v55 }
 0x51e   :  { %v2611_v56 = vadd.f32 %v2610_v11, %v2498_v18  ;;  %2434 = vmatmul.f32.gmra.mxu2 %v1541_v57  ;;  %v2616_v48 = vpop.f32.mrf.mxu1 }
 0x51f   :  { %2547 = vmatmul.f32.gmra.mxu3 %v1542_v59 }
 0x520   :  { %vm2678_vm2 = vcmp.ge.f32.partialorder %v2611_v56, 0.0  ;;  %v2710_v7 = vmul.f32 0.33, %v2611_v56 }
 0x521   :  { %v2387_v39 = vpop.f32.mrf.mxu2 }
 0x522   :  { %v2742_v14 = vsel %vm2678_vm2, %v2611_v56, %v2710_v7  ;;  %v2388_v8 = vadd.f32 %v2387_v39, %v2275_v32  ;;  %v2500_v3 = vpop.f32.mrf.mxu3  ;;  %v2277_v34 = vpop.f32.mrf.mxu0 }
 0x523   :  { %2774 = vst.msk [vmem:[%s3711_s9 + $0x70] sm:$0xff] %vm119_vm0, %v2742_v14  ;;  %v2278_v35 = vadd.f32 %v2277_v34, %v3507_v10 }
 0x524   :  { %v2501_v29 = vadd.f32 %v2500_v3, %v2388_v8 }
 0x525   :  { %2567 = vmatmul.f32.vlgmr.msrb.gmra.mxu0 %v1295_v21 }
 0x526   :  { %v2614_v27 = vadd.f32 %v2613_v22, %v2501_v29  ;;  %v2619_v19 = vpop.f32.mrf.mxu1 }
 0x528   :  { %vm2679_vm3 = vcmp.ge.f32.partialorder %v2614_v27, 0.0  ;;  %v2711_v28 = vmul.f32 0.33, %v2614_v27 }
 0x529   :  { %v2390_v33 = vpop.f32.mrf.mxu2 }
 0x52a   :  { %v2743_v23 = vsel %vm2679_vm3, %v2614_v27, %v2711_v28  ;;  %v2391_v30 = vadd.f32 %v2390_v33, %v2278_v35  ;;  %v2503_v38 = vpop.f32.mrf.mxu3  ;;  %v2280_v53 = vpop.f32.mrf.mxu0 }
 0x52b   :  { %2775 = vst.msk [vmem:[%s3711_s9 + $0x78] sm:$0xff] %vm119_vm0, %v2743_v23  ;;  %v2281_v25 = vadd.f32 %v2280_v53, %v3509_v49 }
 0x52c   :  { %v2504_v11 = vadd.f32 %v2503_v38, %v2391_v30 }
 0x52e   :  { %v2617_v40 = vadd.f32 %v2616_v48, %v2504_v11  ;;  %v2622_v20 = vpop.f32.mrf.mxu1 }
 0x530   :  { %vm2680_vm4 = vcmp.ge.f32.partialorder %v2617_v40, 0.0  ;;  %v2712_v4 = vmul.f32 0.33, %v2617_v40 }
 0x531   :  { %v2393_v10 = vpop.f32.mrf.mxu2 }
 0x532   :  { %v2744_v44 = vsel %vm2680_vm4, %v2617_v40, %v2712_v4  ;;  %v2394_v45 = vadd.f32 %v2393_v10, %v2281_v25  ;;  %v2506_v58 = vpop.f32.mrf.mxu3  ;;  %v2283_v54 = vpop.f32.mrf.mxu0 }
 0x533   :  { %2776 = vst.msk [vmem:[%s3711_s9 + $0x80] sm:$0xff] %vm119_vm0, %v2744_v44  ;;  %v2284_v16 = vadd.f32 %v2283_v54, %v3511_v2 }
 0x534   :  { %v2507_v60 = vadd.f32 %v2506_v58, %v2394_v45 }
 0x536   :  { %v2620_v61 = vadd.f32 %v2619_v19, %v2507_v60  ;;  %v2625_v50 = vpop.f32.mrf.mxu1 }
 0x538   :  { %vm2681_vm5 = vcmp.ge.f32.partialorder %v2620_v61, 0.0  ;;  %v2713_v26 = vmul.f32 0.33, %v2620_v61 }
 0x539   :  { %v2396_v49 = vpop.f32.mrf.mxu2 }
 0x53a   :  { %v2745_v22 = vsel %vm2681_vm5, %v2620_v61, %v2713_v26  ;;  %v2397_v6 = vadd.f32 %v2396_v49, %v2284_v16  ;;  %v2509_v42 = vpop.f32.mrf.mxu3  ;;  %v2286_v52 = vpop.f32.mrf.mxu0 }
 0x53b   :  { %2777 = vst.msk [vmem:[%s3711_s9 + $0x88] sm:$0xff] %vm119_vm0, %v2745_v22  ;;  %v2287_v9 = vadd.f32 %v2286_v52, %v3513_v47 }
 0x53c   :  { %v2510_v12 = vadd.f32 %v2509_v42, %v2397_v6 }
 0x53e   :  { %v2623_v0 = vadd.f32 %v2622_v20, %v2510_v12  ;;  %v2628_v37 = vpop.f32.mrf.mxu1 }
 0x540   :  { %vm2682_vm6 = vcmp.ge.f32.partialorder %v2623_v0, 0.0  ;;  %v2714_v15 = vmul.f32 0.33, %v2623_v0 }
 0x541   :  { %v2399_v2 = vpop.f32.mrf.mxu2 }
 0x542   :  { %v2746_v55 = vsel %vm2682_vm6, %v2623_v0, %v2714_v15  ;;  %v2400_v57 = vadd.f32 %v2399_v2, %v2287_v9  ;;  %v2512_v18 = vpop.f32.mrf.mxu3  ;;  %v2289_v59 = vpop.f32.mrf.mxu0 }
 0x543   :  { %2778 = vst.msk [vmem:[%s3711_s9 + $0x90] sm:$0xff] %vm119_vm0, %v2746_v55  ;;  %v2290_v7 = vadd.f32 %v2289_v59, %v3515_v1 }
 0x544   :  { %v2513_v56 = vadd.f32 %v2512_v18, %v2400_v57 }
 0x546   :  { %v2626_v48 = vadd.f32 %v2625_v50, %v2513_v56  ;;  %v2631_v32 = vpop.f32.mrf.mxu1 }
 0x548   :  { %vm2683_vm7 = vcmp.ge.f32.partialorder %v2626_v48, 0.0  ;;  %v2715_v39 = vmul.f32 0.33, %v2626_v48 }
 0x549   :  { %v2402_v47 = vpop.f32.mrf.mxu2 }
 0x54a   :  { %v2747_v14 = vsel %vm2683_vm7, %v2626_v48, %v2715_v39  ;;  %v2403_v8 = vadd.f32 %v2402_v47, %v2290_v7  ;;  %v2515_v3 = vpop.f32.mrf.mxu3  ;;  %v2292_v34 = vpop.f32.mrf.mxu0 }
 0x54b   :  { %2779 = vst.msk [vmem:[%s3711_s9 + $0x98] sm:$0xff] %vm119_vm0, %v2747_v14  ;;  %v2293_v19 = vadd.f32 %v2292_v34, %v3517_v43 }
 0x54c   :  { %v2516_v21 = vadd.f32 %v2515_v3, %v2403_v8 }
 0x54e   :  { %v2629_v29 = vadd.f32 %v2628_v37, %v2516_v21  ;;  %v2634_v27 = vpop.f32.mrf.mxu1 }
 0x550   :  { %vm2684_vm8 = vcmp.ge.f32.partialorder %v2629_v29, 0.0  ;;  %v2716_v35 = vmul.f32 0.33, %v2629_v29 }
 0x551   :  { %v2405_v1 = vpop.f32.mrf.mxu2 }
 0x552   :  { %v2748_v28 = vsel %vm2684_vm8, %v2629_v29, %v2716_v35  ;;  %v2406_v33 = vadd.f32 %v2405_v1, %v2293_v19  ;;  %v2518_v23 = vpop.f32.mrf.mxu3  ;;  %v2295_v30 = vpop.f32.mrf.mxu0 }
 0x553   :  { %2780 = vst.msk [vmem:[%s3711_s9 + $0xa0] sm:$0xff] %vm119_vm0, %v2748_v28  ;;  %v2296_v40 = vadd.f32 %v2295_v30, %v3519_v51 }
 0x554   :  { %v2519_v38 = vadd.f32 %v2518_v23, %v2406_v33 }
 0x556   :  { %v2632_v53 = vadd.f32 %v2631_v32, %v2519_v38  ;;  %v2637_v11 = vpop.f32.mrf.mxu1 }
 0x558   :  { %vm2685_vm9 = vcmp.ge.f32.partialorder %v2632_v53, 0.0  ;;  %v2717_v20 = vmul.f32 0.33, %v2632_v53 }
 0x559   :  { %v2408_v43 = vpop.f32.mrf.mxu2 }
 0x55a   :  { %v2749_v25 = vsel %vm2685_vm9, %v2632_v53, %v2717_v20  ;;  %v2409_v4 = vadd.f32 %v2408_v43, %v2296_v40  ;;  %v2521_v10 = vpop.f32.mrf.mxu3  ;;  %v2298_v44 = vpop.f32.mrf.mxu0 }
 0x55b   :  { %2781 = vst.msk [vmem:[%s3711_s9 + $0xa8] sm:$0xff] %vm119_vm0, %v2749_v25  ;;  %v2299_v60 = vadd.f32 %v2298_v44, %v3521_v13 }
 0x55c   :  { %v2522_v45 = vadd.f32 %v2521_v10, %v2409_v4 }
 0x55e   :  { %v2635_v58 = vadd.f32 %v2634_v27, %v2522_v45  ;;  %v2640_v54 = vpop.f32.mrf.mxu1 }
 0x560   :  { %vm2686_vm10 = vcmp.ge.f32.partialorder %v2635_v58, 0.0  ;;  %v2718_v61 = vmul.f32 0.33, %v2635_v58 }
 0x561   :  { %v2411_v51 = vpop.f32.mrf.mxu2 }
 0x562   :  { %v2750_v50 = vsel %vm2686_vm10, %v2635_v58, %v2718_v61  ;;  %v2412_v16 = vadd.f32 %v2411_v51, %v2299_v60  ;;  %v2524_v26 = vpop.f32.mrf.mxu3  ;;  %v2301_v49 = vpop.f32.mrf.mxu0 }
 0x563   :  { %2782 = vst.msk [vmem:[%s3711_s9 + $0xb0] sm:$0xff] %vm119_vm0, %v2750_v50  ;;  %v2302_v52 = vadd.f32 %v2301_v49, %v3523_v63 }
 0x564   :  { %v2525_v22 = vadd.f32 %v2524_v26, %v2412_v16 }
 0x566   :  { %v2638_v6 = vadd.f32 %v2637_v11, %v2525_v22  ;;  %v2643_v42 = vpop.f32.mrf.mxu1 }
 0x568   :  { %vm2687_vm11 = vcmp.ge.f32.partialorder %v2638_v6, 0.0  ;;  %v2719_v12 = vmul.f32 0.33, %v2638_v6 }
 0x569   :  { %v2414_v13 = vpop.f32.mrf.mxu2 }
 0x56a   :  { %v2751_v0 = vsel %vm2687_vm11, %v2638_v6, %v2719_v12  ;;  %v2415_v37 = vadd.f32 %v2414_v13, %v2302_v52  ;;  %v2527_v9 = vpop.f32.mrf.mxu3  ;;  %v2304_v15 = vpop.f32.mrf.mxu0 }
 0x56b   :  { %2783 = vst.msk [vmem:[%s3711_s9 + $0xb8] sm:$0xff] %vm119_vm0, %v2751_v0  ;;  %v2305_v57 = vadd.f32 %v2304_v15, %v3525_v24 }
 0x56c   :  { %v2528_v2 = vadd.f32 %v2527_v9, %v2415_v37 }
 0x56e   :  { %v2641_v55 = vadd.f32 %v2640_v54, %v2528_v2  ;;  %v2646_v63 = vpop.f32.mrf.mxu1 }
 0x570   :  { %vm2688_vm12 = vcmp.ge.f32.partialorder %v2641_v55, 0.0  ;;  %v2720_v18 = vmul.f32 0.33, %v2641_v55 }
 0x571   :  { %v2417_v59 = vpop.f32.mrf.mxu2 }
 0x572   :  { %v2752_v56 = vsel %vm2688_vm12, %v2641_v55, %v2720_v18  ;;  %v2418_v48 = vadd.f32 %v2417_v59, %v2305_v57  ;;  %v2530_v32 = vpop.f32.mrf.mxu3  ;;  %v2307_v7 = vpop.f32.mrf.mxu0 }
 0x573   :  { %2784 = vst.msk [vmem:[%s3711_s9 + $0xc0] sm:$0xff] %vm119_vm0, %v2752_v56  ;;  %v2308_v14 = vadd.f32 %v2307_v7, %v3527_v5 }
 0x574   :  { %v2531_v39 = vadd.f32 %v2530_v32, %v2418_v48 }
 0x576   :  { %v2644_v47 = vadd.f32 %v2643_v42, %v2531_v39  ;;  %v2649_v27 = vpop.f32.mrf.mxu1 }
 0x578   :  { %vm2689_vm13 = vcmp.ge.f32.partialorder %v2644_v47, 0.0  ;;  %v2721_v8 = vmul.f32 0.33, %v2644_v47 }
 0x579   :  { %v2420_v24 = vpop.f32.mrf.mxu2 }
 0x57a   :  { %v2753_v3 = vsel %vm2689_vm13, %v2644_v47, %v2721_v8  ;;  %v2421_v34 = vadd.f32 %v2420_v24, %v2308_v14  ;;  %v2533_v21 = vpop.f32.mrf.mxu3  ;;  %v2310_v29 = vpop.f32.mrf.mxu0 }
 0x57b   :  { %2785 = vst.msk [vmem:[%s3711_s9 + $0xc8] sm:$0xff] %vm119_vm0, %v2753_v3  ;;  %v2311_v1 = vadd.f32 %v2310_v29, %v3529_v62 }
 0x57c   :  { %v2534_v19 = vadd.f32 %v2533_v21, %v2421_v34 }
 0x57e   :  { %v2647_v35 = vadd.f32 %v2646_v63, %v2534_v19  ;;  %v2652_v11 = vpop.f32.mrf.mxu1 }
 0x580   :  { %vm2690_vm14 = vcmp.ge.f32.partialorder %v2647_v35, 0.0  ;;  %v2722_v28 = vmul.f32 0.33, %v2647_v35 }
 0x581   :  { %v2423_v5 = vpop.f32.mrf.mxu2 }
 0x582   :  { %v2754_v33 = vsel %vm2690_vm14, %v2647_v35, %v2722_v28  ;;  %v2424_v23 = vadd.f32 %v2423_v5, %v2311_v1  ;;  %v2536_v30 = vpop.f32.mrf.mxu3  ;;  %v2313_v38 = vpop.f32.mrf.mxu0 }
 0x583   :  { %2786 = vst.msk [vmem:[%s3711_s9 + $0xd0] sm:$0xff] %vm119_vm0, %v2754_v33  ;;  %v2314_v20 = vadd.f32 %v2313_v38, %v3531_v46 }
 0x584   :  { %v2537_v53 = vadd.f32 %v2536_v30, %v2424_v23 }
 0x586   :  { %v2650_v40 = vadd.f32 %v2649_v27, %v2537_v53  ;;  %v2655_v54 = vpop.f32.mrf.mxu1 }
 0x588   :  { %vm2691_vm15 = vcmp.ge.f32.partialorder %v2650_v40, 0.0  ;;  %v2723_v43 = vmul.f32 0.33, %v2650_v40 }
 0x589   :  { %v2426_v62 = vpop.f32.mrf.mxu2 }
 0x58a   :  { %v2755_v25 = vsel %vm2691_vm15, %v2650_v40, %v2723_v43  ;;  %v2427_v4 = vadd.f32 %v2426_v62, %v2314_v20  ;;  %v2539_v10 = vpop.f32.mrf.mxu3  ;;  %v2316_v44 = vpop.f32.mrf.mxu0 }
 0x58b   :  { %2787 = vst.msk [vmem:[%s3711_s9 + $0xd8] sm:$0xff] %vm119_vm0, %v2755_v25  ;;  %v2317_v60 = vadd.f32 %v2316_v44, %v3533_v17 }
 0x58c   :  { %v2540_v45 = vadd.f32 %v2539_v10, %v2427_v4 }
 0x58e   :  { %v2653_v58 = vadd.f32 %v2652_v11, %v2540_v45  ;;  %v2658_v17 = vpop.f32.mrf.mxu1 }
 0x590   :  { %vm2692_vm1 = vcmp.ge.f32.partialorder %v2653_v58, 0.0  ;;  %v2724_v61 = vmul.f32 0.33, %v2653_v58 }
 0x591   :  { %v2429_v46 = vpop.f32.mrf.mxu2 }
 0x592   :  { %v2756_v51 = vsel %vm2692_vm1, %v2653_v58, %v2724_v61  ;;  %v2430_v50 = vadd.f32 %v2429_v46, %v2317_v60  ;;  %v2542_v16 = vpop.f32.mrf.mxu3  ;;  %v2319_v26 = vpop.f32.mrf.mxu0 }
 0x593   :  { %2788 = vst.msk [vmem:[%s3711_s9 + $0xe0] sm:$0xff] %vm119_vm0, %v2756_v51  ;;  %v2320_v6 = vadd.f32 %v2319_v26, %v3535_v41 }
 0x594   :  { %v2543_v49 = vadd.f32 %v2542_v16, %v2430_v50 }
 0x596   :  { %v2656_v22 = vadd.f32 %v2655_v54, %v2543_v49  ;;  %v2661_v56 = vpop.f32.mrf.mxu1 }
 0x598   :  { %vm2693_vm2 = vcmp.ge.f32.partialorder %v2656_v22, 0.0  ;;  %v2725_v42 = vmul.f32 0.33, %v2656_v22 }
 0x599   :  { %v2432_v52 = vpop.f32.mrf.mxu2 }
 0x59a   :  { %v2757_v12 = vsel %vm2693_vm2, %v2656_v22, %v2725_v42  ;;  %v2433_v13 = vadd.f32 %v2432_v52, %v2320_v6  ;;  %v2545_v0 = vpop.f32.mrf.mxu3  ;;  %v2322_v37 = vpop.f32.mrf.mxu0 }
 0x59b   :  { %2789 = vst.msk [vmem:[%s3711_s9 + $0xe8] sm:$0xff] %vm119_vm0, %v2757_v12  ;;  %v2323_v2 = vadd.f32 %v2322_v37, %v3537_v31 }
 0x59c   :  { %v2546_v9 = vadd.f32 %v2545_v0, %v2433_v13 }
 0x59e   :  { %v2659_v15 = vadd.f32 %v2658_v17, %v2546_v9 }
 0x5a0   :  { %vm2694_vm3 = vcmp.ge.f32.partialorder %v2659_v15, 0.0  ;;  %v2726_v55 = vmul.f32 0.33, %v2659_v15 }
 0x5a1   :  { %v2435_v41 = vpop.f32.mrf.mxu2 }
 0x5a2   :  { %v2758_v57 = vsel %vm2694_vm3, %v2659_v15, %v2726_v55  ;;  %v2436_v18 = vadd.f32 %v2435_v41, %v2323_v2  ;;  %v2548_v59 = vpop.f32.mrf.mxu3  ;;  %v2568_v63 = vpop.f32.mrf.mxu0 }
 0x5a3   :  { %2790 = vst.msk [vmem:[%s3711_s9 + $0xf0] sm:$0xff] %vm119_vm0, %v2758_v57  ;;  %v2569_v32 = vadd.f32 %v2568_v63, %v3540_v36 }
 0x5a4   :  { %v2549_v48 = vadd.f32 %v2548_v59, %v2436_v18 }
 0x5a5   :  { %vm2664_vm4 = vcmp.ge.f32.partialorder %v2569_v32, 0.0  ;;  %v2696_v7 = vmul.f32 0.33, %v2569_v32 }
 0x5a6   :  { %v2662_v39 = vadd.f32 %v2661_v56, %v2549_v48 }
 0x5a7   :  { %v2728_v31 = vsel %vm2664_vm4, %v2569_v32, %v2696_v7 }
 0x5a8   :  { %vm2695_vm5 = vcmp.ge.f32.partialorder %v2662_v39, 0.0  ;;  %v2727_v47 = vmul.f32 0.33, %v2662_v39  ;;  %2760 = vst.msk [vmem:[%s3711_s9] sm:$0xff] %vm119_vm0, %v2728_v31 }
 0x5aa   :  { %v2759_v14 = vsel %vm2695_vm5, %v2662_v39, %v2727_v47 }
 0x5ab   :  { %2791 = vst.msk [vmem:[%s3711_s9 + $0xf8] sm:$0xff] %vm119_vm0, %v2759_v14 }
 0x5ac   :  { %2796 = vsyncpa [#allocation6], 1 }
 0x5ad   :  { %2797 = vsyncpa [#allocation9], 1 }
 0x5ae   :  { %2798 = vsyncpa [#allocation7], 1 }
 0x5af   :  { %2799 = vsyncpa [#allocation12], 1 }
 0x5b0   :  { %2800 = vsyncmov [#allocation4] }
 0x5b3   :  { %s2801_s24 = vpop.sfrf %2800 }
 0x5b4   :  { %p2836_p0 = scmp.ne.s32.totalorder %s2801_s24, 0 }
 0x5b6   :  { %2805 = shalt.err (%p2836_p0)  }

</bundles_post_ra>
